<compile_context>
chip_gen: v6e
topology: v6e:2x2x1
jax: 0.10.0
libtpu: 0.0.40
codegen_flags: <defaults>
</compile_context>

<pallas_src>
import functools
import math

import jax
import jax.numpy as jnp
from jax.experimental import pallas as pl
from jax.experimental.pallas import tpu as pltpu


# ----------------------------------------------------------------------------
# Small helpers (work on plain values; used inside the kernel and the ref)
# ----------------------------------------------------------------------------
def _apply_act(y, mode):
    if mode == "relu":
        return jnp.maximum(y, 0.0)
    if mode == "leaky":
        return jnp.where(y > 0.0, y, 0.01 * y)
    if mode == "tanh":
        return jnp.tanh(y)
    if mode == "sigmoid":
        return 1.0 / (1.0 + jnp.exp(-y))
    return y


def _dense(x, w, b):
    return jnp.dot(x, w, preferred_element_type=jnp.float32) + b


def _layernorm(x, g, b, eps=1e-5):
    mu = jnp.mean(x, axis=-1, keepdims=True)
    xc = x - mu
    var = jnp.mean(xc * xc, axis=-1, keepdims=True)
    return xc * jax.lax.rsqrt(var + eps) * g + b


def _softmax_rows(y):
    m = jnp.max(y, axis=-1, keepdims=True)
    p = jnp.exp(y - m)
    return p / jnp.sum(p, axis=-1, keepdims=True)


# ----------------------------------------------------------------------------
# The single fused Generator kernel (stem + depth blocks + readouts)
# ----------------------------------------------------------------------------
# Fixed ordering of the stacked per-block parameters (w, b interleaved):
_BLOCK_ORDER = ("ln1", "q", "k", "v", "e", "out_e", "out_n",
                "ln3", "ln4", "ln5", "ln6",
                "mlp_n_fc1", "mlp_n_fc2", "mlp_e_fc1", "mlp_e_fc2")
_N_STEM, _N_BLOCK, _N_RO = 8, 2 * len(_BLOCK_ORDER), 4   # 8, 30, 4


def _generator_kernel(zn_ref, zec_ref, *refs, heads, act):
    stem = refs[:_N_STEM]
    blk = refs[_N_STEM:_N_STEM + _N_BLOCK]
    ro = refs[_N_STEM + _N_BLOCK:_N_STEM + _N_BLOCK + _N_RO]
    node_out, edge_out, nsamp_out, esamp_out = refs[_N_STEM + _N_BLOCK + _N_RO:]

    wn1, bn1, wn2, bn2, we1, be1, we2, be2 = stem
    (ln1g, ln1b, wq, bq, wk, bk, wv, bv, wee, bee, woe, boe, won, bon,
     ln3g, ln3b, ln4g, ln4b, ln5g, ln5b, ln6g, ln6b,
     wmn1, bmn1, wmn2, bmn2, wme1, bme1, wme2, bme2) = blk
    wrn, brn, wre, bre = ro

    n = zn_ref.shape[1]
    n2 = n * n
    dim = wn2.shape[-1]
    depth = wq.shape[0]
    scale = 1.0 / math.sqrt(dim // heads)

    zn = zn_ref[0]            # [N, nodes]
    zec = zec_ref[0]          # [2*N^2, edges]  (z_e rows followed by z_e^T rows)

    # ---- input stems ----
    x = _apply_act(_dense(_apply_act(_dense(zn, wn1[...], bn1[...]), act),
                          wn2[...], bn2[...]), act)                     # [N, D]
    ec = _apply_act(_dense(_apply_act(_dense(zec, we1[...], be1[...]), act),
                           we2[...], be2[...]), act)                    # [2N^2, D]
    # edge = (edge + edge.permute(0,2,1,3)) / 2 : rows [n2:] are the MLP of the
    # pre-transposed input, so symmetrization is a static slice + average.
    edge = 0.5 * (ec[:n2] + ec[n2:])                                    # [N^2, D]

    # ---- TransformerEncoder blocks (depth is small -> static unroll) ----
    for d in range(depth):
        x1 = _layernorm(x, ln1g[d], ln1b[d])
        q = _dense(x1, wq[d], bq[d]) * scale      # fold 1/sqrt(dk) into q (N,D)
        k = _dense(x1, wk[d], bk[d])
        v = _dense(x1, wv[d], bv[d])
        e3 = _dense(edge, wee[d], bee[d]).reshape(n, n, dim)

        # channel-separable attention logits, modulated by the edge features
        a = q[:, None, :] * k[None, :, :]          # [N(q), N(k), D]
        a = a * (e3 + 1.0) * e3

        # edge path uses the PRE-softmax modulated logits (matches DrugGEN)
        edge_attn = _dense(a.reshape(n2, dim), woe[d], boe[d])

        # per-channel softmax over the key axis; normalize AFTER the reduction
        m = jnp.max(a, axis=1, keepdims=True)
        p = jnp.exp(a - m)
        s = jnp.sum(p, axis=1)                     # [N, D]
        ctx = jnp.sum(p * v[None, :, :], axis=1) / s
        node_attn = _dense(ctx, won[d], bon[d])

        # residuals + LayerNorms + MLPs
        x2 = _layernorm(x1 + node_attn, ln3g[d], ln3b[d])
        y2 = _layernorm(edge + edge_attn, ln4g[d], ln4b[d])
        mx = _dense(_apply_act(_dense(x2, wmn1[d], bmn1[d]), act), wmn2[d], bmn2[d])
        my = _dense(_apply_act(_dense(y2, wme1[d], bme1[d]), act), wme2[d], bme2[d])
        x = _layernorm(x2 + mx, ln5g[d], ln5b[d])
        edge = _layernorm(y2 + my, ln6g[d], ln6b[d])

    # ---- readouts (lane-dense 128-col padded logits; pads carry -1e30 bias) ----
    nsamp_out[0] = _softmax_rows(_dense(x, wrn[...], brn[...]))
    esamp_out[0] = _softmax_rows(_dense(edge, wre[...], bre[...]))
    node_out[0] = x
    edge_out[0] = edge


def _const_spec(w):
    nd = w.ndim
    return pl.BlockSpec(w.shape, lambda b, _nd=nd: (0,) * _nd)


def generator_forward(params, z_e, z_n, *, heads, act="relu"):
    B, N, n_nodes = z_n.shape
    n_edges = z_e.shape[-1]
    N2 = N * N
    dim = params["stem"][3].shape[-1]
    pad_n = params["readout"][0].shape[-1]
    pad_e = params["readout"][2].shape[-1]

    # Transpose of the tiny raw edge input (cheapest tensor in the model),
    # concatenated so one stem matmul chain yields both orderings.
    z_e2 = z_e.reshape(B, N2, n_edges)
    z_e2t = jnp.transpose(z_e, (0, 2, 1, 3)).reshape(B, N2, n_edges)
    z_ec = jnp.concatenate([z_e2, z_e2t], axis=1)          # (B, 2*N^2, edges)

    flat_w = list(params["stem"]) + list(params["blocks"]) + list(params["readout"])
    in_specs = ([pl.BlockSpec((1, N, n_nodes), lambda b: (b, 0, 0)),
                 pl.BlockSpec((1, 2 * N2, n_edges), lambda b: (b, 0, 0))]
                + [_const_spec(w) for w in flat_w])
    out_shape = (jax.ShapeDtypeStruct((B, N, dim), jnp.float32),
                 jax.ShapeDtypeStruct((B, N2, dim), jnp.float32),
                 jax.ShapeDtypeStruct((B, N, pad_n), jnp.float32),
                 jax.ShapeDtypeStruct((B, N2, pad_e), jnp.float32))
    out_specs = (pl.BlockSpec((1, N, dim), lambda b: (b, 0, 0)),
                 pl.BlockSpec((1, N2, dim), lambda b: (b, 0, 0)),
                 pl.BlockSpec((1, N, pad_n), lambda b: (b, 0, 0)),
                 pl.BlockSpec((1, N2, pad_e), lambda b: (b, 0, 0)))

    node, edge2, nsp, esp = pl.pallas_call(
        functools.partial(_generator_kernel, heads=heads, act=act),
        out_shape=out_shape,
        grid=(B,),
        in_specs=in_specs,
        out_specs=out_specs,
        compiler_params=pltpu.CompilerParams(
            dimension_semantics=("parallel",),
            vmem_limit_bytes=32 * 1024 * 1024),
    )(z_n, z_ec, *flat_w)

    edge = edge2.reshape(B, N, N, dim)
    node_sample = nsp[:, :, :n_nodes]
    edge_sample = esp[:, :, :n_edges].reshape(B, N, N, n_edges)
    return node, edge, node_sample, edge_sample


# ----------------------------------------------------------------------------
# Parameter initialization (PyTorch-Linear-like uniform init, kernel-packed:
# per-block weights stacked on a leading depth axis, readouts padded to 128
# lanes at init so no per-call padding ops remain in the forward).
# ----------------------------------------------------------------------------
def _init_linear(key, fan_in, fan_out):
    kw, kb = jax.random.split(key)
    bound = 1.0 / math.sqrt(fan_in)
    w = jax.random.uniform(kw, (fan_in, fan_out), jnp.float32, -bound, bound)
    b = jax.random.uniform(kb, (1, fan_out), jnp.float32, -bound, bound)
    return w, b


def _init_layernorm(dim):
    return (jnp.ones((1, dim), jnp.float32), jnp.zeros((1, dim), jnp.float32))


def init_generator_params(key, *, vertexes, edges, nodes, dim, depth, heads, mlp_ratio):
    del vertexes, heads
    hid = dim * mlp_ratio
    n_lin = 4 + 10 * depth + 2
    keys = iter(jax.random.split(key, n_lin))
    lin = lambda fi, fo: _init_linear(next(keys), fi, fo)

    wn1, bn1 = lin(nodes, 64)
    wn2, bn2 = lin(64, dim)
    we1, be1 = lin(edges, 64)
    we2, be2 = lin(64, dim)
    stem = [wn1, bn1, wn2, bn2, we1, be1, we2, be2]

    per_block = []
    for _ in range(depth):
        blk = {
            "ln1": _init_layernorm(dim),
            "q": lin(dim, dim), "k": lin(dim, dim), "v": lin(dim, dim),
            "e": lin(dim, dim), "out_e": lin(dim, dim), "out_n": lin(dim, dim),
            "ln3": _init_layernorm(dim), "ln4": _init_layernorm(dim),
            "ln5": _init_layernorm(dim), "ln6": _init_layernorm(dim),
            "mlp_n_fc1": lin(dim, hid), "mlp_n_fc2": lin(hid, dim),
            "mlp_e_fc1": lin(dim, hid), "mlp_e_fc2": lin(hid, dim),
        }
        per_block.append(blk)

    blocks = []
    for name in _BLOCK_ORDER:
        blocks.append(jnp.stack([b[name][0] for b in per_block], axis=0))
        blocks.append(jnp.stack([b[name][1] for b in per_block], axis=0))

    wrn, brn = lin(dim, nodes)
    wre, bre = lin(dim, edges)
    pad_n = max(128, ((nodes + 127) // 128) * 128)
    pad_e = max(128, ((edges + 127) // 128) * 128)
    # zero-pad weights; pad bias with -1e30 so padded logits vanish (f32 softmax)
    readout = [
        jnp.pad(wrn, ((0, 0), (0, pad_n - nodes))),
        jnp.pad(brn, ((0, 0), (0, pad_n - nodes)), constant_values=-1e30),
        jnp.pad(wre, ((0, 0), (0, pad_e - edges))),
        jnp.pad(bre, ((0, 0), (0, pad_e - edges)), constant_values=-1e30),
    ]
    return {"stem": stem, "blocks": blocks, "readout": readout}


# ----------------------------------------------------------------------------
# Pure-JAX reference (same math, no Pallas) for a correctness cross-check
# ----------------------------------------------------------------------------
def reference_forward(params, z_e, z_n, *, heads, act="relu"):
    wn1, bn1, wn2, bn2, we1, be1, we2, be2 = params["stem"]
    (ln1g, ln1b, wq, bq, wk, bk, wv, bv, wee, bee, woe, boe, won, bon,
     ln3g, ln3b, ln4g, ln4b, ln5g, ln5b, ln6g, ln6b,
     wmn1, bmn1, wmn2, bmn2, wme1, bme1, wme2, bme2) = params["blocks"]
    wrn, brn, wre, bre = params["readout"]

    B, N, n_nodes = z_n.shape
    n_edges = z_e.shape[-1]
    dim = wn2.shape[-1]
    depth = wq.shape[0]
    scale = 1.0 / math.sqrt(dim // heads)

    def ln(x, g, b, eps=1e-5):
        mu = x.mean(-1, keepdims=True)
        xc = x - mu
        var = (xc * xc).mean(-1, keepdims=True)
        return xc / jnp.sqrt(var + eps) * g + b

    x = _apply_act(_apply_act(z_n @ wn1 + bn1, act) @ wn2 + bn2, act)
    e = _apply_act(_apply_act(z_e @ we1 + be1, act) @ we2 + be2, act)
    y = 0.5 * (e + jnp.transpose(e, (0, 2, 1, 3)))

    for d in range(depth):
        x1 = ln(x, ln1g[d], ln1b[d])
        q = x1 @ wq[d] + bq[d]
        k = x1 @ wk[d] + bk[d]
        v = x1 @ wv[d] + bv[d]
        el = y @ wee[d] + bee[d]
        a = (q[:, :, None, :] * k[:, None, :, :]) * scale
        a = a * (el + 1.0) * el
        edge_attn = a @ woe[d] + boe[d]
        attn = jax.nn.softmax(a, axis=2)
        ctx = jnp.sum(attn * v[:, None, :, :], axis=2)
        node_attn = ctx @ won[d] + bon[d]
        x2 = ln(x1 + node_attn, ln3g[d], ln3b[d])
        y2 = ln(y + edge_attn, ln4g[d], ln4b[d])
        mx = _apply_act(x2 @ wmn1[d] + bmn1[d], act) @ wmn2[d] + bmn2[d]
        my = _apply_act(y2 @ wme1[d] + bme1[d], act) @ wme2[d] + bme2[d]
        x = ln(x2 + mx, ln5g[d], ln5b[d])
        y = ln(y2 + my, ln6g[d], ln6b[d])

    ns = jax.nn.softmax(x @ wrn[:, :n_nodes] + brn[:, :n_nodes], -1)
    es = jax.nn.softmax(y @ wre[:, :n_edges] + bre[:, :n_edges], -1)
    return x, y, ns, es


# ----------------------------------------------------------------------------
if __name__ == "__main__":
    Z_DIM, VERTEXES, EDGES, NODES = 16, 8, 4, 5
    DIM, DEPTH, HEADS, MLP_RATIO = 32, 2, 4, 2
    B = 2

    key = jax.random.PRNGKey(0)
    kp, ke, kn = jax.random.split(key, 3)

    params = init_generator_params(
        kp, vertexes=VERTEXES, edges=EDGES, nodes=NODES,
        dim=DIM, depth=DEPTH, heads=HEADS, mlp_ratio=MLP_RATIO)

    z_e = jax.random.normal(ke, (B, VERTEXES, VERTEXES, EDGES), jnp.float32)
    z_n = jax.random.normal(kn, (B, VERTEXES, NODES), jnp.float32)

    fwd = jax.jit(functools.partial(generator_forward, heads=HEADS, act="relu"))
    node, edge, node_sample, edge_sample = fwd(params, z_e, z_n)
    jax.block_until_ready((node, edge, node_sample, edge_sample))

    # shape / sanity checks
    assert node.shape == (B, VERTEXES, DIM)
    assert edge.shape == (B, VERTEXES, VERTEXES, DIM)
    assert node_sample.shape == (B, VERTEXES, NODES)
    assert edge_sample.shape == (B, VERTEXES, VERTEXES, EDGES)
    assert bool(jnp.allclose(jnp.sum(node_sample, axis=-1), 1.0, atol=1e-4))
    assert bool(jnp.allclose(jnp.sum(edge_sample, axis=-1), 1.0, atol=1e-4))
    assert bool(jnp.all(jnp.isfinite(node))) and bool(jnp.all(jnp.isfinite(edge)))

    # cross-check against the pure-JAX reference
    rn, re_, rns, res = reference_forward(params, z_e, z_n, heads=HEADS, act="relu")
    assert bool(jnp.allclose(node, rn, atol=2e-3, rtol=2e-3))
    assert bool(jnp.allclose(edge, re_, atol=2e-3, rtol=2e-3))
    assert bool(jnp.allclose(node_sample, rns, atol=2e-3, rtol=2e-3))
    assert bool(jnp.allclose(edge_sample, res, atol=2e-3, rtol=2e-3))

    print("KERNEL_OK")
</pallas_src>

<mosaic_0001>
module attributes {stable_mosaic.version = 11 : i64} {
  func.func @_generator_kernel(%arg0: i32, %arg1: memref<1x8x5xf32, #tpu.memory_space<vmem>>, %arg2: memref<1x128x4xf32, #tpu.memory_space<vmem>>, %arg3: memref<5x64xf32, #tpu.memory_space<vmem>>, %arg4: memref<1x64xf32, #tpu.memory_space<vmem>>, %arg5: memref<64x32xf32, #tpu.memory_space<vmem>>, %arg6: memref<1x32xf32, #tpu.memory_space<vmem>>, %arg7: memref<4x64xf32, #tpu.memory_space<vmem>>, %arg8: memref<1x64xf32, #tpu.memory_space<vmem>>, %arg9: memref<64x32xf32, #tpu.memory_space<vmem>>, %arg10: memref<1x32xf32, #tpu.memory_space<vmem>>, %arg11: memref<2x1x32xf32, #tpu.memory_space<vmem>>, %arg12: memref<2x1x32xf32, #tpu.memory_space<vmem>>, %arg13: memref<2x32x32xf32, #tpu.memory_space<vmem>>, %arg14: memref<2x1x32xf32, #tpu.memory_space<vmem>>, %arg15: memref<2x32x32xf32, #tpu.memory_space<vmem>>, %arg16: memref<2x1x32xf32, #tpu.memory_space<vmem>>, %arg17: memref<2x32x32xf32, #tpu.memory_space<vmem>>, %arg18: memref<2x1x32xf32, #tpu.memory_space<vmem>>, %arg19: memref<2x32x32xf32, #tpu.memory_space<vmem>>, %arg20: memref<2x1x32xf32, #tpu.memory_space<vmem>>, %arg21: memref<2x32x32xf32, #tpu.memory_space<vmem>>, %arg22: memref<2x1x32xf32, #tpu.memory_space<vmem>>, %arg23: memref<2x32x32xf32, #tpu.memory_space<vmem>>, %arg24: memref<2x1x32xf32, #tpu.memory_space<vmem>>, %arg25: memref<2x1x32xf32, #tpu.memory_space<vmem>>, %arg26: memref<2x1x32xf32, #tpu.memory_space<vmem>>, %arg27: memref<2x1x32xf32, #tpu.memory_space<vmem>>, %arg28: memref<2x1x32xf32, #tpu.memory_space<vmem>>, %arg29: memref<2x1x32xf32, #tpu.memory_space<vmem>>, %arg30: memref<2x1x32xf32, #tpu.memory_space<vmem>>, %arg31: memref<2x1x32xf32, #tpu.memory_space<vmem>>, %arg32: memref<2x1x32xf32, #tpu.memory_space<vmem>>, %arg33: memref<2x32x64xf32, #tpu.memory_space<vmem>>, %arg34: memref<2x1x64xf32, #tpu.memory_space<vmem>>, %arg35: memref<2x64x32xf32, #tpu.memory_space<vmem>>, %arg36: memref<2x1x32xf32, #tpu.memory_space<vmem>>, %arg37: memref<2x32x64xf32, #tpu.memory_space<vmem>>, %arg38: memref<2x1x64xf32, #tpu.memory_space<vmem>>, %arg39: memref<2x64x32xf32, #tpu.memory_space<vmem>>, %arg40: memref<2x1x32xf32, #tpu.memory_space<vmem>>, %arg41: memref<32x128xf32, #tpu.memory_space<vmem>>, %arg42: memref<1x128xf32, #tpu.memory_space<vmem>>, %arg43: memref<32x128xf32, #tpu.memory_space<vmem>>, %arg44: memref<1x128xf32, #tpu.memory_space<vmem>>, %arg45: memref<1x8x32xf32, #tpu.memory_space<vmem>>, %arg46: memref<1x64x32xf32, #tpu.memory_space<vmem>>, %arg47: memref<1x8x128xf32, #tpu.memory_space<vmem>>, %arg48: memref<1x64x128xf32, #tpu.memory_space<vmem>>) attributes {dimension_semantics = [#tpu.dimension_semantics<parallel>], iteration_bounds = array<i64: 2>, scalar_prefetch = 0 : i64, scratch_operands = 0 : i64, tpu.core_type = #tpu.core_type<tc>, window_params = [{transform_indices = @transform_0, window_bounds = array<i64: 1, 8, 5>}, {transform_indices = @transform_1, window_bounds = array<i64: 1, 128, 4>}, {pipeline_mode = #tpu.pipeline_mode<synchronous>, transform_indices = @transform_2, window_bounds = array<i64: 5, 64>}, {pipeline_mode = #tpu.pipeline_mode<synchronous>, transform_indices = @transform_3, window_bounds = array<i64: 1, 64>}, {pipeline_mode = #tpu.pipeline_mode<synchronous>, transform_indices = @transform_4, window_bounds = array<i64: 64, 32>}, {pipeline_mode = #tpu.pipeline_mode<synchronous>, transform_indices = @transform_5, window_bounds = array<i64: 1, 32>}, {pipeline_mode = #tpu.pipeline_mode<synchronous>, transform_indices = @transform_6, window_bounds = array<i64: 4, 64>}, {pipeline_mode = #tpu.pipeline_mode<synchronous>, transform_indices = @transform_7, window_bounds = array<i64: 1, 64>}, {pipeline_mode = #tpu.pipeline_mode<synchronous>, transform_indices = @transform_8, window_bounds = array<i64: 64, 32>}, {pipeline_mode = #tpu.pipeline_mode<synchronous>, transform_indices = @transform_9, window_bounds = array<i64: 1, 32>}, {pipeline_mode = #tpu.pipeline_mode<synchronous>, transform_indices = @transform_10, window_bounds = array<i64: 2, 1, 32>}, {pipeline_mode = #tpu.pipeline_mode<synchronous>, transform_indices = @transform_11, window_bounds = array<i64: 2, 1, 32>}, {pipeline_mode = #tpu.pipeline_mode<synchronous>, transform_indices = @transform_12, window_bounds = array<i64: 2, 32, 32>}, {pipeline_mode = #tpu.pipeline_mode<synchronous>, transform_indices = @transform_13, window_bounds = array<i64: 2, 1, 32>}, {pipeline_mode = #tpu.pipeline_mode<synchronous>, transform_indices = @transform_14, window_bounds = array<i64: 2, 32, 32>}, {pipeline_mode = #tpu.pipeline_mode<synchronous>, transform_indices = @transform_15, window_bounds = array<i64: 2, 1, 32>}, {pipeline_mode = #tpu.pipeline_mode<synchronous>, transform_indices = @transform_16, window_bounds = array<i64: 2, 32, 32>}, {pipeline_mode = #tpu.pipeline_mode<synchronous>, transform_indices = @transform_17, window_bounds = array<i64: 2, 1, 32>}, {pipeline_mode = #tpu.pipeline_mode<synchronous>, transform_indices = @transform_18, window_bounds = array<i64: 2, 32, 32>}, {pipeline_mode = #tpu.pipeline_mode<synchronous>, transform_indices = @transform_19, window_bounds = array<i64: 2, 1, 32>}, {pipeline_mode = #tpu.pipeline_mode<synchronous>, transform_indices = @transform_20, window_bounds = array<i64: 2, 32, 32>}, {pipeline_mode = #tpu.pipeline_mode<synchronous>, transform_indices = @transform_21, window_bounds = array<i64: 2, 1, 32>}, {pipeline_mode = #tpu.pipeline_mode<synchronous>, transform_indices = @transform_22, window_bounds = array<i64: 2, 32, 32>}, {pipeline_mode = #tpu.pipeline_mode<synchronous>, transform_indices = @transform_23, window_bounds = array<i64: 2, 1, 32>}, {pipeline_mode = #tpu.pipeline_mode<synchronous>, transform_indices = @transform_24, window_bounds = array<i64: 2, 1, 32>}, {pipeline_mode = #tpu.pipeline_mode<synchronous>, transform_indices = @transform_25, window_bounds = array<i64: 2, 1, 32>}, {pipeline_mode = #tpu.pipeline_mode<synchronous>, transform_indices = @transform_26, window_bounds = array<i64: 2, 1, 32>}, {pipeline_mode = #tpu.pipeline_mode<synchronous>, transform_indices = @transform_27, window_bounds = array<i64: 2, 1, 32>}, {pipeline_mode = #tpu.pipeline_mode<synchronous>, transform_indices = @transform_28, window_bounds = array<i64: 2, 1, 32>}, {pipeline_mode = #tpu.pipeline_mode<synchronous>, transform_indices = @transform_29, window_bounds = array<i64: 2, 1, 32>}, {pipeline_mode = #tpu.pipeline_mode<synchronous>, transform_indices = @transform_30, window_bounds = array<i64: 2, 1, 32>}, {pipeline_mode = #tpu.pipeline_mode<synchronous>, transform_indices = @transform_31, window_bounds = array<i64: 2, 1, 32>}, {pipeline_mode = #tpu.pipeline_mode<synchronous>, transform_indices = @transform_32, window_bounds = array<i64: 2, 32, 64>}, {pipeline_mode = #tpu.pipeline_mode<synchronous>, transform_indices = @transform_33, window_bounds = array<i64: 2, 1, 64>}, {pipeline_mode = #tpu.pipeline_mode<synchronous>, transform_indices = @transform_34, window_bounds = array<i64: 2, 64, 32>}, {pipeline_mode = #tpu.pipeline_mode<synchronous>, transform_indices = @transform_35, window_bounds = array<i64: 2, 1, 32>}, {pipeline_mode = #tpu.pipeline_mode<synchronous>, transform_indices = @transform_36, window_bounds = array<i64: 2, 32, 64>}, {pipeline_mode = #tpu.pipeline_mode<synchronous>, transform_indices = @transform_37, window_bounds = array<i64: 2, 1, 64>}, {pipeline_mode = #tpu.pipeline_mode<synchronous>, transform_indices = @transform_38, window_bounds = array<i64: 2, 64, 32>}, {pipeline_mode = #tpu.pipeline_mode<synchronous>, transform_indices = @transform_39, window_bounds = array<i64: 2, 1, 32>}, {pipeline_mode = #tpu.pipeline_mode<synchronous>, transform_indices = @transform_40, window_bounds = array<i64: 32, 128>}, {pipeline_mode = #tpu.pipeline_mode<synchronous>, transform_indices = @transform_41, window_bounds = array<i64: 1, 128>}, {pipeline_mode = #tpu.pipeline_mode<synchronous>, transform_indices = @transform_42, window_bounds = array<i64: 32, 128>}, {pipeline_mode = #tpu.pipeline_mode<synchronous>, transform_indices = @transform_43, window_bounds = array<i64: 1, 128>}, {transform_indices = @transform_44, window_bounds = array<i64: 1, 8, 32>}, {transform_indices = @transform_45, window_bounds = array<i64: 1, 64, 32>}, {transform_indices = @transform_46, window_bounds = array<i64: 1, 8, 128>}, {transform_indices = @transform_47, window_bounds = array<i64: 1, 64, 128>}]} {
    %c0 = arith.constant 0 : index
    %c0_0 = arith.constant 0 : index
    %c0_1 = arith.constant 0 : index
    %0 = vector.load %arg1[%c0, %c0_0, %c0_1] : memref<1x8x5xf32, #tpu.memory_space<vmem>>, vector<1x8x5xf32>
    %1 = vector.shape_cast %0 : vector<1x8x5xf32> to vector<8x5xf32>
    %c0_2 = arith.constant 0 : index
    %c0_3 = arith.constant 0 : index
    %c0_4 = arith.constant 0 : index
    %2 = vector.load %arg2[%c0_2, %c0_3, %c0_4] : memref<1x128x4xf32, #tpu.memory_space<vmem>>, vector<1x128x4xf32>
    %3 = vector.shape_cast %2 : vector<1x128x4xf32> to vector<128x4xf32>
    %c0_5 = arith.constant 0 : index
    %c0_6 = arith.constant 0 : index
    %4 = vector.load %arg3[%c0_5, %c0_6] : memref<5x64xf32, #tpu.memory_space<vmem>>, vector<5x64xf32>
    %c0_7 = arith.constant 0 : index
    %c0_8 = arith.constant 0 : index
    %5 = vector.load %arg4[%c0_7, %c0_8] : memref<1x64xf32, #tpu.memory_space<vmem>>, vector<1x64xf32>
    %cst = arith.constant dense<0.000000e+00> : vector<8x64xf32>
    %6 = tpu.matmul %1, %4, %cst {dimension_numbers = #tpu.dot_dimension_numbers<[1], [0], [0], [1], [0, 0, 1, 1], [], []>} : vector<8x5xf32>, vector<5x64xf32>, vector<8x64xf32> -> vector<8x64xf32>
    %7 = vector.broadcast %5 : vector<1x64xf32> to vector<8x64xf32>
    %8 = arith.addf %6, %7 : vector<8x64xf32>
    %cst_9 = arith.constant 0.000000e+00 : f32
    %9 = vector.broadcast %cst_9 : f32 to vector<8x64xf32>
    %10 = arith.maximumf %8, %9 : vector<8x64xf32>
    %c0_10 = arith.constant 0 : index
    %c0_11 = arith.constant 0 : index
    %11 = vector.load %arg5[%c0_10, %c0_11] : memref<64x32xf32, #tpu.memory_space<vmem>>, vector<64x32xf32>
    %c0_12 = arith.constant 0 : index
    %c0_13 = arith.constant 0 : index
    %12 = vector.load %arg6[%c0_12, %c0_13] : memref<1x32xf32, #tpu.memory_space<vmem>>, vector<1x32xf32>
    %cst_14 = arith.constant dense<0.000000e+00> : vector<8x32xf32>
    %13 = tpu.matmul %10, %11, %cst_14 {dimension_numbers = #tpu.dot_dimension_numbers<[1], [0], [0], [1], [0, 0, 1, 1], [], []>} : vector<8x64xf32>, vector<64x32xf32>, vector<8x32xf32> -> vector<8x32xf32>
    %14 = vector.broadcast %12 : vector<1x32xf32> to vector<8x32xf32>
    %15 = arith.addf %13, %14 : vector<8x32xf32>
    %cst_15 = arith.constant 0.000000e+00 : f32
    %16 = vector.broadcast %cst_15 : f32 to vector<8x32xf32>
    %17 = arith.maximumf %15, %16 : vector<8x32xf32>
    %c0_16 = arith.constant 0 : index
    %c0_17 = arith.constant 0 : index
    %18 = vector.load %arg7[%c0_16, %c0_17] : memref<4x64xf32, #tpu.memory_space<vmem>>, vector<4x64xf32>
    %c0_18 = arith.constant 0 : index
    %c0_19 = arith.constant 0 : index
    %19 = vector.load %arg8[%c0_18, %c0_19] : memref<1x64xf32, #tpu.memory_space<vmem>>, vector<1x64xf32>
    %cst_20 = arith.constant dense<0.000000e+00> : vector<128x64xf32>
    %20 = tpu.matmul %3, %18, %cst_20 {dimension_numbers = #tpu.dot_dimension_numbers<[1], [0], [0], [1], [0, 0, 1, 1], [], []>} : vector<128x4xf32>, vector<4x64xf32>, vector<128x64xf32> -> vector<128x64xf32>
    %21 = vector.broadcast %19 : vector<1x64xf32> to vector<128x64xf32>
    %22 = arith.addf %20, %21 : vector<128x64xf32>
    %cst_21 = arith.constant 0.000000e+00 : f32
    %23 = vector.broadcast %cst_21 : f32 to vector<128x64xf32>
    %24 = arith.maximumf %22, %23 : vector<128x64xf32>
    %c0_22 = arith.constant 0 : index
    %c0_23 = arith.constant 0 : index
    %25 = vector.load %arg9[%c0_22, %c0_23] : memref<64x32xf32, #tpu.memory_space<vmem>>, vector<64x32xf32>
    %c0_24 = arith.constant 0 : index
    %c0_25 = arith.constant 0 : index
    %26 = vector.load %arg10[%c0_24, %c0_25] : memref<1x32xf32, #tpu.memory_space<vmem>>, vector<1x32xf32>
    %cst_26 = arith.constant dense<0.000000e+00> : vector<128x32xf32>
    %27 = tpu.matmul %24, %25, %cst_26 {dimension_numbers = #tpu.dot_dimension_numbers<[1], [0], [0], [1], [0, 0, 1, 1], [], []>} : vector<128x64xf32>, vector<64x32xf32>, vector<128x32xf32> -> vector<128x32xf32>
    %28 = vector.broadcast %26 : vector<1x32xf32> to vector<128x32xf32>
    %29 = arith.addf %27, %28 : vector<128x32xf32>
    %cst_27 = arith.constant 0.000000e+00 : f32
    %30 = vector.broadcast %cst_27 : f32 to vector<128x32xf32>
    %31 = arith.maximumf %29, %30 : vector<128x32xf32>
    %32 = vector.extract_strided_slice %31 {offsets = [0, 0], sizes = [64, 32], strides = [1, 1]} : vector<128x32xf32> to vector<64x32xf32>
    %33 = vector.extract_strided_slice %31 {offsets = [64, 0], sizes = [64, 32], strides = [1, 1]} : vector<128x32xf32> to vector<64x32xf32>
    %34 = arith.addf %32, %33 : vector<64x32xf32>
    %cst_28 = arith.constant 5.000000e-01 : f32
    %35 = vector.broadcast %cst_28 : f32 to vector<64x32xf32>
    %36 = arith.mulf %35, %34 : vector<64x32xf32>
    %c0_29 = arith.constant 0 : index
    %c0_30 = arith.constant 0 : index
    %c0_31 = arith.constant 0 : index
    %37 = vector.load %arg11[%c0_29, %c0_30, %c0_31] : memref<2x1x32xf32, #tpu.memory_space<vmem>>, vector<1x1x32xf32>
    %38 = vector.shape_cast %37 : vector<1x1x32xf32> to vector<1x32xf32>
    %c0_32 = arith.constant 0 : index
    %c0_33 = arith.constant 0 : index
    %c0_34 = arith.constant 0 : index
    %39 = vector.load %arg12[%c0_32, %c0_33, %c0_34] : memref<2x1x32xf32, #tpu.memory_space<vmem>>, vector<1x1x32xf32>
    %40 = vector.shape_cast %39 : vector<1x1x32xf32> to vector<1x32xf32>
    %cst_35 = arith.constant dense<0.000000e+00> : vector<8xf32>
    %41 = vector.multi_reduction <add>, %17, %cst_35 [1] : vector<8x32xf32> to vector<8xf32>
    %42 = vector.shape_cast %41 : vector<8xf32> to vector<8x1xf32>
    %cst_36 = arith.constant 3.200000e+01 : f32
    %43 = vector.broadcast %cst_36 : f32 to vector<8x1xf32>
    %44 = arith.divf %42, %43 : vector<8x1xf32>
    %45 = vector.broadcast %44 : vector<8x1xf32> to vector<8x32xf32>
    %46 = arith.subf %17, %45 : vector<8x32xf32>
    %47 = arith.mulf %46, %46 : vector<8x32xf32>
    %cst_37 = arith.constant dense<0.000000e+00> : vector<8xf32>
    %48 = vector.multi_reduction <add>, %47, %cst_37 [1] : vector<8x32xf32> to vector<8xf32>
    %49 = vector.shape_cast %48 : vector<8xf32> to vector<8x1xf32>
    %cst_38 = arith.constant 3.200000e+01 : f32
    %50 = vector.broadcast %cst_38 : f32 to vector<8x1xf32>
    %51 = arith.divf %49, %50 : vector<8x1xf32>
    %cst_39 = arith.constant 9.99999974E-6 : f32
    %52 = vector.broadcast %cst_39 : f32 to vector<8x1xf32>
    %53 = arith.addf %51, %52 : vector<8x1xf32>
    %54 = math.rsqrt %53 : vector<8x1xf32>
    %55 = vector.broadcast %54 : vector<8x1xf32> to vector<8x32xf32>
    %56 = arith.mulf %46, %55 : vector<8x32xf32>
    %57 = vector.broadcast %38 : vector<1x32xf32> to vector<8x32xf32>
    %58 = arith.mulf %56, %57 : vector<8x32xf32>
    %59 = vector.broadcast %40 : vector<1x32xf32> to vector<8x32xf32>
    %60 = arith.addf %58, %59 : vector<8x32xf32>
    %c0_40 = arith.constant 0 : index
    %c0_41 = arith.constant 0 : index
    %c0_42 = arith.constant 0 : index
    %61 = vector.load %arg13[%c0_40, %c0_41, %c0_42] : memref<2x32x32xf32, #tpu.memory_space<vmem>>, vector<1x32x32xf32>
    %62 = vector.shape_cast %61 : vector<1x32x32xf32> to vector<32x32xf32>
    %c0_43 = arith.constant 0 : index
    %c0_44 = arith.constant 0 : index
    %c0_45 = arith.constant 0 : index
    %63 = vector.load %arg14[%c0_43, %c0_44, %c0_45] : memref<2x1x32xf32, #tpu.memory_space<vmem>>, vector<1x1x32xf32>
    %64 = vector.shape_cast %63 : vector<1x1x32xf32> to vector<1x32xf32>
    %cst_46 = arith.constant dense<0.000000e+00> : vector<8x32xf32>
    %65 = tpu.matmul %60, %62, %cst_46 {dimension_numbers = #tpu.dot_dimension_numbers<[1], [0], [0], [1], [0, 0, 1, 1], [], []>} : vector<8x32xf32>, vector<32x32xf32>, vector<8x32xf32> -> vector<8x32xf32>
    %66 = vector.broadcast %64 : vector<1x32xf32> to vector<8x32xf32>
    %67 = arith.addf %65, %66 : vector<8x32xf32>
    %cst_47 = arith.constant 0.353553385 : f32
    %68 = vector.broadcast %cst_47 : f32 to vector<8x32xf32>
    %69 = arith.mulf %67, %68 : vector<8x32xf32>
    %c0_48 = arith.constant 0 : index
    %c0_49 = arith.constant 0 : index
    %c0_50 = arith.constant 0 : index
    %70 = vector.load %arg15[%c0_48, %c0_49, %c0_50] : memref<2x32x32xf32, #tpu.memory_space<vmem>>, vector<1x32x32xf32>
    %71 = vector.shape_cast %70 : vector<1x32x32xf32> to vector<32x32xf32>
    %c0_51 = arith.constant 0 : index
    %c0_52 = arith.constant 0 : index
    %c0_53 = arith.constant 0 : index
    %72 = vector.load %arg16[%c0_51, %c0_52, %c0_53] : memref<2x1x32xf32, #tpu.memory_space<vmem>>, vector<1x1x32xf32>
    %73 = vector.shape_cast %72 : vector<1x1x32xf32> to vector<1x32xf32>
    %cst_54 = arith.constant dense<0.000000e+00> : vector<8x32xf32>
    %74 = tpu.matmul %60, %71, %cst_54 {dimension_numbers = #tpu.dot_dimension_numbers<[1], [0], [0], [1], [0, 0, 1, 1], [], []>} : vector<8x32xf32>, vector<32x32xf32>, vector<8x32xf32> -> vector<8x32xf32>
    %75 = vector.broadcast %73 : vector<1x32xf32> to vector<8x32xf32>
    %76 = arith.addf %74, %75 : vector<8x32xf32>
    %c0_55 = arith.constant 0 : index
    %c0_56 = arith.constant 0 : index
    %c0_57 = arith.constant 0 : index
    %77 = vector.load %arg17[%c0_55, %c0_56, %c0_57] : memref<2x32x32xf32, #tpu.memory_space<vmem>>, vector<1x32x32xf32>
    %78 = vector.shape_cast %77 : vector<1x32x32xf32> to vector<32x32xf32>
    %c0_58 = arith.constant 0 : index
    %c0_59 = arith.constant 0 : index
    %c0_60 = arith.constant 0 : index
    %79 = vector.load %arg18[%c0_58, %c0_59, %c0_60] : memref<2x1x32xf32, #tpu.memory_space<vmem>>, vector<1x1x32xf32>
    %80 = vector.shape_cast %79 : vector<1x1x32xf32> to vector<1x32xf32>
    %cst_61 = arith.constant dense<0.000000e+00> : vector<8x32xf32>
    %81 = tpu.matmul %60, %78, %cst_61 {dimension_numbers = #tpu.dot_dimension_numbers<[1], [0], [0], [1], [0, 0, 1, 1], [], []>} : vector<8x32xf32>, vector<32x32xf32>, vector<8x32xf32> -> vector<8x32xf32>
    %82 = vector.broadcast %80 : vector<1x32xf32> to vector<8x32xf32>
    %83 = arith.addf %81, %82 : vector<8x32xf32>
    %c0_62 = arith.constant 0 : index
    %c0_63 = arith.constant 0 : index
    %c0_64 = arith.constant 0 : index
    %84 = vector.load %arg19[%c0_62, %c0_63, %c0_64] : memref<2x32x32xf32, #tpu.memory_space<vmem>>, vector<1x32x32xf32>
    %85 = vector.shape_cast %84 : vector<1x32x32xf32> to vector<32x32xf32>
    %c0_65 = arith.constant 0 : index
    %c0_66 = arith.constant 0 : index
    %c0_67 = arith.constant 0 : index
    %86 = vector.load %arg20[%c0_65, %c0_66, %c0_67] : memref<2x1x32xf32, #tpu.memory_space<vmem>>, vector<1x1x32xf32>
    %87 = vector.shape_cast %86 : vector<1x1x32xf32> to vector<1x32xf32>
    %cst_68 = arith.constant dense<0.000000e+00> : vector<64x32xf32>
    %88 = tpu.matmul %36, %85, %cst_68 {dimension_numbers = #tpu.dot_dimension_numbers<[1], [0], [0], [1], [0, 0, 1, 1], [], []>} : vector<64x32xf32>, vector<32x32xf32>, vector<64x32xf32> -> vector<64x32xf32>
    %89 = vector.broadcast %87 : vector<1x32xf32> to vector<64x32xf32>
    %90 = arith.addf %88, %89 : vector<64x32xf32>
    %91 = vector.shape_cast %90 : vector<64x32xf32> to vector<8x8x32xf32>
    %92 = vector.shape_cast %69 : vector<8x32xf32> to vector<8x1x32xf32>
    %93 = vector.shape_cast %76 : vector<8x32xf32> to vector<1x8x32xf32>
    %94 = vector.broadcast %92 : vector<8x1x32xf32> to vector<8x8x32xf32>
    %95 = vector.broadcast %93 : vector<1x8x32xf32> to vector<8x8x32xf32>
    %96 = arith.mulf %94, %95 : vector<8x8x32xf32>
    %cst_69 = arith.constant 1.000000e+00 : f32
    %97 = vector.broadcast %cst_69 : f32 to vector<8x8x32xf32>
    %98 = arith.addf %91, %97 : vector<8x8x32xf32>
    %99 = arith.mulf %96, %98 : vector<8x8x32xf32>
    %100 = arith.mulf %99, %91 : vector<8x8x32xf32>
    %101 = vector.shape_cast %100 : vector<8x8x32xf32> to vector<64x32xf32>
    %c0_70 = arith.constant 0 : index
    %c0_71 = arith.constant 0 : index
    %c0_72 = arith.constant 0 : index
    %102 = vector.load %arg21[%c0_70, %c0_71, %c0_72] : memref<2x32x32xf32, #tpu.memory_space<vmem>>, vector<1x32x32xf32>
    %103 = vector.shape_cast %102 : vector<1x32x32xf32> to vector<32x32xf32>
    %c0_73 = arith.constant 0 : index
    %c0_74 = arith.constant 0 : index
    %c0_75 = arith.constant 0 : index
    %104 = vector.load %arg22[%c0_73, %c0_74, %c0_75] : memref<2x1x32xf32, #tpu.memory_space<vmem>>, vector<1x1x32xf32>
    %105 = vector.shape_cast %104 : vector<1x1x32xf32> to vector<1x32xf32>
    %cst_76 = arith.constant dense<0.000000e+00> : vector<64x32xf32>
    %106 = tpu.matmul %101, %103, %cst_76 {dimension_numbers = #tpu.dot_dimension_numbers<[1], [0], [0], [1], [0, 0, 1, 1], [], []>} : vector<64x32xf32>, vector<32x32xf32>, vector<64x32xf32> -> vector<64x32xf32>
    %107 = vector.broadcast %105 : vector<1x32xf32> to vector<64x32xf32>
    %108 = arith.addf %106, %107 : vector<64x32xf32>
    %cst_77 = arith.constant dense<0xFF800000> : vector<8x32xf32>
    %109 = vector.multi_reduction <maximumf>, %100, %cst_77 [1] : vector<8x8x32xf32> to vector<8x32xf32>
    %110 = vector.shape_cast %109 : vector<8x32xf32> to vector<8x1x32xf32>
    %111 = vector.broadcast %110 : vector<8x1x32xf32> to vector<8x8x32xf32>
    %112 = arith.subf %100, %111 : vector<8x8x32xf32>
    %113 = math.exp %112 : vector<8x8x32xf32>
    %cst_78 = arith.constant dense<0.000000e+00> : vector<8x32xf32>
    %114 = vector.multi_reduction <add>, %113, %cst_78 [1] : vector<8x8x32xf32> to vector<8x32xf32>
    %115 = vector.shape_cast %83 : vector<8x32xf32> to vector<1x8x32xf32>
    %116 = vector.broadcast %115 : vector<1x8x32xf32> to vector<8x8x32xf32>
    %117 = arith.mulf %113, %116 : vector<8x8x32xf32>
    %cst_79 = arith.constant dense<0.000000e+00> : vector<8x32xf32>
    %118 = vector.multi_reduction <add>, %117, %cst_79 [1] : vector<8x8x32xf32> to vector<8x32xf32>
    %119 = arith.divf %118, %114 : vector<8x32xf32>
    %c0_80 = arith.constant 0 : index
    %c0_81 = arith.constant 0 : index
    %c0_82 = arith.constant 0 : index
    %120 = vector.load %arg23[%c0_80, %c0_81, %c0_82] : memref<2x32x32xf32, #tpu.memory_space<vmem>>, vector<1x32x32xf32>
    %121 = vector.shape_cast %120 : vector<1x32x32xf32> to vector<32x32xf32>
    %c0_83 = arith.constant 0 : index
    %c0_84 = arith.constant 0 : index
    %c0_85 = arith.constant 0 : index
    %122 = vector.load %arg24[%c0_83, %c0_84, %c0_85] : memref<2x1x32xf32, #tpu.memory_space<vmem>>, vector<1x1x32xf32>
    %123 = vector.shape_cast %122 : vector<1x1x32xf32> to vector<1x32xf32>
    %cst_86 = arith.constant dense<0.000000e+00> : vector<8x32xf32>
    %124 = tpu.matmul %119, %121, %cst_86 {dimension_numbers = #tpu.dot_dimension_numbers<[1], [0], [0], [1], [0, 0, 1, 1], [], []>} : vector<8x32xf32>, vector<32x32xf32>, vector<8x32xf32> -> vector<8x32xf32>
    %125 = vector.broadcast %123 : vector<1x32xf32> to vector<8x32xf32>
    %126 = arith.addf %124, %125 : vector<8x32xf32>
    %127 = arith.addf %60, %126 : vector<8x32xf32>
    %c0_87 = arith.constant 0 : index
    %c0_88 = arith.constant 0 : index
    %c0_89 = arith.constant 0 : index
    %128 = vector.load %arg25[%c0_87, %c0_88, %c0_89] : memref<2x1x32xf32, #tpu.memory_space<vmem>>, vector<1x1x32xf32>
    %129 = vector.shape_cast %128 : vector<1x1x32xf32> to vector<1x32xf32>
    %c0_90 = arith.constant 0 : index
    %c0_91 = arith.constant 0 : index
    %c0_92 = arith.constant 0 : index
    %130 = vector.load %arg26[%c0_90, %c0_91, %c0_92] : memref<2x1x32xf32, #tpu.memory_space<vmem>>, vector<1x1x32xf32>
    %131 = vector.shape_cast %130 : vector<1x1x32xf32> to vector<1x32xf32>
    %cst_93 = arith.constant dense<0.000000e+00> : vector<8xf32>
    %132 = vector.multi_reduction <add>, %127, %cst_93 [1] : vector<8x32xf32> to vector<8xf32>
    %133 = vector.shape_cast %132 : vector<8xf32> to vector<8x1xf32>
    %cst_94 = arith.constant 3.200000e+01 : f32
    %134 = vector.broadcast %cst_94 : f32 to vector<8x1xf32>
    %135 = arith.divf %133, %134 : vector<8x1xf32>
    %136 = vector.broadcast %135 : vector<8x1xf32> to vector<8x32xf32>
    %137 = arith.subf %127, %136 : vector<8x32xf32>
    %138 = arith.mulf %137, %137 : vector<8x32xf32>
    %cst_95 = arith.constant dense<0.000000e+00> : vector<8xf32>
    %139 = vector.multi_reduction <add>, %138, %cst_95 [1] : vector<8x32xf32> to vector<8xf32>
    %140 = vector.shape_cast %139 : vector<8xf32> to vector<8x1xf32>
    %cst_96 = arith.constant 3.200000e+01 : f32
    %141 = vector.broadcast %cst_96 : f32 to vector<8x1xf32>
    %142 = arith.divf %140, %141 : vector<8x1xf32>
    %cst_97 = arith.constant 9.99999974E-6 : f32
    %143 = vector.broadcast %cst_97 : f32 to vector<8x1xf32>
    %144 = arith.addf %142, %143 : vector<8x1xf32>
    %145 = math.rsqrt %144 : vector<8x1xf32>
    %146 = vector.broadcast %145 : vector<8x1xf32> to vector<8x32xf32>
    %147 = arith.mulf %137, %146 : vector<8x32xf32>
    %148 = vector.broadcast %129 : vector<1x32xf32> to vector<8x32xf32>
    %149 = arith.mulf %147, %148 : vector<8x32xf32>
    %150 = vector.broadcast %131 : vector<1x32xf32> to vector<8x32xf32>
    %151 = arith.addf %149, %150 : vector<8x32xf32>
    %152 = arith.addf %36, %108 : vector<64x32xf32>
    %c0_98 = arith.constant 0 : index
    %c0_99 = arith.constant 0 : index
    %c0_100 = arith.constant 0 : index
    %153 = vector.load %arg27[%c0_98, %c0_99, %c0_100] : memref<2x1x32xf32, #tpu.memory_space<vmem>>, vector<1x1x32xf32>
    %154 = vector.shape_cast %153 : vector<1x1x32xf32> to vector<1x32xf32>
    %c0_101 = arith.constant 0 : index
    %c0_102 = arith.constant 0 : index
    %c0_103 = arith.constant 0 : index
    %155 = vector.load %arg28[%c0_101, %c0_102, %c0_103] : memref<2x1x32xf32, #tpu.memory_space<vmem>>, vector<1x1x32xf32>
    %156 = vector.shape_cast %155 : vector<1x1x32xf32> to vector<1x32xf32>
    %cst_104 = arith.constant dense<0.000000e+00> : vector<64xf32>
    %157 = vector.multi_reduction <add>, %152, %cst_104 [1] : vector<64x32xf32> to vector<64xf32>
    %158 = vector.shape_cast %157 : vector<64xf32> to vector<64x1xf32>
    %cst_105 = arith.constant 3.200000e+01 : f32
    %159 = vector.broadcast %cst_105 : f32 to vector<64x1xf32>
    %160 = arith.divf %158, %159 : vector<64x1xf32>
    %161 = vector.broadcast %160 : vector<64x1xf32> to vector<64x32xf32>
    %162 = arith.subf %152, %161 : vector<64x32xf32>
    %163 = arith.mulf %162, %162 : vector<64x32xf32>
    %cst_106 = arith.constant dense<0.000000e+00> : vector<64xf32>
    %164 = vector.multi_reduction <add>, %163, %cst_106 [1] : vector<64x32xf32> to vector<64xf32>
    %165 = vector.shape_cast %164 : vector<64xf32> to vector<64x1xf32>
    %cst_107 = arith.constant 3.200000e+01 : f32
    %166 = vector.broadcast %cst_107 : f32 to vector<64x1xf32>
    %167 = arith.divf %165, %166 : vector<64x1xf32>
    %cst_108 = arith.constant 9.99999974E-6 : f32
    %168 = vector.broadcast %cst_108 : f32 to vector<64x1xf32>
    %169 = arith.addf %167, %168 : vector<64x1xf32>
    %170 = math.rsqrt %169 : vector<64x1xf32>
    %171 = vector.broadcast %170 : vector<64x1xf32> to vector<64x32xf32>
    %172 = arith.mulf %162, %171 : vector<64x32xf32>
    %173 = vector.broadcast %154 : vector<1x32xf32> to vector<64x32xf32>
    %174 = arith.mulf %172, %173 : vector<64x32xf32>
    %175 = vector.broadcast %156 : vector<1x32xf32> to vector<64x32xf32>
    %176 = arith.addf %174, %175 : vector<64x32xf32>
    %c0_109 = arith.constant 0 : index
    %c0_110 = arith.constant 0 : index
    %c0_111 = arith.constant 0 : index
    %177 = vector.load %arg33[%c0_109, %c0_110, %c0_111] : memref<2x32x64xf32, #tpu.memory_space<vmem>>, vector<1x32x64xf32>
    %178 = vector.shape_cast %177 : vector<1x32x64xf32> to vector<32x64xf32>
    %c0_112 = arith.constant 0 : index
    %c0_113 = arith.constant 0 : index
    %c0_114 = arith.constant 0 : index
    %179 = vector.load %arg34[%c0_112, %c0_113, %c0_114] : memref<2x1x64xf32, #tpu.memory_space<vmem>>, vector<1x1x64xf32>
    %180 = vector.shape_cast %179 : vector<1x1x64xf32> to vector<1x64xf32>
    %cst_115 = arith.constant dense<0.000000e+00> : vector<8x64xf32>
    %181 = tpu.matmul %151, %178, %cst_115 {dimension_numbers = #tpu.dot_dimension_numbers<[1], [0], [0], [1], [0, 0, 1, 1], [], []>} : vector<8x32xf32>, vector<32x64xf32>, vector<8x64xf32> -> vector<8x64xf32>
    %182 = vector.broadcast %180 : vector<1x64xf32> to vector<8x64xf32>
    %183 = arith.addf %181, %182 : vector<8x64xf32>
    %cst_116 = arith.constant 0.000000e+00 : f32
    %184 = vector.broadcast %cst_116 : f32 to vector<8x64xf32>
    %185 = arith.maximumf %183, %184 : vector<8x64xf32>
    %c0_117 = arith.constant 0 : index
    %c0_118 = arith.constant 0 : index
    %c0_119 = arith.constant 0 : index
    %186 = vector.load %arg35[%c0_117, %c0_118, %c0_119] : memref<2x64x32xf32, #tpu.memory_space<vmem>>, vector<1x64x32xf32>
    %187 = vector.shape_cast %186 : vector<1x64x32xf32> to vector<64x32xf32>
    %c0_120 = arith.constant 0 : index
    %c0_121 = arith.constant 0 : index
    %c0_122 = arith.constant 0 : index
    %188 = vector.load %arg36[%c0_120, %c0_121, %c0_122] : memref<2x1x32xf32, #tpu.memory_space<vmem>>, vector<1x1x32xf32>
    %189 = vector.shape_cast %188 : vector<1x1x32xf32> to vector<1x32xf32>
    %cst_123 = arith.constant dense<0.000000e+00> : vector<8x32xf32>
    %190 = tpu.matmul %185, %187, %cst_123 {dimension_numbers = #tpu.dot_dimension_numbers<[1], [0], [0], [1], [0, 0, 1, 1], [], []>} : vector<8x64xf32>, vector<64x32xf32>, vector<8x32xf32> -> vector<8x32xf32>
    %191 = vector.broadcast %189 : vector<1x32xf32> to vector<8x32xf32>
    %192 = arith.addf %190, %191 : vector<8x32xf32>
    %c0_124 = arith.constant 0 : index
    %c0_125 = arith.constant 0 : index
    %c0_126 = arith.constant 0 : index
    %193 = vector.load %arg37[%c0_124, %c0_125, %c0_126] : memref<2x32x64xf32, #tpu.memory_space<vmem>>, vector<1x32x64xf32>
    %194 = vector.shape_cast %193 : vector<1x32x64xf32> to vector<32x64xf32>
    %c0_127 = arith.constant 0 : index
    %c0_128 = arith.constant 0 : index
    %c0_129 = arith.constant 0 : index
    %195 = vector.load %arg38[%c0_127, %c0_128, %c0_129] : memref<2x1x64xf32, #tpu.memory_space<vmem>>, vector<1x1x64xf32>
    %196 = vector.shape_cast %195 : vector<1x1x64xf32> to vector<1x64xf32>
    %cst_130 = arith.constant dense<0.000000e+00> : vector<64x64xf32>
    %197 = tpu.matmul %176, %194, %cst_130 {dimension_numbers = #tpu.dot_dimension_numbers<[1], [0], [0], [1], [0, 0, 1, 1], [], []>} : vector<64x32xf32>, vector<32x64xf32>, vector<64x64xf32> -> vector<64x64xf32>
    %198 = vector.broadcast %196 : vector<1x64xf32> to vector<64x64xf32>
    %199 = arith.addf %197, %198 : vector<64x64xf32>
    %cst_131 = arith.constant 0.000000e+00 : f32
    %200 = vector.broadcast %cst_131 : f32 to vector<64x64xf32>
    %201 = arith.maximumf %199, %200 : vector<64x64xf32>
    %c0_132 = arith.constant 0 : index
    %c0_133 = arith.constant 0 : index
    %c0_134 = arith.constant 0 : index
    %202 = vector.load %arg39[%c0_132, %c0_133, %c0_134] : memref<2x64x32xf32, #tpu.memory_space<vmem>>, vector<1x64x32xf32>
    %203 = vector.shape_cast %202 : vector<1x64x32xf32> to vector<64x32xf32>
    %c0_135 = arith.constant 0 : index
    %c0_136 = arith.constant 0 : index
    %c0_137 = arith.constant 0 : index
    %204 = vector.load %arg40[%c0_135, %c0_136, %c0_137] : memref<2x1x32xf32, #tpu.memory_space<vmem>>, vector<1x1x32xf32>
    %205 = vector.shape_cast %204 : vector<1x1x32xf32> to vector<1x32xf32>
    %cst_138 = arith.constant dense<0.000000e+00> : vector<64x32xf32>
    %206 = tpu.matmul %201, %203, %cst_138 {dimension_numbers = #tpu.dot_dimension_numbers<[1], [0], [0], [1], [0, 0, 1, 1], [], []>} : vector<64x64xf32>, vector<64x32xf32>, vector<64x32xf32> -> vector<64x32xf32>
    %207 = vector.broadcast %205 : vector<1x32xf32> to vector<64x32xf32>
    %208 = arith.addf %206, %207 : vector<64x32xf32>
    %209 = arith.addf %151, %192 : vector<8x32xf32>
    %c0_139 = arith.constant 0 : index
    %c0_140 = arith.constant 0 : index
    %c0_141 = arith.constant 0 : index
    %210 = vector.load %arg29[%c0_139, %c0_140, %c0_141] : memref<2x1x32xf32, #tpu.memory_space<vmem>>, vector<1x1x32xf32>
    %211 = vector.shape_cast %210 : vector<1x1x32xf32> to vector<1x32xf32>
    %c0_142 = arith.constant 0 : index
    %c0_143 = arith.constant 0 : index
    %c0_144 = arith.constant 0 : index
    %212 = vector.load %arg30[%c0_142, %c0_143, %c0_144] : memref<2x1x32xf32, #tpu.memory_space<vmem>>, vector<1x1x32xf32>
    %213 = vector.shape_cast %212 : vector<1x1x32xf32> to vector<1x32xf32>
    %cst_145 = arith.constant dense<0.000000e+00> : vector<8xf32>
    %214 = vector.multi_reduction <add>, %209, %cst_145 [1] : vector<8x32xf32> to vector<8xf32>
    %215 = vector.shape_cast %214 : vector<8xf32> to vector<8x1xf32>
    %cst_146 = arith.constant 3.200000e+01 : f32
    %216 = vector.broadcast %cst_146 : f32 to vector<8x1xf32>
    %217 = arith.divf %215, %216 : vector<8x1xf32>
    %218 = vector.broadcast %217 : vector<8x1xf32> to vector<8x32xf32>
    %219 = arith.subf %209, %218 : vector<8x32xf32>
    %220 = arith.mulf %219, %219 : vector<8x32xf32>
    %cst_147 = arith.constant dense<0.000000e+00> : vector<8xf32>
    %221 = vector.multi_reduction <add>, %220, %cst_147 [1] : vector<8x32xf32> to vector<8xf32>
    %222 = vector.shape_cast %221 : vector<8xf32> to vector<8x1xf32>
    %cst_148 = arith.constant 3.200000e+01 : f32
    %223 = vector.broadcast %cst_148 : f32 to vector<8x1xf32>
    %224 = arith.divf %222, %223 : vector<8x1xf32>
    %cst_149 = arith.constant 9.99999974E-6 : f32
    %225 = vector.broadcast %cst_149 : f32 to vector<8x1xf32>
    %226 = arith.addf %224, %225 : vector<8x1xf32>
    %227 = math.rsqrt %226 : vector<8x1xf32>
    %228 = vector.broadcast %227 : vector<8x1xf32> to vector<8x32xf32>
    %229 = arith.mulf %219, %228 : vector<8x32xf32>
    %230 = vector.broadcast %211 : vector<1x32xf32> to vector<8x32xf32>
    %231 = arith.mulf %229, %230 : vector<8x32xf32>
    %232 = vector.broadcast %213 : vector<1x32xf32> to vector<8x32xf32>
    %233 = arith.addf %231, %232 : vector<8x32xf32>
    %234 = arith.addf %176, %208 : vector<64x32xf32>
    %c0_150 = arith.constant 0 : index
    %c0_151 = arith.constant 0 : index
    %c0_152 = arith.constant 0 : index
    %235 = vector.load %arg31[%c0_150, %c0_151, %c0_152] : memref<2x1x32xf32, #tpu.memory_space<vmem>>, vector<1x1x32xf32>
    %236 = vector.shape_cast %235 : vector<1x1x32xf32> to vector<1x32xf32>
    %c0_153 = arith.constant 0 : index
    %c0_154 = arith.constant 0 : index
    %c0_155 = arith.constant 0 : index
    %237 = vector.load %arg32[%c0_153, %c0_154, %c0_155] : memref<2x1x32xf32, #tpu.memory_space<vmem>>, vector<1x1x32xf32>
    %238 = vector.shape_cast %237 : vector<1x1x32xf32> to vector<1x32xf32>
    %cst_156 = arith.constant dense<0.000000e+00> : vector<64xf32>
    %239 = vector.multi_reduction <add>, %234, %cst_156 [1] : vector<64x32xf32> to vector<64xf32>
    %240 = vector.shape_cast %239 : vector<64xf32> to vector<64x1xf32>
    %cst_157 = arith.constant 3.200000e+01 : f32
    %241 = vector.broadcast %cst_157 : f32 to vector<64x1xf32>
    %242 = arith.divf %240, %241 : vector<64x1xf32>
    %243 = vector.broadcast %242 : vector<64x1xf32> to vector<64x32xf32>
    %244 = arith.subf %234, %243 : vector<64x32xf32>
    %245 = arith.mulf %244, %244 : vector<64x32xf32>
    %cst_158 = arith.constant dense<0.000000e+00> : vector<64xf32>
    %246 = vector.multi_reduction <add>, %245, %cst_158 [1] : vector<64x32xf32> to vector<64xf32>
    %247 = vector.shape_cast %246 : vector<64xf32> to vector<64x1xf32>
    %cst_159 = arith.constant 3.200000e+01 : f32
    %248 = vector.broadcast %cst_159 : f32 to vector<64x1xf32>
    %249 = arith.divf %247, %248 : vector<64x1xf32>
    %cst_160 = arith.constant 9.99999974E-6 : f32
    %250 = vector.broadcast %cst_160 : f32 to vector<64x1xf32>
    %251 = arith.addf %249, %250 : vector<64x1xf32>
    %252 = math.rsqrt %251 : vector<64x1xf32>
    %253 = vector.broadcast %252 : vector<64x1xf32> to vector<64x32xf32>
    %254 = arith.mulf %244, %253 : vector<64x32xf32>
    %255 = vector.broadcast %236 : vector<1x32xf32> to vector<64x32xf32>
    %256 = arith.mulf %254, %255 : vector<64x32xf32>
    %257 = vector.broadcast %238 : vector<1x32xf32> to vector<64x32xf32>
    %258 = arith.addf %256, %257 : vector<64x32xf32>
    %c1 = arith.constant 1 : index
    %c0_161 = arith.constant 0 : index
    %c0_162 = arith.constant 0 : index
    %259 = vector.load %arg11[%c1, %c0_161, %c0_162] : memref<2x1x32xf32, #tpu.memory_space<vmem>>, vector<1x1x32xf32>
    %260 = vector.shape_cast %259 : vector<1x1x32xf32> to vector<1x32xf32>
    %c1_163 = arith.constant 1 : index
    %c0_164 = arith.constant 0 : index
    %c0_165 = arith.constant 0 : index
    %261 = vector.load %arg12[%c1_163, %c0_164, %c0_165] : memref<2x1x32xf32, #tpu.memory_space<vmem>>, vector<1x1x32xf32>
    %262 = vector.shape_cast %261 : vector<1x1x32xf32> to vector<1x32xf32>
    %cst_166 = arith.constant dense<0.000000e+00> : vector<8xf32>
    %263 = vector.multi_reduction <add>, %233, %cst_166 [1] : vector<8x32xf32> to vector<8xf32>
    %264 = vector.shape_cast %263 : vector<8xf32> to vector<8x1xf32>
    %cst_167 = arith.constant 3.200000e+01 : f32
    %265 = vector.broadcast %cst_167 : f32 to vector<8x1xf32>
    %266 = arith.divf %264, %265 : vector<8x1xf32>
    %267 = vector.broadcast %266 : vector<8x1xf32> to vector<8x32xf32>
    %268 = arith.subf %233, %267 : vector<8x32xf32>
    %269 = arith.mulf %268, %268 : vector<8x32xf32>
    %cst_168 = arith.constant dense<0.000000e+00> : vector<8xf32>
    %270 = vector.multi_reduction <add>, %269, %cst_168 [1] : vector<8x32xf32> to vector<8xf32>
    %271 = vector.shape_cast %270 : vector<8xf32> to vector<8x1xf32>
    %cst_169 = arith.constant 3.200000e+01 : f32
    %272 = vector.broadcast %cst_169 : f32 to vector<8x1xf32>
    %273 = arith.divf %271, %272 : vector<8x1xf32>
    %cst_170 = arith.constant 9.99999974E-6 : f32
    %274 = vector.broadcast %cst_170 : f32 to vector<8x1xf32>
    %275 = arith.addf %273, %274 : vector<8x1xf32>
    %276 = math.rsqrt %275 : vector<8x1xf32>
    %277 = vector.broadcast %276 : vector<8x1xf32> to vector<8x32xf32>
    %278 = arith.mulf %268, %277 : vector<8x32xf32>
    %279 = vector.broadcast %260 : vector<1x32xf32> to vector<8x32xf32>
    %280 = arith.mulf %278, %279 : vector<8x32xf32>
    %281 = vector.broadcast %262 : vector<1x32xf32> to vector<8x32xf32>
    %282 = arith.addf %280, %281 : vector<8x32xf32>
    %c1_171 = arith.constant 1 : index
    %c0_172 = arith.constant 0 : index
    %c0_173 = arith.constant 0 : index
    %283 = vector.load %arg13[%c1_171, %c0_172, %c0_173] : memref<2x32x32xf32, #tpu.memory_space<vmem>>, vector<1x32x32xf32>
    %284 = vector.shape_cast %283 : vector<1x32x32xf32> to vector<32x32xf32>
    %c1_174 = arith.constant 1 : index
    %c0_175 = arith.constant 0 : index
    %c0_176 = arith.constant 0 : index
    %285 = vector.load %arg14[%c1_174, %c0_175, %c0_176] : memref<2x1x32xf32, #tpu.memory_space<vmem>>, vector<1x1x32xf32>
    %286 = vector.shape_cast %285 : vector<1x1x32xf32> to vector<1x32xf32>
    %cst_177 = arith.constant dense<0.000000e+00> : vector<8x32xf32>
    %287 = tpu.matmul %282, %284, %cst_177 {dimension_numbers = #tpu.dot_dimension_numbers<[1], [0], [0], [1], [0, 0, 1, 1], [], []>} : vector<8x32xf32>, vector<32x32xf32>, vector<8x32xf32> -> vector<8x32xf32>
    %288 = vector.broadcast %286 : vector<1x32xf32> to vector<8x32xf32>
    %289 = arith.addf %287, %288 : vector<8x32xf32>
    %cst_178 = arith.constant 0.353553385 : f32
    %290 = vector.broadcast %cst_178 : f32 to vector<8x32xf32>
    %291 = arith.mulf %289, %290 : vector<8x32xf32>
    %c1_179 = arith.constant 1 : index
    %c0_180 = arith.constant 0 : index
    %c0_181 = arith.constant 0 : index
    %292 = vector.load %arg15[%c1_179, %c0_180, %c0_181] : memref<2x32x32xf32, #tpu.memory_space<vmem>>, vector<1x32x32xf32>
    %293 = vector.shape_cast %292 : vector<1x32x32xf32> to vector<32x32xf32>
    %c1_182 = arith.constant 1 : index
    %c0_183 = arith.constant 0 : index
    %c0_184 = arith.constant 0 : index
    %294 = vector.load %arg16[%c1_182, %c0_183, %c0_184] : memref<2x1x32xf32, #tpu.memory_space<vmem>>, vector<1x1x32xf32>
    %295 = vector.shape_cast %294 : vector<1x1x32xf32> to vector<1x32xf32>
    %cst_185 = arith.constant dense<0.000000e+00> : vector<8x32xf32>
    %296 = tpu.matmul %282, %293, %cst_185 {dimension_numbers = #tpu.dot_dimension_numbers<[1], [0], [0], [1], [0, 0, 1, 1], [], []>} : vector<8x32xf32>, vector<32x32xf32>, vector<8x32xf32> -> vector<8x32xf32>
    %297 = vector.broadcast %295 : vector<1x32xf32> to vector<8x32xf32>
    %298 = arith.addf %296, %297 : vector<8x32xf32>
    %c1_186 = arith.constant 1 : index
    %c0_187 = arith.constant 0 : index
    %c0_188 = arith.constant 0 : index
    %299 = vector.load %arg17[%c1_186, %c0_187, %c0_188] : memref<2x32x32xf32, #tpu.memory_space<vmem>>, vector<1x32x32xf32>
    %300 = vector.shape_cast %299 : vector<1x32x32xf32> to vector<32x32xf32>
    %c1_189 = arith.constant 1 : index
    %c0_190 = arith.constant 0 : index
    %c0_191 = arith.constant 0 : index
    %301 = vector.load %arg18[%c1_189, %c0_190, %c0_191] : memref<2x1x32xf32, #tpu.memory_space<vmem>>, vector<1x1x32xf32>
    %302 = vector.shape_cast %301 : vector<1x1x32xf32> to vector<1x32xf32>
    %cst_192 = arith.constant dense<0.000000e+00> : vector<8x32xf32>
    %303 = tpu.matmul %282, %300, %cst_192 {dimension_numbers = #tpu.dot_dimension_numbers<[1], [0], [0], [1], [0, 0, 1, 1], [], []>} : vector<8x32xf32>, vector<32x32xf32>, vector<8x32xf32> -> vector<8x32xf32>
    %304 = vector.broadcast %302 : vector<1x32xf32> to vector<8x32xf32>
    %305 = arith.addf %303, %304 : vector<8x32xf32>
    %c1_193 = arith.constant 1 : index
    %c0_194 = arith.constant 0 : index
    %c0_195 = arith.constant 0 : index
    %306 = vector.load %arg19[%c1_193, %c0_194, %c0_195] : memref<2x32x32xf32, #tpu.memory_space<vmem>>, vector<1x32x32xf32>
    %307 = vector.shape_cast %306 : vector<1x32x32xf32> to vector<32x32xf32>
    %c1_196 = arith.constant 1 : index
    %c0_197 = arith.constant 0 : index
    %c0_198 = arith.constant 0 : index
    %308 = vector.load %arg20[%c1_196, %c0_197, %c0_198] : memref<2x1x32xf32, #tpu.memory_space<vmem>>, vector<1x1x32xf32>
    %309 = vector.shape_cast %308 : vector<1x1x32xf32> to vector<1x32xf32>
    %cst_199 = arith.constant dense<0.000000e+00> : vector<64x32xf32>
    %310 = tpu.matmul %258, %307, %cst_199 {dimension_numbers = #tpu.dot_dimension_numbers<[1], [0], [0], [1], [0, 0, 1, 1], [], []>} : vector<64x32xf32>, vector<32x32xf32>, vector<64x32xf32> -> vector<64x32xf32>
    %311 = vector.broadcast %309 : vector<1x32xf32> to vector<64x32xf32>
    %312 = arith.addf %310, %311 : vector<64x32xf32>
    %313 = vector.shape_cast %312 : vector<64x32xf32> to vector<8x8x32xf32>
    %314 = vector.shape_cast %291 : vector<8x32xf32> to vector<8x1x32xf32>
    %315 = vector.shape_cast %298 : vector<8x32xf32> to vector<1x8x32xf32>
    %316 = vector.broadcast %314 : vector<8x1x32xf32> to vector<8x8x32xf32>
    %317 = vector.broadcast %315 : vector<1x8x32xf32> to vector<8x8x32xf32>
    %318 = arith.mulf %316, %317 : vector<8x8x32xf32>
    %cst_200 = arith.constant 1.000000e+00 : f32
    %319 = vector.broadcast %cst_200 : f32 to vector<8x8x32xf32>
    %320 = arith.addf %313, %319 : vector<8x8x32xf32>
    %321 = arith.mulf %318, %320 : vector<8x8x32xf32>
    %322 = arith.mulf %321, %313 : vector<8x8x32xf32>
    %323 = vector.shape_cast %322 : vector<8x8x32xf32> to vector<64x32xf32>
    %c1_201 = arith.constant 1 : index
    %c0_202 = arith.constant 0 : index
    %c0_203 = arith.constant 0 : index
    %324 = vector.load %arg21[%c1_201, %c0_202, %c0_203] : memref<2x32x32xf32, #tpu.memory_space<vmem>>, vector<1x32x32xf32>
    %325 = vector.shape_cast %324 : vector<1x32x32xf32> to vector<32x32xf32>
    %c1_204 = arith.constant 1 : index
    %c0_205 = arith.constant 0 : index
    %c0_206 = arith.constant 0 : index
    %326 = vector.load %arg22[%c1_204, %c0_205, %c0_206] : memref<2x1x32xf32, #tpu.memory_space<vmem>>, vector<1x1x32xf32>
    %327 = vector.shape_cast %326 : vector<1x1x32xf32> to vector<1x32xf32>
    %cst_207 = arith.constant dense<0.000000e+00> : vector<64x32xf32>
    %328 = tpu.matmul %323, %325, %cst_207 {dimension_numbers = #tpu.dot_dimension_numbers<[1], [0], [0], [1], [0, 0, 1, 1], [], []>} : vector<64x32xf32>, vector<32x32xf32>, vector<64x32xf32> -> vector<64x32xf32>
    %329 = vector.broadcast %327 : vector<1x32xf32> to vector<64x32xf32>
    %330 = arith.addf %328, %329 : vector<64x32xf32>
    %cst_208 = arith.constant dense<0xFF800000> : vector<8x32xf32>
    %331 = vector.multi_reduction <maximumf>, %322, %cst_208 [1] : vector<8x8x32xf32> to vector<8x32xf32>
    %332 = vector.shape_cast %331 : vector<8x32xf32> to vector<8x1x32xf32>
    %333 = vector.broadcast %332 : vector<8x1x32xf32> to vector<8x8x32xf32>
    %334 = arith.subf %322, %333 : vector<8x8x32xf32>
    %335 = math.exp %334 : vector<8x8x32xf32>
    %cst_209 = arith.constant dense<0.000000e+00> : vector<8x32xf32>
    %336 = vector.multi_reduction <add>, %335, %cst_209 [1] : vector<8x8x32xf32> to vector<8x32xf32>
    %337 = vector.shape_cast %305 : vector<8x32xf32> to vector<1x8x32xf32>
    %338 = vector.broadcast %337 : vector<1x8x32xf32> to vector<8x8x32xf32>
    %339 = arith.mulf %335, %338 : vector<8x8x32xf32>
    %cst_210 = arith.constant dense<0.000000e+00> : vector<8x32xf32>
    %340 = vector.multi_reduction <add>, %339, %cst_210 [1] : vector<8x8x32xf32> to vector<8x32xf32>
    %341 = arith.divf %340, %336 : vector<8x32xf32>
    %c1_211 = arith.constant 1 : index
    %c0_212 = arith.constant 0 : index
    %c0_213 = arith.constant 0 : index
    %342 = vector.load %arg23[%c1_211, %c0_212, %c0_213] : memref<2x32x32xf32, #tpu.memory_space<vmem>>, vector<1x32x32xf32>
    %343 = vector.shape_cast %342 : vector<1x32x32xf32> to vector<32x32xf32>
    %c1_214 = arith.constant 1 : index
    %c0_215 = arith.constant 0 : index
    %c0_216 = arith.constant 0 : index
    %344 = vector.load %arg24[%c1_214, %c0_215, %c0_216] : memref<2x1x32xf32, #tpu.memory_space<vmem>>, vector<1x1x32xf32>
    %345 = vector.shape_cast %344 : vector<1x1x32xf32> to vector<1x32xf32>
    %cst_217 = arith.constant dense<0.000000e+00> : vector<8x32xf32>
    %346 = tpu.matmul %341, %343, %cst_217 {dimension_numbers = #tpu.dot_dimension_numbers<[1], [0], [0], [1], [0, 0, 1, 1], [], []>} : vector<8x32xf32>, vector<32x32xf32>, vector<8x32xf32> -> vector<8x32xf32>
    %347 = vector.broadcast %345 : vector<1x32xf32> to vector<8x32xf32>
    %348 = arith.addf %346, %347 : vector<8x32xf32>
    %349 = arith.addf %282, %348 : vector<8x32xf32>
    %c1_218 = arith.constant 1 : index
    %c0_219 = arith.constant 0 : index
    %c0_220 = arith.constant 0 : index
    %350 = vector.load %arg25[%c1_218, %c0_219, %c0_220] : memref<2x1x32xf32, #tpu.memory_space<vmem>>, vector<1x1x32xf32>
    %351 = vector.shape_cast %350 : vector<1x1x32xf32> to vector<1x32xf32>
    %c1_221 = arith.constant 1 : index
    %c0_222 = arith.constant 0 : index
    %c0_223 = arith.constant 0 : index
    %352 = vector.load %arg26[%c1_221, %c0_222, %c0_223] : memref<2x1x32xf32, #tpu.memory_space<vmem>>, vector<1x1x32xf32>
    %353 = vector.shape_cast %352 : vector<1x1x32xf32> to vector<1x32xf32>
    %cst_224 = arith.constant dense<0.000000e+00> : vector<8xf32>
    %354 = vector.multi_reduction <add>, %349, %cst_224 [1] : vector<8x32xf32> to vector<8xf32>
    %355 = vector.shape_cast %354 : vector<8xf32> to vector<8x1xf32>
    %cst_225 = arith.constant 3.200000e+01 : f32
    %356 = vector.broadcast %cst_225 : f32 to vector<8x1xf32>
    %357 = arith.divf %355, %356 : vector<8x1xf32>
    %358 = vector.broadcast %357 : vector<8x1xf32> to vector<8x32xf32>
    %359 = arith.subf %349, %358 : vector<8x32xf32>
    %360 = arith.mulf %359, %359 : vector<8x32xf32>
    %cst_226 = arith.constant dense<0.000000e+00> : vector<8xf32>
    %361 = vector.multi_reduction <add>, %360, %cst_226 [1] : vector<8x32xf32> to vector<8xf32>
    %362 = vector.shape_cast %361 : vector<8xf32> to vector<8x1xf32>
    %cst_227 = arith.constant 3.200000e+01 : f32
    %363 = vector.broadcast %cst_227 : f32 to vector<8x1xf32>
    %364 = arith.divf %362, %363 : vector<8x1xf32>
    %cst_228 = arith.constant 9.99999974E-6 : f32
    %365 = vector.broadcast %cst_228 : f32 to vector<8x1xf32>
    %366 = arith.addf %364, %365 : vector<8x1xf32>
    %367 = math.rsqrt %366 : vector<8x1xf32>
    %368 = vector.broadcast %367 : vector<8x1xf32> to vector<8x32xf32>
    %369 = arith.mulf %359, %368 : vector<8x32xf32>
    %370 = vector.broadcast %351 : vector<1x32xf32> to vector<8x32xf32>
    %371 = arith.mulf %369, %370 : vector<8x32xf32>
    %372 = vector.broadcast %353 : vector<1x32xf32> to vector<8x32xf32>
    %373 = arith.addf %371, %372 : vector<8x32xf32>
    %374 = arith.addf %258, %330 : vector<64x32xf32>
    %c1_229 = arith.constant 1 : index
    %c0_230 = arith.constant 0 : index
    %c0_231 = arith.constant 0 : index
    %375 = vector.load %arg27[%c1_229, %c0_230, %c0_231] : memref<2x1x32xf32, #tpu.memory_space<vmem>>, vector<1x1x32xf32>
    %376 = vector.shape_cast %375 : vector<1x1x32xf32> to vector<1x32xf32>
    %c1_232 = arith.constant 1 : index
    %c0_233 = arith.constant 0 : index
    %c0_234 = arith.constant 0 : index
    %377 = vector.load %arg28[%c1_232, %c0_233, %c0_234] : memref<2x1x32xf32, #tpu.memory_space<vmem>>, vector<1x1x32xf32>
    %378 = vector.shape_cast %377 : vector<1x1x32xf32> to vector<1x32xf32>
    %cst_235 = arith.constant dense<0.000000e+00> : vector<64xf32>
    %379 = vector.multi_reduction <add>, %374, %cst_235 [1] : vector<64x32xf32> to vector<64xf32>
    %380 = vector.shape_cast %379 : vector<64xf32> to vector<64x1xf32>
    %cst_236 = arith.constant 3.200000e+01 : f32
    %381 = vector.broadcast %cst_236 : f32 to vector<64x1xf32>
    %382 = arith.divf %380, %381 : vector<64x1xf32>
    %383 = vector.broadcast %382 : vector<64x1xf32> to vector<64x32xf32>
    %384 = arith.subf %374, %383 : vector<64x32xf32>
    %385 = arith.mulf %384, %384 : vector<64x32xf32>
    %cst_237 = arith.constant dense<0.000000e+00> : vector<64xf32>
    %386 = vector.multi_reduction <add>, %385, %cst_237 [1] : vector<64x32xf32> to vector<64xf32>
    %387 = vector.shape_cast %386 : vector<64xf32> to vector<64x1xf32>
    %cst_238 = arith.constant 3.200000e+01 : f32
    %388 = vector.broadcast %cst_238 : f32 to vector<64x1xf32>
    %389 = arith.divf %387, %388 : vector<64x1xf32>
    %cst_239 = arith.constant 9.99999974E-6 : f32
    %390 = vector.broadcast %cst_239 : f32 to vector<64x1xf32>
    %391 = arith.addf %389, %390 : vector<64x1xf32>
    %392 = math.rsqrt %391 : vector<64x1xf32>
    %393 = vector.broadcast %392 : vector<64x1xf32> to vector<64x32xf32>
    %394 = arith.mulf %384, %393 : vector<64x32xf32>
    %395 = vector.broadcast %376 : vector<1x32xf32> to vector<64x32xf32>
    %396 = arith.mulf %394, %395 : vector<64x32xf32>
    %397 = vector.broadcast %378 : vector<1x32xf32> to vector<64x32xf32>
    %398 = arith.addf %396, %397 : vector<64x32xf32>
    %c1_240 = arith.constant 1 : index
    %c0_241 = arith.constant 0 : index
    %c0_242 = arith.constant 0 : index
    %399 = vector.load %arg33[%c1_240, %c0_241, %c0_242] : memref<2x32x64xf32, #tpu.memory_space<vmem>>, vector<1x32x64xf32>
    %400 = vector.shape_cast %399 : vector<1x32x64xf32> to vector<32x64xf32>
    %c1_243 = arith.constant 1 : index
    %c0_244 = arith.constant 0 : index
    %c0_245 = arith.constant 0 : index
    %401 = vector.load %arg34[%c1_243, %c0_244, %c0_245] : memref<2x1x64xf32, #tpu.memory_space<vmem>>, vector<1x1x64xf32>
    %402 = vector.shape_cast %401 : vector<1x1x64xf32> to vector<1x64xf32>
    %cst_246 = arith.constant dense<0.000000e+00> : vector<8x64xf32>
    %403 = tpu.matmul %373, %400, %cst_246 {dimension_numbers = #tpu.dot_dimension_numbers<[1], [0], [0], [1], [0, 0, 1, 1], [], []>} : vector<8x32xf32>, vector<32x64xf32>, vector<8x64xf32> -> vector<8x64xf32>
    %404 = vector.broadcast %402 : vector<1x64xf32> to vector<8x64xf32>
    %405 = arith.addf %403, %404 : vector<8x64xf32>
    %cst_247 = arith.constant 0.000000e+00 : f32
    %406 = vector.broadcast %cst_247 : f32 to vector<8x64xf32>
    %407 = arith.maximumf %405, %406 : vector<8x64xf32>
    %c1_248 = arith.constant 1 : index
    %c0_249 = arith.constant 0 : index
    %c0_250 = arith.constant 0 : index
    %408 = vector.load %arg35[%c1_248, %c0_249, %c0_250] : memref<2x64x32xf32, #tpu.memory_space<vmem>>, vector<1x64x32xf32>
    %409 = vector.shape_cast %408 : vector<1x64x32xf32> to vector<64x32xf32>
    %c1_251 = arith.constant 1 : index
    %c0_252 = arith.constant 0 : index
    %c0_253 = arith.constant 0 : index
    %410 = vector.load %arg36[%c1_251, %c0_252, %c0_253] : memref<2x1x32xf32, #tpu.memory_space<vmem>>, vector<1x1x32xf32>
    %411 = vector.shape_cast %410 : vector<1x1x32xf32> to vector<1x32xf32>
    %cst_254 = arith.constant dense<0.000000e+00> : vector<8x32xf32>
    %412 = tpu.matmul %407, %409, %cst_254 {dimension_numbers = #tpu.dot_dimension_numbers<[1], [0], [0], [1], [0, 0, 1, 1], [], []>} : vector<8x64xf32>, vector<64x32xf32>, vector<8x32xf32> -> vector<8x32xf32>
    %413 = vector.broadcast %411 : vector<1x32xf32> to vector<8x32xf32>
    %414 = arith.addf %412, %413 : vector<8x32xf32>
    %c1_255 = arith.constant 1 : index
    %c0_256 = arith.constant 0 : index
    %c0_257 = arith.constant 0 : index
    %415 = vector.load %arg37[%c1_255, %c0_256, %c0_257] : memref<2x32x64xf32, #tpu.memory_space<vmem>>, vector<1x32x64xf32>
    %416 = vector.shape_cast %415 : vector<1x32x64xf32> to vector<32x64xf32>
    %c1_258 = arith.constant 1 : index
    %c0_259 = arith.constant 0 : index
    %c0_260 = arith.constant 0 : index
    %417 = vector.load %arg38[%c1_258, %c0_259, %c0_260] : memref<2x1x64xf32, #tpu.memory_space<vmem>>, vector<1x1x64xf32>
    %418 = vector.shape_cast %417 : vector<1x1x64xf32> to vector<1x64xf32>
    %cst_261 = arith.constant dense<0.000000e+00> : vector<64x64xf32>
    %419 = tpu.matmul %398, %416, %cst_261 {dimension_numbers = #tpu.dot_dimension_numbers<[1], [0], [0], [1], [0, 0, 1, 1], [], []>} : vector<64x32xf32>, vector<32x64xf32>, vector<64x64xf32> -> vector<64x64xf32>
    %420 = vector.broadcast %418 : vector<1x64xf32> to vector<64x64xf32>
    %421 = arith.addf %419, %420 : vector<64x64xf32>
    %cst_262 = arith.constant 0.000000e+00 : f32
    %422 = vector.broadcast %cst_262 : f32 to vector<64x64xf32>
    %423 = arith.maximumf %421, %422 : vector<64x64xf32>
    %c1_263 = arith.constant 1 : index
    %c0_264 = arith.constant 0 : index
    %c0_265 = arith.constant 0 : index
    %424 = vector.load %arg39[%c1_263, %c0_264, %c0_265] : memref<2x64x32xf32, #tpu.memory_space<vmem>>, vector<1x64x32xf32>
    %425 = vector.shape_cast %424 : vector<1x64x32xf32> to vector<64x32xf32>
    %c1_266 = arith.constant 1 : index
    %c0_267 = arith.constant 0 : index
    %c0_268 = arith.constant 0 : index
    %426 = vector.load %arg40[%c1_266, %c0_267, %c0_268] : memref<2x1x32xf32, #tpu.memory_space<vmem>>, vector<1x1x32xf32>
    %427 = vector.shape_cast %426 : vector<1x1x32xf32> to vector<1x32xf32>
    %cst_269 = arith.constant dense<0.000000e+00> : vector<64x32xf32>
    %428 = tpu.matmul %423, %425, %cst_269 {dimension_numbers = #tpu.dot_dimension_numbers<[1], [0], [0], [1], [0, 0, 1, 1], [], []>} : vector<64x64xf32>, vector<64x32xf32>, vector<64x32xf32> -> vector<64x32xf32>
    %429 = vector.broadcast %427 : vector<1x32xf32> to vector<64x32xf32>
    %430 = arith.addf %428, %429 : vector<64x32xf32>
    %431 = arith.addf %373, %414 : vector<8x32xf32>
    %c1_270 = arith.constant 1 : index
    %c0_271 = arith.constant 0 : index
    %c0_272 = arith.constant 0 : index
    %432 = vector.load %arg29[%c1_270, %c0_271, %c0_272] : memref<2x1x32xf32, #tpu.memory_space<vmem>>, vector<1x1x32xf32>
    %433 = vector.shape_cast %432 : vector<1x1x32xf32> to vector<1x32xf32>
    %c1_273 = arith.constant 1 : index
    %c0_274 = arith.constant 0 : index
    %c0_275 = arith.constant 0 : index
    %434 = vector.load %arg30[%c1_273, %c0_274, %c0_275] : memref<2x1x32xf32, #tpu.memory_space<vmem>>, vector<1x1x32xf32>
    %435 = vector.shape_cast %434 : vector<1x1x32xf32> to vector<1x32xf32>
    %cst_276 = arith.constant dense<0.000000e+00> : vector<8xf32>
    %436 = vector.multi_reduction <add>, %431, %cst_276 [1] : vector<8x32xf32> to vector<8xf32>
    %437 = vector.shape_cast %436 : vector<8xf32> to vector<8x1xf32>
    %cst_277 = arith.constant 3.200000e+01 : f32
    %438 = vector.broadcast %cst_277 : f32 to vector<8x1xf32>
    %439 = arith.divf %437, %438 : vector<8x1xf32>
    %440 = vector.broadcast %439 : vector<8x1xf32> to vector<8x32xf32>
    %441 = arith.subf %431, %440 : vector<8x32xf32>
    %442 = arith.mulf %441, %441 : vector<8x32xf32>
    %cst_278 = arith.constant dense<0.000000e+00> : vector<8xf32>
    %443 = vector.multi_reduction <add>, %442, %cst_278 [1] : vector<8x32xf32> to vector<8xf32>
    %444 = vector.shape_cast %443 : vector<8xf32> to vector<8x1xf32>
    %cst_279 = arith.constant 3.200000e+01 : f32
    %445 = vector.broadcast %cst_279 : f32 to vector<8x1xf32>
    %446 = arith.divf %444, %445 : vector<8x1xf32>
    %cst_280 = arith.constant 9.99999974E-6 : f32
    %447 = vector.broadcast %cst_280 : f32 to vector<8x1xf32>
    %448 = arith.addf %446, %447 : vector<8x1xf32>
    %449 = math.rsqrt %448 : vector<8x1xf32>
    %450 = vector.broadcast %449 : vector<8x1xf32> to vector<8x32xf32>
    %451 = arith.mulf %441, %450 : vector<8x32xf32>
    %452 = vector.broadcast %433 : vector<1x32xf32> to vector<8x32xf32>
    %453 = arith.mulf %451, %452 : vector<8x32xf32>
    %454 = vector.broadcast %435 : vector<1x32xf32> to vector<8x32xf32>
    %455 = arith.addf %453, %454 : vector<8x32xf32>
    %456 = arith.addf %398, %430 : vector<64x32xf32>
    %c1_281 = arith.constant 1 : index
    %c0_282 = arith.constant 0 : index
    %c0_283 = arith.constant 0 : index
    %457 = vector.load %arg31[%c1_281, %c0_282, %c0_283] : memref<2x1x32xf32, #tpu.memory_space<vmem>>, vector<1x1x32xf32>
    %458 = vector.shape_cast %457 : vector<1x1x32xf32> to vector<1x32xf32>
    %c1_284 = arith.constant 1 : index
    %c0_285 = arith.constant 0 : index
    %c0_286 = arith.constant 0 : index
    %459 = vector.load %arg32[%c1_284, %c0_285, %c0_286] : memref<2x1x32xf32, #tpu.memory_space<vmem>>, vector<1x1x32xf32>
    %460 = vector.shape_cast %459 : vector<1x1x32xf32> to vector<1x32xf32>
    %cst_287 = arith.constant dense<0.000000e+00> : vector<64xf32>
    %461 = vector.multi_reduction <add>, %456, %cst_287 [1] : vector<64x32xf32> to vector<64xf32>
    %462 = vector.shape_cast %461 : vector<64xf32> to vector<64x1xf32>
    %cst_288 = arith.constant 3.200000e+01 : f32
    %463 = vector.broadcast %cst_288 : f32 to vector<64x1xf32>
    %464 = arith.divf %462, %463 : vector<64x1xf32>
    %465 = vector.broadcast %464 : vector<64x1xf32> to vector<64x32xf32>
    %466 = arith.subf %456, %465 : vector<64x32xf32>
    %467 = arith.mulf %466, %466 : vector<64x32xf32>
    %cst_289 = arith.constant dense<0.000000e+00> : vector<64xf32>
    %468 = vector.multi_reduction <add>, %467, %cst_289 [1] : vector<64x32xf32> to vector<64xf32>
    %469 = vector.shape_cast %468 : vector<64xf32> to vector<64x1xf32>
    %cst_290 = arith.constant 3.200000e+01 : f32
    %470 = vector.broadcast %cst_290 : f32 to vector<64x1xf32>
    %471 = arith.divf %469, %470 : vector<64x1xf32>
    %cst_291 = arith.constant 9.99999974E-6 : f32
    %472 = vector.broadcast %cst_291 : f32 to vector<64x1xf32>
    %473 = arith.addf %471, %472 : vector<64x1xf32>
    %474 = math.rsqrt %473 : vector<64x1xf32>
    %475 = vector.broadcast %474 : vector<64x1xf32> to vector<64x32xf32>
    %476 = arith.mulf %466, %475 : vector<64x32xf32>
    %477 = vector.broadcast %458 : vector<1x32xf32> to vector<64x32xf32>
    %478 = arith.mulf %476, %477 : vector<64x32xf32>
    %479 = vector.broadcast %460 : vector<1x32xf32> to vector<64x32xf32>
    %480 = arith.addf %478, %479 : vector<64x32xf32>
    %c0_292 = arith.constant 0 : index
    %c0_293 = arith.constant 0 : index
    %481 = vector.load %arg41[%c0_292, %c0_293] : memref<32x128xf32, #tpu.memory_space<vmem>>, vector<32x128xf32>
    %c0_294 = arith.constant 0 : index
    %c0_295 = arith.constant 0 : index
    %482 = vector.load %arg42[%c0_294, %c0_295] : memref<1x128xf32, #tpu.memory_space<vmem>>, vector<1x128xf32>
    %cst_296 = arith.constant dense<0.000000e+00> : vector<8x128xf32>
    %483 = tpu.matmul %455, %481, %cst_296 {dimension_numbers = #tpu.dot_dimension_numbers<[1], [0], [0], [1], [0, 0, 1, 1], [], []>} : vector<8x32xf32>, vector<32x128xf32>, vector<8x128xf32> -> vector<8x128xf32>
    %484 = vector.broadcast %482 : vector<1x128xf32> to vector<8x128xf32>
    %485 = arith.addf %483, %484 : vector<8x128xf32>
    %cst_297 = arith.constant dense<0xFF800000> : vector<8xf32>
    %486 = vector.multi_reduction <maximumf>, %485, %cst_297 [1] : vector<8x128xf32> to vector<8xf32>
    %487 = vector.shape_cast %486 : vector<8xf32> to vector<8x1xf32>
    %488 = vector.broadcast %487 : vector<8x1xf32> to vector<8x128xf32>
    %489 = arith.subf %485, %488 : vector<8x128xf32>
    %490 = math.exp %489 : vector<8x128xf32>
    %cst_298 = arith.constant dense<0.000000e+00> : vector<8xf32>
    %491 = vector.multi_reduction <add>, %490, %cst_298 [1] : vector<8x128xf32> to vector<8xf32>
    %492 = vector.shape_cast %491 : vector<8xf32> to vector<8x1xf32>
    %493 = vector.broadcast %492 : vector<8x1xf32> to vector<8x128xf32>
    %494 = arith.divf %490, %493 : vector<8x128xf32>
    %c0_299 = arith.constant 0 : index
    %c0_300 = arith.constant 0 : index
    %c0_301 = arith.constant 0 : index
    %495 = vector.load %arg47[%c0_299, %c0_300, %c0_301] : memref<1x8x128xf32, #tpu.memory_space<vmem>>, vector<1x8x128xf32>
    %496 = vector.shape_cast %495 : vector<1x8x128xf32> to vector<8x128xf32>
    %497 = vector.shape_cast %494 : vector<8x128xf32> to vector<1x8x128xf32>
    tpu.vector_store %arg47[%c0_299, %c0_300, %c0_301], %497 {strides = array<i32>} : memref<1x8x128xf32, #tpu.memory_space<vmem>>, vector<1x8x128xf32>,
    %c0_302 = arith.constant 0 : index
    %c0_303 = arith.constant 0 : index
    %498 = vector.load %arg43[%c0_302, %c0_303] : memref<32x128xf32, #tpu.memory_space<vmem>>, vector<32x128xf32>
    %c0_304 = arith.constant 0 : index
    %c0_305 = arith.constant 0 : index
    %499 = vector.load %arg44[%c0_304, %c0_305] : memref<1x128xf32, #tpu.memory_space<vmem>>, vector<1x128xf32>
    %cst_306 = arith.constant dense<0.000000e+00> : vector<64x128xf32>
    %500 = tpu.matmul %480, %498, %cst_306 {dimension_numbers = #tpu.dot_dimension_numbers<[1], [0], [0], [1], [0, 0, 1, 1], [], []>} : vector<64x32xf32>, vector<32x128xf32>, vector<64x128xf32> -> vector<64x128xf32>
    %501 = vector.broadcast %499 : vector<1x128xf32> to vector<64x128xf32>
    %502 = arith.addf %500, %501 : vector<64x128xf32>
    %cst_307 = arith.constant dense<0xFF800000> : vector<64xf32>
    %503 = vector.multi_reduction <maximumf>, %502, %cst_307 [1] : vector<64x128xf32> to vector<64xf32>
    %504 = vector.shape_cast %503 : vector<64xf32> to vector<64x1xf32>
    %505 = vector.broadcast %504 : vector<64x1xf32> to vector<64x128xf32>
    %506 = arith.subf %502, %505 : vector<64x128xf32>
    %507 = math.exp %506 : vector<64x128xf32>
    %cst_308 = arith.constant dense<0.000000e+00> : vector<64xf32>
    %508 = vector.multi_reduction <add>, %507, %cst_308 [1] : vector<64x128xf32> to vector<64xf32>
    %509 = vector.shape_cast %508 : vector<64xf32> to vector<64x1xf32>
    %510 = vector.broadcast %509 : vector<64x1xf32> to vector<64x128xf32>
    %511 = arith.divf %507, %510 : vector<64x128xf32>
    %c0_309 = arith.constant 0 : index
    %c0_310 = arith.constant 0 : index
    %c0_311 = arith.constant 0 : index
    %512 = vector.load %arg48[%c0_309, %c0_310, %c0_311] : memref<1x64x128xf32, #tpu.memory_space<vmem>>, vector<1x64x128xf32>
    %513 = vector.shape_cast %512 : vector<1x64x128xf32> to vector<64x128xf32>
    %514 = vector.shape_cast %511 : vector<64x128xf32> to vector<1x64x128xf32>
    tpu.vector_store %arg48[%c0_309, %c0_310, %c0_311], %514 {strides = array<i32>} : memref<1x64x128xf32, #tpu.memory_space<vmem>>, vector<1x64x128xf32>,
    %c0_312 = arith.constant 0 : index
    %c0_313 = arith.constant 0 : index
    %c0_314 = arith.constant 0 : index
    %515 = vector.load %arg45[%c0_312, %c0_313, %c0_314] : memref<1x8x32xf32, #tpu.memory_space<vmem>>, vector<1x8x32xf32>
    %516 = vector.shape_cast %515 : vector<1x8x32xf32> to vector<8x32xf32>
    %517 = vector.shape_cast %455 : vector<8x32xf32> to vector<1x8x32xf32>
    tpu.vector_store %arg45[%c0_312, %c0_313, %c0_314], %517 {strides = array<i32>} : memref<1x8x32xf32, #tpu.memory_space<vmem>>, vector<1x8x32xf32>,
    %c0_315 = arith.constant 0 : index
    %c0_316 = arith.constant 0 : index
    %c0_317 = arith.constant 0 : index
    %518 = vector.load %arg46[%c0_315, %c0_316, %c0_317] : memref<1x64x32xf32, #tpu.memory_space<vmem>>, vector<1x64x32xf32>
    %519 = vector.shape_cast %518 : vector<1x64x32xf32> to vector<64x32xf32>
    %520 = vector.shape_cast %480 : vector<64x32xf32> to vector<1x64x32xf32>
    tpu.vector_store %arg46[%c0_315, %c0_316, %c0_317], %520 {strides = array<i32>} : memref<1x64x32xf32, #tpu.memory_space<vmem>>, vector<1x64x32xf32>,
    return
  }
  func.func @transform_0(%arg0: i32) -> (i32, i32, i32) {
    %c0_i32 = arith.constant 0 : i32
    %c0_i32_0 = arith.constant 0 : i32
    %c0_i32_1 = arith.constant 0 : i32
    return %arg0, %c0_i32, %c0_i32_0 : i32, i32, i32
  }
  func.func @transform_1(%arg0: i32) -> (i32, i32, i32) {
    %c0_i32 = arith.constant 0 : i32
    %c0_i32_0 = arith.constant 0 : i32
    %c0_i32_1 = arith.constant 0 : i32
    return %arg0, %c0_i32, %c0_i32_0 : i32, i32, i32
  }
  func.func @transform_2(%arg0: i32) -> (i32, i32) {
    %c0_i32 = arith.constant 0 : i32
    %c0_i32_0 = arith.constant 0 : i32
    %c0_i32_1 = arith.constant 0 : i32
    return %c0_i32, %c0_i32_0 : i32, i32
  }
  func.func @transform_3(%arg0: i32) -> (i32, i32) {
    %c0_i32 = arith.constant 0 : i32
    %c0_i32_0 = arith.constant 0 : i32
    %c0_i32_1 = arith.constant 0 : i32
    return %c0_i32, %c0_i32_0 : i32, i32
  }
  func.func @transform_4(%arg0: i32) -> (i32, i32) {
    %c0_i32 = arith.constant 0 : i32
    %c0_i32_0 = arith.constant 0 : i32
    %c0_i32_1 = arith.constant 0 : i32
    return %c0_i32, %c0_i32_0 : i32, i32
  }
  func.func @transform_5(%arg0: i32) -> (i32, i32) {
    %c0_i32 = arith.constant 0 : i32
    %c0_i32_0 = arith.constant 0 : i32
    %c0_i32_1 = arith.constant 0 : i32
    return %c0_i32, %c0_i32_0 : i32, i32
  }
  func.func @transform_6(%arg0: i32) -> (i32, i32) {
    %c0_i32 = arith.constant 0 : i32
    %c0_i32_0 = arith.constant 0 : i32
    %c0_i32_1 = arith.constant 0 : i32
    return %c0_i32, %c0_i32_0 : i32, i32
  }
  func.func @transform_7(%arg0: i32) -> (i32, i32) {
    %c0_i32 = arith.constant 0 : i32
    %c0_i32_0 = arith.constant 0 : i32
    %c0_i32_1 = arith.constant 0 : i32
    return %c0_i32, %c0_i32_0 : i32, i32
  }
  func.func @transform_8(%arg0: i32) -> (i32, i32) {
    %c0_i32 = arith.constant 0 : i32
    %c0_i32_0 = arith.constant 0 : i32
    %c0_i32_1 = arith.constant 0 : i32
    return %c0_i32, %c0_i32_0 : i32, i32
  }
  func.func @transform_9(%arg0: i32) -> (i32, i32) {
    %c0_i32 = arith.constant 0 : i32
    %c0_i32_0 = arith.constant 0 : i32
    %c0_i32_1 = arith.constant 0 : i32
    return %c0_i32, %c0_i32_0 : i32, i32
  }
  func.func @transform_10(%arg0: i32) -> (i32, i32, i32) {
    %c0_i32 = arith.constant 0 : i32
    %c0_i32_0 = arith.constant 0 : i32
    %c0_i32_1 = arith.constant 0 : i32
    %c0_i32_2 = arith.constant 0 : i32
    return %c0_i32, %c0_i32_0, %c0_i32_1 : i32, i32, i32
  }
  func.func @transform_11(%arg0: i32) -> (i32, i32, i32) {
    %c0_i32 = arith.constant 0 : i32
    %c0_i32_0 = arith.constant 0 : i32
    %c0_i32_1 = arith.constant 0 : i32
    %c0_i32_2 = arith.constant 0 : i32
    return %c0_i32, %c0_i32_0, %c0_i32_1 : i32, i32, i32
  }
  func.func @transform_12(%arg0: i32) -> (i32, i32, i32) {
    %c0_i32 = arith.constant 0 : i32
    %c0_i32_0 = arith.constant 0 : i32
    %c0_i32_1 = arith.constant 0 : i32
    %c0_i32_2 = arith.constant 0 : i32
    return %c0_i32, %c0_i32_0, %c0_i32_1 : i32, i32, i32
  }
  func.func @transform_13(%arg0: i32) -> (i32, i32, i32) {
    %c0_i32 = arith.constant 0 : i32
    %c0_i32_0 = arith.constant 0 : i32
    %c0_i32_1 = arith.constant 0 : i32
    %c0_i32_2 = arith.constant 0 : i32
    return %c0_i32, %c0_i32_0, %c0_i32_1 : i32, i32, i32
  }
  func.func @transform_14(%arg0: i32) -> (i32, i32, i32) {
    %c0_i32 = arith.constant 0 : i32
    %c0_i32_0 = arith.constant 0 : i32
    %c0_i32_1 = arith.constant 0 : i32
    %c0_i32_2 = arith.constant 0 : i32
    return %c0_i32, %c0_i32_0, %c0_i32_1 : i32, i32, i32
  }
  func.func @transform_15(%arg0: i32) -> (i32, i32, i32) {
    %c0_i32 = arith.constant 0 : i32
    %c0_i32_0 = arith.constant 0 : i32
    %c0_i32_1 = arith.constant 0 : i32
    %c0_i32_2 = arith.constant 0 : i32
    return %c0_i32, %c0_i32_0, %c0_i32_1 : i32, i32, i32
  }
  func.func @transform_16(%arg0: i32) -> (i32, i32, i32) {
    %c0_i32 = arith.constant 0 : i32
    %c0_i32_0 = arith.constant 0 : i32
    %c0_i32_1 = arith.constant 0 : i32
    %c0_i32_2 = arith.constant 0 : i32
    return %c0_i32, %c0_i32_0, %c0_i32_1 : i32, i32, i32
  }
  func.func @transform_17(%arg0: i32) -> (i32, i32, i32) {
    %c0_i32 = arith.constant 0 : i32
    %c0_i32_0 = arith.constant 0 : i32
    %c0_i32_1 = arith.constant 0 : i32
    %c0_i32_2 = arith.constant 0 : i32
    return %c0_i32, %c0_i32_0, %c0_i32_1 : i32, i32, i32
  }
  func.func @transform_18(%arg0: i32) -> (i32, i32, i32) {
    %c0_i32 = arith.constant 0 : i32
    %c0_i32_0 = arith.constant 0 : i32
    %c0_i32_1 = arith.constant 0 : i32
    %c0_i32_2 = arith.constant 0 : i32
    return %c0_i32, %c0_i32_0, %c0_i32_1 : i32, i32, i32
  }
  func.func @transform_19(%arg0: i32) -> (i32, i32, i32) {
    %c0_i32 = arith.constant 0 : i32
    %c0_i32_0 = arith.constant 0 : i32
    %c0_i32_1 = arith.constant 0 : i32
    %c0_i32_2 = arith.constant 0 : i32
    return %c0_i32, %c0_i32_0, %c0_i32_1 : i32, i32, i32
  }
  func.func @transform_20(%arg0: i32) -> (i32, i32, i32) {
    %c0_i32 = arith.constant 0 : i32
    %c0_i32_0 = arith.constant 0 : i32
    %c0_i32_1 = arith.constant 0 : i32
    %c0_i32_2 = arith.constant 0 : i32
    return %c0_i32, %c0_i32_0, %c0_i32_1 : i32, i32, i32
  }
  func.func @transform_21(%arg0: i32) -> (i32, i32, i32) {
    %c0_i32 = arith.constant 0 : i32
    %c0_i32_0 = arith.constant 0 : i32
    %c0_i32_1 = arith.constant 0 : i32
    %c0_i32_2 = arith.constant 0 : i32
    return %c0_i32, %c0_i32_0, %c0_i32_1 : i32, i32, i32
  }
  func.func @transform_22(%arg0: i32) -> (i32, i32, i32) {
    %c0_i32 = arith.constant 0 : i32
    %c0_i32_0 = arith.constant 0 : i32
    %c0_i32_1 = arith.constant 0 : i32
    %c0_i32_2 = arith.constant 0 : i32
    return %c0_i32, %c0_i32_0, %c0_i32_1 : i32, i32, i32
  }
  func.func @transform_23(%arg0: i32) -> (i32, i32, i32) {
    %c0_i32 = arith.constant 0 : i32
    %c0_i32_0 = arith.constant 0 : i32
    %c0_i32_1 = arith.constant 0 : i32
    %c0_i32_2 = arith.constant 0 : i32
    return %c0_i32, %c0_i32_0, %c0_i32_1 : i32, i32, i32
  }
  func.func @transform_24(%arg0: i32) -> (i32, i32, i32) {
    %c0_i32 = arith.constant 0 : i32
    %c0_i32_0 = arith.constant 0 : i32
    %c0_i32_1 = arith.constant 0 : i32
    %c0_i32_2 = arith.constant 0 : i32
    return %c0_i32, %c0_i32_0, %c0_i32_1 : i32, i32, i32
  }
  func.func @transform_25(%arg0: i32) -> (i32, i32, i32) {
    %c0_i32 = arith.constant 0 : i32
    %c0_i32_0 = arith.constant 0 : i32
    %c0_i32_1 = arith.constant 0 : i32
    %c0_i32_2 = arith.constant 0 : i32
    return %c0_i32, %c0_i32_0, %c0_i32_1 : i32, i32, i32
  }
  func.func @transform_26(%arg0: i32) -> (i32, i32, i32) {
    %c0_i32 = arith.constant 0 : i32
    %c0_i32_0 = arith.constant 0 : i32
    %c0_i32_1 = arith.constant 0 : i32
    %c0_i32_2 = arith.constant 0 : i32
    return %c0_i32, %c0_i32_0, %c0_i32_1 : i32, i32, i32
  }
  func.func @transform_27(%arg0: i32) -> (i32, i32, i32) {
    %c0_i32 = arith.constant 0 : i32
    %c0_i32_0 = arith.constant 0 : i32
    %c0_i32_1 = arith.constant 0 : i32
    %c0_i32_2 = arith.constant 0 : i32
    return %c0_i32, %c0_i32_0, %c0_i32_1 : i32, i32, i32
  }
  func.func @transform_28(%arg0: i32) -> (i32, i32, i32) {
    %c0_i32 = arith.constant 0 : i32
    %c0_i32_0 = arith.constant 0 : i32
    %c0_i32_1 = arith.constant 0 : i32
    %c0_i32_2 = arith.constant 0 : i32
    return %c0_i32, %c0_i32_0, %c0_i32_1 : i32, i32, i32
  }
  func.func @transform_29(%arg0: i32) -> (i32, i32, i32) {
    %c0_i32 = arith.constant 0 : i32
    %c0_i32_0 = arith.constant 0 : i32
    %c0_i32_1 = arith.constant 0 : i32
    %c0_i32_2 = arith.constant 0 : i32
    return %c0_i32, %c0_i32_0, %c0_i32_1 : i32, i32, i32
  }
  func.func @transform_30(%arg0: i32) -> (i32, i32, i32) {
    %c0_i32 = arith.constant 0 : i32
    %c0_i32_0 = arith.constant 0 : i32
    %c0_i32_1 = arith.constant 0 : i32
    %c0_i32_2 = arith.constant 0 : i32
    return %c0_i32, %c0_i32_0, %c0_i32_1 : i32, i32, i32
  }
  func.func @transform_31(%arg0: i32) -> (i32, i32, i32) {
    %c0_i32 = arith.constant 0 : i32
    %c0_i32_0 = arith.constant 0 : i32
    %c0_i32_1 = arith.constant 0 : i32
    %c0_i32_2 = arith.constant 0 : i32
    return %c0_i32, %c0_i32_0, %c0_i32_1 : i32, i32, i32
  }
  func.func @transform_32(%arg0: i32) -> (i32, i32, i32) {
    %c0_i32 = arith.constant 0 : i32
    %c0_i32_0 = arith.constant 0 : i32
    %c0_i32_1 = arith.constant 0 : i32
    %c0_i32_2 = arith.constant 0 : i32
    return %c0_i32, %c0_i32_0, %c0_i32_1 : i32, i32, i32
  }
  func.func @transform_33(%arg0: i32) -> (i32, i32, i32) {
    %c0_i32 = arith.constant 0 : i32
    %c0_i32_0 = arith.constant 0 : i32
    %c0_i32_1 = arith.constant 0 : i32
    %c0_i32_2 = arith.constant 0 : i32
    return %c0_i32, %c0_i32_0, %c0_i32_1 : i32, i32, i32
  }
  func.func @transform_34(%arg0: i32) -> (i32, i32, i32) {
    %c0_i32 = arith.constant 0 : i32
    %c0_i32_0 = arith.constant 0 : i32
    %c0_i32_1 = arith.constant 0 : i32
    %c0_i32_2 = arith.constant 0 : i32
    return %c0_i32, %c0_i32_0, %c0_i32_1 : i32, i32, i32
  }
  func.func @transform_35(%arg0: i32) -> (i32, i32, i32) {
    %c0_i32 = arith.constant 0 : i32
    %c0_i32_0 = arith.constant 0 : i32
    %c0_i32_1 = arith.constant 0 : i32
    %c0_i32_2 = arith.constant 0 : i32
    return %c0_i32, %c0_i32_0, %c0_i32_1 : i32, i32, i32
  }
  func.func @transform_36(%arg0: i32) -> (i32, i32, i32) {
    %c0_i32 = arith.constant 0 : i32
    %c0_i32_0 = arith.constant 0 : i32
    %c0_i32_1 = arith.constant 0 : i32
    %c0_i32_2 = arith.constant 0 : i32
    return %c0_i32, %c0_i32_0, %c0_i32_1 : i32, i32, i32
  }
  func.func @transform_37(%arg0: i32) -> (i32, i32, i32) {
    %c0_i32 = arith.constant 0 : i32
    %c0_i32_0 = arith.constant 0 : i32
    %c0_i32_1 = arith.constant 0 : i32
    %c0_i32_2 = arith.constant 0 : i32
    return %c0_i32, %c0_i32_0, %c0_i32_1 : i32, i32, i32
  }
  func.func @transform_38(%arg0: i32) -> (i32, i32, i32) {
    %c0_i32 = arith.constant 0 : i32
    %c0_i32_0 = arith.constant 0 : i32
    %c0_i32_1 = arith.constant 0 : i32
    %c0_i32_2 = arith.constant 0 : i32
    return %c0_i32, %c0_i32_0, %c0_i32_1 : i32, i32, i32
  }
  func.func @transform_39(%arg0: i32) -> (i32, i32, i32) {
    %c0_i32 = arith.constant 0 : i32
    %c0_i32_0 = arith.constant 0 : i32
    %c0_i32_1 = arith.constant 0 : i32
    %c0_i32_2 = arith.constant 0 : i32
    return %c0_i32, %c0_i32_0, %c0_i32_1 : i32, i32, i32
  }
  func.func @transform_40(%arg0: i32) -> (i32, i32) {
    %c0_i32 = arith.constant 0 : i32
    %c0_i32_0 = arith.constant 0 : i32
    %c0_i32_1 = arith.constant 0 : i32
    return %c0_i32, %c0_i32_0 : i32, i32
  }
  func.func @transform_41(%arg0: i32) -> (i32, i32) {
    %c0_i32 = arith.constant 0 : i32
    %c0_i32_0 = arith.constant 0 : i32
    %c0_i32_1 = arith.constant 0 : i32
    return %c0_i32, %c0_i32_0 : i32, i32
  }
  func.func @transform_42(%arg0: i32) -> (i32, i32) {
    %c0_i32 = arith.constant 0 : i32
    %c0_i32_0 = arith.constant 0 : i32
    %c0_i32_1 = arith.constant 0 : i32
    return %c0_i32, %c0_i32_0 : i32, i32
  }
  func.func @transform_43(%arg0: i32) -> (i32, i32) {
    %c0_i32 = arith.constant 0 : i32
    %c0_i32_0 = arith.constant 0 : i32
    %c0_i32_1 = arith.constant 0 : i32
    return %c0_i32, %c0_i32_0 : i32, i32
  }
  func.func @transform_44(%arg0: i32) -> (i32, i32, i32) {
    %c0_i32 = arith.constant 0 : i32
    %c0_i32_0 = arith.constant 0 : i32
    %c0_i32_1 = arith.constant 0 : i32
    return %arg0, %c0_i32, %c0_i32_0 : i32, i32, i32
  }
  func.func @transform_45(%arg0: i32) -> (i32, i32, i32) {
    %c0_i32 = arith.constant 0 : i32
    %c0_i32_0 = arith.constant 0 : i32
    %c0_i32_1 = arith.constant 0 : i32
    return %arg0, %c0_i32, %c0_i32_0 : i32, i32, i32
  }
  func.func @transform_46(%arg0: i32) -> (i32, i32, i32) {
    %c0_i32 = arith.constant 0 : i32
    %c0_i32_0 = arith.constant 0 : i32
    %c0_i32_1 = arith.constant 0 : i32
    return %arg0, %c0_i32, %c0_i32_0 : i32, i32, i32
  }
  func.func @transform_47(%arg0: i32) -> (i32, i32, i32) {
    %c0_i32 = arith.constant 0 : i32
    %c0_i32_0 = arith.constant 0 : i32
    %c0_i32_1 = arith.constant 0 : i32
    return %arg0, %c0_i32, %c0_i32_0 : i32, i32, i32
  }
}

</mosaic_0001>

<bundles_post_ra>
// kernel: generator_forward.1
= control target key start
LH: loop header
LB: loop body
LE: loop exit
PB: predicated region body
PF: predicated region fallthrough
CT: control target
= control target key end

     0   :  { %s7631_s6 = smov 1   ;;  %s7632_s10 = smov 2   ;;  %s9208_s0 = inlined_call_operand.smem [shape: u32[48], index: -1, kind: input, shape index: {}] }
   0x1   :  { %s7693_s5 = sld [smem:[%s9208_s0]]   ;;  %s7633_s14 = smov 3  }
   0x2   :  { %s7698_s9 = sld [smem:[%s9208_s0 + %s7631_s6]]   ;;  %s7634_s18 = smov 4  }
   0x3   :  { %s7703_s13 = sld [smem:[%s9208_s0 + %s7632_s10]]   ;;  %s7635_s22 = smov 5  }
   0x4   :  { %s7708_s17 = sld [smem:[%s9208_s0 + %s7633_s14]]   ;;  %s7636_s26 = smov 6  }
   0x5   :  { %s7713_s21 = sld [smem:[%s9208_s0 + %s7634_s18]]   ;;  %s7637_s30 = smov 7  }
   0x6   :  { %s7718_s25 = sld [smem:[%s9208_s0 + %s7635_s22]]   ;;  %s7638_s4 = smov 8  }
   0x7   :  { %9271 = sst [smem:[#allocation8_spill]] %s7693_s5  ;;  %s7639_s10 = smov 9  }
   0x8   :  { %9272 = sst [smem:[#allocation9_spill]] %s7698_s9  ;;  %s7640_s15 = smov 10  }
   0x9   :  { %9273 = sst [smem:[#allocation10_spill]] %s7703_s13  ;;  %s7641_s20 = smov 11  }
   0xa   :  { %9274 = sst [smem:[#allocation11_spill]] %s7708_s17  ;;  %s7643_s1 = smov 13  }
   0xb   :  { %9275 = sst [smem:[#allocation12_spill]] %s7713_s21  ;;  %s7644_s7 = smov 14  }
   0xc   :  { %9276 = sst [smem:[#allocation13_spill]] %s7718_s25  ;;  %s7646_s22 = smov 16  }
   0xd   :  { %s7723_s29 = sld [smem:[%s9208_s0 + %s7636_s26]]   ;;  %s7642_s26 = smov 12  }
   0xe   :  { %s7728_s3 = sld [smem:[%s9208_s0 + %s7637_s30]]   ;;  %s7647_s28 = smov 17  }
   0xf   :  { %s7733_s8 = sld [smem:[%s9208_s0 + %s7638_s4]]  }
  0x10   :  { %s7738_s14 = sld [smem:[%s9208_s0 + %s7639_s10]]  }
  0x11   :  { %s7743_s19 = sld [smem:[%s9208_s0 + %s7640_s15]]   ;;  %s7645_s15 = smov 15  }
  0x12   :  { %s7748_s24 = sld [smem:[%s9208_s0 + %s7641_s20]]  }
  0x13   :  { %9277 = sst [smem:[#allocation14_spill]] %s7723_s29 }
  0x14   :  { %9278 = sst [smem:[#allocation15_spill]] %s7728_s3 }
  0x15   :  { %9279 = sst [smem:[#allocation16_spill]] %s7733_s8 }
  0x16   :  { %9280 = sst [smem:[#allocation17_spill]] %s7738_s14 }
  0x17   :  { %s7753_s30 = sld [smem:[%s9208_s0 + %s7642_s26]]  }
  0x18   :  { %s7758_s6 = sld [smem:[%s9208_s0 + %s7643_s1]]  }
  0x19   :  { %s7763_s12 = sld [smem:[%s9208_s0 + %s7644_s7]]   ;;  %s7648_s7 = smov 18  }
  0x1a   :  { %s7768_s20 = sld [smem:[%s9208_s0 + %s7645_s15]]   ;;  %s7649_s15 = smov 19  }
  0x1b   :  { %s7773_s27 = sld [smem:[%s9208_s0 + %s7646_s22]]   ;;  %s7650_s22 = smov 20  }
  0x1c   :  { %s7778_s4 = sld [smem:[%s9208_s0 + %s7647_s28]]   ;;  %s7651_s28 = smov 21  }
  0x1e   :  { %9281 = sst [smem:[#allocation18_spill]] %s7758_s6 }
  0x1f   :  { %9282 = sst [smem:[#allocation19_spill]] %s7763_s12 }
  0x20   :  { %9283 = sst [smem:[#allocation20_spill]] %s7768_s20 }
  0x21   :  { %9284 = sst [smem:[#allocation21_spill]] %s7773_s27 }
  0x22   :  { %9285 = sst [smem:[#allocation22_spill]] %s7778_s4 }
  0x23   :  { %s7783_s6 = sld [smem:[%s9208_s0 + %s7648_s7]]   ;;  %s7652_s7 = smov 22  }
  0x24   :  { %s7788_s20 = sld [smem:[%s9208_s0 + %s7649_s15]]   ;;  %s7653_s15 = smov 23  }
  0x25   :  { %s7793_s27 = sld [smem:[%s9208_s0 + %s7650_s22]]   ;;  %s7654_s22 = smov 24  }
  0x26   :  { %s7798_s4 = sld [smem:[%s9208_s0 + %s7651_s28]]   ;;  %s7655_s28 = smov 25  }
  0x29   :  { %9286 = sst [smem:[#allocation23_spill]] %s7783_s6 }
  0x2a   :  { %9287 = sst [smem:[#allocation24_spill]] %s7788_s20 }
  0x2b   :  { %9288 = sst [smem:[#allocation25_spill]] %s7793_s27 }
  0x2c   :  { %9289 = sst [smem:[#allocation26_spill]] %s7798_s4 }
  0x2d   :  { %s7803_s6 = sld [smem:[%s9208_s0 + %s7652_s7]]   ;;  %s7656_s7 = smov 26  }
  0x2e   :  { %s7808_s20 = sld [smem:[%s9208_s0 + %s7653_s15]]   ;;  %s7657_s15 = smov 27  }
  0x2f   :  { %s7813_s27 = sld [smem:[%s9208_s0 + %s7654_s22]]   ;;  %s7658_s22 = smov 28  }
  0x30   :  { %s7818_s4 = sld [smem:[%s9208_s0 + %s7655_s28]]   ;;  %s7659_s28 = smov 29  }
  0x33   :  { %9290 = sst [smem:[#allocation27_spill]] %s7803_s6 }
  0x34   :  { %9291 = sst [smem:[#allocation28_spill]] %s7808_s20 }
  0x35   :  { %9292 = sst [smem:[#allocation29_spill]] %s7813_s27 }
  0x36   :  { %9293 = sst [smem:[#allocation30_spill]] %s7818_s4 }
  0x37   :  { %s7823_s6 = sld [smem:[%s9208_s0 + %s7656_s7]]   ;;  %s7660_s7 = smov 30  }
  0x38   :  { %s7828_s20 = sld [smem:[%s9208_s0 + %s7657_s15]]   ;;  %s7661_s15 = smov 31  }
  0x39   :  { %s7833_s27 = sld [smem:[%s9208_s0 + %s7658_s22]]   ;;  %s7662_s22 = smov 32  }
  0x3a   :  { %s7838_s4 = sld [smem:[%s9208_s0 + %s7659_s28]]   ;;  %s7663_s28 = smov 33  }
  0x3d   :  { %9294 = sst [smem:[#allocation31_spill]] %s7823_s6 }
  0x3e   :  { %9295 = sst [smem:[#allocation32_spill]] %s7828_s20 }
  0x3f   :  { %9296 = sst [smem:[#allocation33_spill]] %s7833_s27 }
  0x40   :  { %9297 = sst [smem:[#allocation34_spill]] %s7838_s4 }
  0x41   :  { %s7843_s6 = sld [smem:[%s9208_s0 + %s7660_s7]]   ;;  %s7664_s7 = smov 34  }
  0x42   :  { %s7848_s20 = sld [smem:[%s9208_s0 + %s7661_s15]]   ;;  %s7665_s15 = smov 35  }
  0x43   :  { %s7853_s27 = sld [smem:[%s9208_s0 + %s7662_s22]]   ;;  %s7666_s22 = smov 36  }
  0x44   :  { %s7858_s4 = sld [smem:[%s9208_s0 + %s7663_s28]]   ;;  %s7667_s28 = smov 37  }
  0x47   :  { %9298 = sst [smem:[#allocation35_spill]] %s7843_s6 }
  0x48   :  { %9299 = sst [smem:[#allocation36_spill]] %s7848_s20 }
  0x49   :  { %9300 = sst [smem:[#allocation37_spill]] %s7853_s27 }
  0x4a   :  { %9301 = sst [smem:[#allocation38_spill]] %s7858_s4 }
  0x4b   :  { %s7863_s6 = sld [smem:[%s9208_s0 + %s7664_s7]]   ;;  %s7668_s7 = smov 38  }
  0x4c   :  { %s7868_s20 = sld [smem:[%s9208_s0 + %s7665_s15]]   ;;  %s7669_s15 = smov 39  }
  0x4d   :  { %s7873_s27 = sld [smem:[%s9208_s0 + %s7666_s22]]   ;;  %s7670_s22 = smov 40  }
  0x4e   :  { %s7878_s4 = sld [smem:[%s9208_s0 + %s7667_s28]]   ;;  %s7671_s28 = smov 41  }
  0x51   :  { %9302 = sst [smem:[#allocation39_spill]] %s7863_s6 }
  0x52   :  { %9303 = sst [smem:[#allocation40_spill]] %s7868_s20 }
  0x53   :  { %9304 = sst [smem:[#allocation41_spill]] %s7873_s27 }
  0x54   :  { %9305 = sst [smem:[#allocation42_spill]] %s7878_s4 }
  0x55   :  { %s7883_s6 = sld [smem:[%s9208_s0 + %s7668_s7]]   ;;  %s7672_s7 = smov 42  }
  0x56   :  { %s7888_s20 = sld [smem:[%s9208_s0 + %s7669_s15]]   ;;  %s7673_s15 = smov 43  }
  0x57   :  { %s7893_s27 = sld [smem:[%s9208_s0 + %s7670_s22]]   ;;  %s7674_s22 = smov 44  }
  0x58   :  { %s7898_s4 = sld [smem:[%s9208_s0 + %s7671_s28]]   ;;  %s7675_s28 = smov 45  }
  0x5b   :  { %9306 = sst [smem:[#allocation43_spill]] %s7883_s6 }
  0x5c   :  { %9307 = sst [smem:[#allocation44_spill]] %s7888_s20 }
  0x5d   :  { %9308 = sst [smem:[#allocation45_spill]] %s7893_s27 }
  0x5e   :  { %9309 = sst [smem:[#allocation46_spill]] %s7898_s4 }
  0x5f   :  { %s7903_s6 = sld [smem:[%s9208_s0 + %s7672_s7]]   ;;  %s7676_s7 = smov 46  }
  0x60   :  { %s7908_s20 = sld [smem:[%s9208_s0 + %s7673_s15]]   ;;  %s7677_s15 = smov 47  }
  0x61   :  { %s7913_s27 = sld [smem:[%s9208_s0 + %s7674_s22]]  }
  0x62   :  { %s7918_s4 = sld [smem:[%s9208_s0 + %s7675_s28]]  }
  0x65   :  { %9310 = sst [smem:[#allocation47_spill]] %s7903_s6 }
  0x66   :  { %9311 = sst [smem:[#allocation48_spill]] %s7908_s20 }
  0x67   :  { %9312 = sst [smem:[#allocation49_spill]] %s7913_s27 }
  0x68   :  { %9313 = sst [smem:[#allocation50_spill]] %s7918_s4 }
  0x69   :  { %s7923_s6 = sld [smem:[%s9208_s0 + %s7676_s7]]  }
  0x6a   :  { %s7928_s20 = sld [smem:[%s9208_s0 + %s7677_s15]]  }
  0x6f   :  { %9314 = sst [smem:[#allocation51_spill]] %s7923_s6 }
  0x70   :  { %9315 = sst [smem:[#allocation52_spill]] %s7928_s20 }
  0x71   :  { %101 = vsyncpa [#allocation3], 0 }
  0x72   :  { %103 = vsyncpa [#allocation3 + $0x1], 0 }
  0x73   :  { %104 = vsyncpa [#allocation5], 0 }
  0x74   :  { %106 = vsyncpa [#allocation5 + $0x1], 0  ;;  %s7930_s22 = smov 0   ;;  %s7932_s23 = smov 0  }
  0x75   :  { %s7934_s26 = smov 0   ;;  %s7936_s28 = smov 0  }
  0x76 LB: > { %s9316_s12 = sld [smem:[#allocation19_spill]]  ;;  %s7951_s0 = sadd.s32 4294967295, %s7629_s28   ;;  %s7625_s26 = sphi %s7934_s26, %s9393_s26   ;;  %s7621_s23 = sphi %s7932_s23, %s9395_s23   ;;  %s7617_s22 = sphi %s7930_s22, %s9394_s22   ;;  %s7629_s28 = sphi %s7936_s28, %s9391_s28  }
  0x77   : > { %s9317_s21 = sld [smem:[#allocation12_spill]]  ;;  %s6324_s1 = sadd.s32 4294967294, %s7629_s28  }
  0x78   : > { %s9318_s8 = sld [smem:[#allocation16_spill]]  ;;  %s7955_s2 = sadd.s32 1, %s7629_s28  }
  0x79   : > { %9319 = sst [smem:[#allocation53_spill]] %s7617_s22  ;;  %s1053_s7 = sadd.s32 1, %s7625_s26 }
  0x7a   : > { %9320 = sst [smem:[#allocation54_spill]] %s7625_s26  ;;  %s1050_s10 = ssub.s32 %s7629_s28, %s7955_s2 }
  0x7b   : > { %9321 = sst [smem:[#allocation55_spill]] %s7951_s0  ;;  %p1063_p0 = scmp.ne.s32.totalorder %s7625_s26, %s7621_s23 }
  0x7c   : > { %9322 = sst [smem:[#allocation56_spill]] %s7955_s2  ;;  %p1051_p1 = scmp.eq.s32.totalorder %s1050_s10, 0 }
  0x7d   : > { %p1064_p2 = scmp.eq.s32.totalorder %s7951_s0, 1  ;;  %p1069_p3 = scmp.ne.s32.totalorder %s7621_s23, %s7617_s22 }
  0x7e   : > { %p1070_p4 = scmp.eq.s32.totalorder %s6324_s1, 1  ;;  %p6327_p7 = scmp.ge.s32.totalorder %s7629_s28, 1 }
  0x7f   : > { %s7966_s11 = scalar_select %p1051_p1, %s7625_s26, %s1053_s7  }
  0x80   : > { %p7968_p5 = por %p1064_p2, %p1063_p0  ;;  %p7972_p6 = por %p1070_p4, %p1069_p3 }
  0x81   : > { %9323 = sst [smem:[#allocation57_spill]] %s7966_s11  ;;  %p1307_p8 = scmp.lt.s32.totalorder %s7629_s28, 3 }
  0x82   : > { %s9324_s15 = scalar_select %p7968_p5, 1, 0 }
  0x83   : > { %s9326_s16 = scalar_select %p7972_p6, 1, 0 }
  0x84   : > { %9325 = sst [smem:[#allocation58_spill]] %s9324_s15  ;;  %p1308_p9 = pnand %p6327_p7, %p1307_p8 }
  0x85   : > { %9327 = sst [smem:[#allocation59_spill]] %s9326_s16 }
  0x86   : > { %1311 = sbr.rel (%p1308_p9) target bundleno = 4699 (0x125b), region = 196 }
  0x8b   : > { %s9328_s13 = sld [smem:[#allocation10_spill]]  ;;  %vm1484_vm0 = vcmask 1044480   ;;  %p1437_p10 = scmp.lt.s32.totalorder %s7951_s0, 1  ;;  %v7678_v1 = vmov 0.0   ;;  %vm7679_vm1 = vmmov 0   ;;  %v1566_v2 = vld [vmem:[%s9317_s21 + $0x38] sm:$0xff] }
  0x8c   : > { %s9329_s5 = sld [smem:[#allocation8_spill]]  ;;  %6822 = vmatprep.subr.mxu0 %v7678_v1  ;;  %6824 = vmatprep.mubr.msk.f32.mxu0 %vm7679_vm1, %v7678_v1  ;;  %v1565_v3 = vld [vmem:[%s9317_s21 + $0x30] sm:$0xff]  ;;  %vm1480_vm2 = vcmask 39936   ;;  %v1564_v4 = vld [vmem:[%s9317_s21 + $0x28] sm:$0xff]  ;;  %v1563_v6 = vld [vmem:[%s9317_s21 + $0x20] sm:$0xff]  ;;  %vm1706_vm3 = vcmask 1043456  }
  0x8d   : > { %s7985_s18 = scalar_select %p1437_p10, %s7951_s0, 1  ;;  %6827 = vmatprep.subr.mxu1 %v7678_v1  ;;  %6843 = vmatprep.mubr.msk.f32.mxu1 %vm7679_vm1, %v7678_v1  ;;  %v1562_v7 = vld [vmem:[%s9317_s21 + $0x18] sm:$0xff]  ;;  %v1561_v8 = vld [vmem:[%s9317_s21 + $0x10] sm:$0xff]  ;;  %v1560_v9 = vld [vmem:[%s9317_s21 + $0x8] sm:$0xff]  ;;  %vm1657_vm4 = vcmask 31744   ;;  %vm1574_vm5 = vcmask 523264  }
  0x8e   : > { %6828 = vmatpush3.msra.mxu1 %v1566_v2  ;;  %s9331_s9 = sld [smem:[#allocation9_spill]]  ;;  %v1559_v10 = vld [vmem:[%s9317_s21] sm:$0xff]  ;;  %v1878_v33 = vld [vmem:[%s9318_s8 + $0x38] sm:$0xff]  ;;  %v1877_v34 = vld [vmem:[%s9318_s8 + $0x30] sm:$0xff]  ;;  %vm2113_vm6 = vcmask 261120   ;;  %vm3026_vm7 = vcmask 1041409  }
  0x8f   : > { %9330 = sst [smem:[#allocation60_spill]] %s7985_s18  ;;  %s9237_s1 = sshll.u32 %s7985_s18, 3  ;;  %6829 = vmatprep.subr.mxu1 %v7678_v1  ;;  %v1876_v37 = vld [vmem:[%s9318_s8 + $0x28] sm:$0xff]  ;;  %v1875_v40 = vld [vmem:[%s9318_s8 + $0x20] sm:$0xff]  ;;  %v1874_v43 = vld [vmem:[%s9318_s8 + $0x18] sm:$0xff]  ;;  %vm3028_vm8 = vcmask 1042434  }
  0x90   : > { %6830 = vmatpush3.msra.mxu1 %v1565_v3  ;;  %s9332_s29 = sld [smem:[#allocation14_spill]]  ;;  %s6578_s10 = sshll.u32 %s7985_s18, 7  ;;  %v1873_v45 = vld [vmem:[%s9318_s8 + $0x10] sm:$0xff]  ;;  %v1872_v48 = vld [vmem:[%s9318_s8 + $0x8] sm:$0xff]  ;;  %v1871_v51 = vld [vmem:[%s9318_s8] sm:$0xff]  ;;  %vm3030_vm9 = vcmask 1043459  }
  0x91   : > { %v1472_v0 = vld [vmem:[%s9328_s13] sm:$0x1f]  ;;  %6831 = vmatprep.subr.mxu1 %v7678_v1  ;;  %s9333_s17 = sld [smem:[#allocation11_spill]]  ;;  %vm3032_vm10 = vcmask 1044484   ;;  %vm3034_vm11 = vcmask 1045509   ;;  %vm3036_vm12 = vcmask 1046534  }
  0x92   : > { %6823 = vmatpush3.msk.msra.mxu0 %vm1484_vm0, %v1472_v0  ;;  %s1440_s7 = scalar_lea.vmem %s9329_s5, %s9237_s1  ;;  %6832 = vmatpush3.msra.mxu1 %v1564_v4  ;;  %s9334_s3 = sld [smem:[#allocation15_spill]]  ;;  %vm3038_vm13 = vcmask 1047559  }
  0x93   : > { %v1455_v5 = vld [vmem:[%s1440_s7] sm:$0xff]  ;;  %6833 = vmatprep.subr.mxu1 %v7678_v1  ;;  %s9335_s25 = sld [smem:[#allocation13_spill]] }
  0x94   : > { %6825 = vmatmul.mubr.msk.f32.vlgmr.msra.gmra.mxu0 %vm1480_vm2, %v1455_v5  ;;  %6834 = vmatpush3.msra.mxu1 %v1563_v6  ;;  %s8008_s7 = scalar_lea.vmem %s9331_s9, %s6578_s10  ;;  %s9336_s14 = sld [smem:[#allocation17_spill]] }
  0x95   : > { %6835 = vmatprep.subr.mxu1 %v7678_v1  ;;  %v1456_v12 = vld [vmem:[%s8008_s7] sm:$0xff]  ;;  %v1457_v13 = vld [vmem:[%s8008_s7 + $0x8] sm:$0xff]  ;;  %v1458_v14 = vld [vmem:[%s8008_s7 + $0x10] sm:$0xff]  ;;  %s9337_s10 = sld [smem:[#allocation21_spill]] }
  0x96   : > { %6836 = vmatpush3.msra.mxu1 %v1562_v7  ;;  %v1649_v11 = vld [vmem:[%s9332_s29] sm:$0xf]  ;;  %6848 = vmatprep.mubr.msk.f32.mxu0 %vm1657_vm4, %v1456_v12  ;;  %v1459_v15 = vld [vmem:[%s8008_s7 + $0x18] sm:$0xff]  ;;  %v1461_v17 = vld [vmem:[%s8008_s7 + $0x28] sm:$0xff]  ;;  %s9339_s1 = sld [smem:[#allocation25_spill]] }
  0x97   : > { %6837 = vmatprep.subr.mxu1 %v7678_v1  ;;  %6846 = vmatprep.subr.msk.mxu0 %vm1706_vm3, %v1649_v11  ;;  %v1460_v16 = vld [vmem:[%s8008_s7 + $0x20] sm:$0xff]  ;;  %v1462_v18 = vld [vmem:[%s8008_s7 + $0x30] sm:$0xff]  ;;  %v1463_v19 = vld [vmem:[%s8008_s7 + $0x38] sm:$0xff]  ;;  %s9341_s5 = sld [smem:[#allocation18_spill]] }
  0x98   : > { %6838 = vmatpush3.msra.mxu1 %v1561_v8  ;;  %6847 = vmatpush3.msk.msra.mxu0 %vm1706_vm3, %v1649_v11  ;;  %v1464_v20 = vld [vmem:[%s8008_s7 + $0x40] sm:$0xff]  ;;  %v1465_v21 = vld [vmem:[%s8008_s7 + $0x48] sm:$0xff]  ;;  %v1466_v22 = vld [vmem:[%s8008_s7 + $0x50] sm:$0xff]  ;;  %s9342_s8 = sld [smem:[#allocation20_spill]] }
  0x99   : > { %6839 = vmatprep.subr.mxu1 %v7678_v1  ;;  %6849 = vmatmul.mubr.msk.f32.vlgmr.msra.gmra.mxu0 %vm1657_vm4, %v1457_v13  ;;  %v1467_v23 = vld [vmem:[%s8008_s7 + $0x58] sm:$0xff]  ;;  %v1468_v24 = vld [vmem:[%s8008_s7 + $0x60] sm:$0xff]  ;;  %v1469_v25 = vld [vmem:[%s8008_s7 + $0x68] sm:$0xff]  ;;  %s9343_s9 = sld [smem:[#allocation24_spill]] }
  0x9a   : > { %6840 = vmatpush3.msra.mxu1 %v1560_v9  ;;  %6912 = vmatprep.subr.mxu0 %v7678_v1  ;;  %v1470_v26 = vld [vmem:[%s8008_s7 + $0x70] sm:$0xff]  ;;  %v1471_v27 = vld [vmem:[%s8008_s7 + $0x78] sm:$0xff]  ;;  %v6336_v28 = vld [vmem:[%s9333_s17] ss:$0 sm:$0xff]  ;;  %s9338_s7 = sld [smem:[#allocation23_spill]] }
  0x9b   : > { %6841 = vmatprep.subr.mxu1 %v7678_v1  ;;  %6851 = vmatprep.mubr.msk.f32.mxu0 %vm1657_vm4, %v1458_v14  ;;  %v8053_v36 = vld [vmem:[%s9334_s3] ss:$0 sm:$0xff]  ;;  %s9340_s3 = sld [smem:[#allocation27_spill]] }
  0x9c   : > { %6842 = vmatpush3.msra.mxu1 %v1559_v10  ;;  %s9344_s13 = sld [smem:[#allocation22_spill]] }
  0x9d   : > { %6852 = vmatmul.mubr.msk.f32.gmra.mxu0 %vm1657_vm4, %v1459_v15  ;;  %6872 = vmatprep.subr.mxu1 %v1878_v33  ;;  %s9346_s17 = sld [smem:[#allocation28_spill]] }
  0x9e   : > { %6854 = vmatprep.mubr.msk.f32.mxu0 %vm1657_vm4, %v1460_v16  ;;  %s9347_s21 = sld [smem:[#allocation37_spill]] }
  0x9f   : > { %s9349_s29 = sld [smem:[#allocation29_spill]] }
  0xa0   : > { %s9350_s11 = sld [smem:[#allocation30_spill]] }
  0xa1   : > { %6855 = vmatmul.mubr.msk.f32.gmra.mxu0 %vm1657_vm4, %v1461_v17  ;;  %s9351_s26 = sld [smem:[#allocation32_spill]] }
  0xa2   : > { %6857 = vmatprep.mubr.msk.f32.mxu0 %vm1657_vm4, %v1462_v18  ;;  %s9353_s16 = sld [smem:[#allocation41_spill]] }
  0xa3   : > { %s9354_s22 = sld [smem:[#allocation39_spill]] }
  0xa5   : > { %6858 = vmatmul.mubr.msk.f32.gmra.mxu0 %vm1657_vm4, %v1463_v19 }
  0xa6   : > { %6860 = vmatprep.mubr.msk.f32.mxu0 %vm1657_vm4, %v1464_v20 }
  0xa7   : > { %s9352_s2 = smov %s9351_s26 }
  0xa9   : > { %6861 = vmatmul.mubr.msk.f32.gmra.mxu0 %vm1657_vm4, %v1465_v21  ;;  %s9355_s20 = smov %s9354_s22 }
  0xaa   : > { %6863 = vmatprep.mubr.msk.f32.mxu0 %vm1657_vm4, %v1466_v22 }
  0xad   : > { %6864 = vmatmul.mubr.msk.f32.gmra.mxu0 %vm1657_vm4, %v1467_v23 }
  0xae   : > { %6866 = vmatprep.mubr.msk.f32.mxu0 %vm1657_vm4, %v1468_v24 }
  0xb1   : > { %6867 = vmatmul.mubr.msk.f32.gmra.mxu0 %vm1657_vm4, %v1469_v25 }
  0xb2   : > { %6869 = vmatprep.mubr.msk.f32.mxu0 %vm1657_vm4, %v1470_v26 }
  0xb5   : > { %6870 = vmatmul.mubr.msk.f32.gmra.mxu0 %vm1657_vm4, %v1471_v27  ;;  %v6339_v27 = vld [vmem:[%s9335_s25] ss:$0 sm:$0xff]  ;;  %s9348_s25 = sld [smem:[#allocation31_spill]] }
  0xb6   : > { %6920 = vmatprep.mubr.msk.f32.mxu0 %vm7679_vm1, %v7678_v1 }
 0x154   : > { %v1554_v29 = vpop.f32.mrf.mxu0 }
 0x155   : > { %v1555_v30 = vadd.f32 %v6336_v28, %v1554_v29 }
 0x156   : > { %v6826_v31 = vpop.f32.mrf.mxu0 }
 0x157   : > { %v1558_v32 = vmax.f32 %v1555_v30, 0.0 }
 0x159   : > { %6844 = vmatmul.mubr.msk.f32.vlgmr.msra.gmra.mxu1 %vm1574_vm5, %v1558_v32  ;;  %v6850_v35 = vpop.f32.mrf.mxu0 }
 0x15a   : > { %6873 = vmatpush3.msra.mxu1 %v1878_v33  ;;  %v1782_v47 = vadd.f32 %v6850_v35, %v8053_v36  ;;  %v2145_v33 = vld [vmem:[%s7753_s30 + $0x18] sm:$0xff] }
 0x15b   : > { %v1776_v38 = vpop.f32.mrf.mxu0  ;;  %6874 = vmatprep.subr.mxu1 %v1877_v34  ;;  %6913 = vmatpush3.msra.mxu0 %v2145_v33 }
 0x15c   : > { %v1777_v39 = vadd.f32 %v8053_v36, %v1776_v38  ;;  %6875 = vmatpush3.msra.mxu1 %v1877_v34  ;;  %v1856_v53 = vmax.f32 %v1782_v47, 0.0  ;;  %6914 = vmatprep.subr.mxu0 %v7678_v1 }
 0x15d   : > { %v6853_v41 = vpop.f32.mrf.mxu0  ;;  %6876 = vmatprep.subr.mxu1 %v1876_v37 }
 0x15e   : > { %v1855_v42 = vmax.f32 %v1777_v39, 0.0  ;;  %6877 = vmatpush3.msra.mxu1 %v1876_v37  ;;  %v1792_v54 = vadd.f32 %v6853_v41, %v8053_v36  ;;  %v2144_v39 = vld [vmem:[%s7753_s30 + $0x10] sm:$0xff]  ;;  %v2142_v41 = vld [vmem:[%s7753_s30] sm:$0xff] }
 0x15f   : > { %v1786_v44 = vpop.f32.mrf.mxu0  ;;  %6878 = vmatprep.subr.mxu1 %v1875_v40  ;;  %6915 = vmatpush3.msra.mxu0 %v2144_v39 }
 0x160   : > { %6888 = vmatprep.mubr.msk.f32.mxu1 %vm1574_vm5, %v1855_v42  ;;  %6879 = vmatpush3.msra.mxu1 %v1875_v40  ;;  %v1787_v49 = vadd.f32 %v8053_v36, %v1786_v44  ;;  %v1858_v59 = vmax.f32 %v1792_v54, 0.0  ;;  %v2143_v40 = vld [vmem:[%s7753_s30 + $0x8] sm:$0xff] }
 0x161   : > { %v6856_v46 = vpop.f32.mrf.mxu0  ;;  %6880 = vmatprep.subr.mxu1 %v1874_v43  ;;  %6916 = vmatprep.subr.mxu0 %v7678_v1 }
 0x162   : > { %6881 = vmatpush3.msra.mxu1 %v1874_v43  ;;  %v1857_v55 = vmax.f32 %v1787_v49, 0.0  ;;  %v1802_v60 = vadd.f32 %v6856_v46, %v8053_v36  ;;  %6917 = vmatpush3.msra.mxu0 %v2143_v40 }
 0x163   : > { %v1796_v50 = vpop.f32.mrf.mxu0  ;;  %6882 = vmatprep.subr.mxu1 %v1873_v45  ;;  %6918 = vmatprep.subr.mxu0 %v7678_v1 }
 0x164   : > { %6883 = vmatpush3.msra.mxu1 %v1873_v45  ;;  %v1797_v56 = vadd.f32 %v8053_v36, %v1796_v50  ;;  %v1860_v2 = vmax.f32 %v1802_v60, 0.0  ;;  %6919 = vmatpush3.msra.mxu0 %v2142_v41 }
 0x165   : > { %v6859_v52 = vpop.f32.mrf.mxu0  ;;  %6884 = vmatprep.subr.mxu1 %v1872_v48  ;;  %6923 = vmatprep.subr.mxu0 %v7678_v1 }
 0x166   : > { %6885 = vmatpush3.msra.mxu1 %v1872_v48  ;;  %v1859_v61 = vmax.f32 %v1797_v56, 0.0  ;;  %v1812_v3 = vadd.f32 %v6859_v52, %v8053_v36  ;;  %v6376_v56 = vld [vmem:[%s7743_s19] ss:$0 sm:$0xff] }
 0x167   : > { %v1806_v57 = vpop.f32.mrf.mxu0  ;;  %6886 = vmatprep.subr.mxu1 %v1871_v51 }
 0x168   : > { %6887 = vmatpush3.msra.mxu1 %v1871_v51  ;;  %v1807_v62 = vadd.f32 %v8053_v36, %v1806_v57  ;;  %v1862_v8 = vmax.f32 %v1812_v3, 0.0  ;;  %v2228_v3 = vld [vmem:[%s9316_s12 + $0x8] sm:$0xff] }
 0x169   : > { %v6862_v58 = vpop.f32.mrf.mxu0  ;;  %6889 = vmatmul.mubr.msk.f32.vlgmr.msra.gmra.mxu1 %vm1574_vm5, %v1856_v53 }
 0x16a   : > { %6891 = vmatprep.mubr.msk.f32.mxu1 %vm1574_vm5, %v1857_v55  ;;  %v1861_v4 = vmax.f32 %v1807_v62, 0.0  ;;  %v1822_v9 = vadd.f32 %v6862_v58, %v8053_v36  ;;  %v6377_v58 = vld [vmem:[%s7748_s24] ss:$0 sm:$0xff]  ;;  %v2230_v62 = vld [vmem:[%s9316_s12 + $0x18] sm:$0xff] }
 0x16b   : > { %v1816_v63 = vpop.f32.mrf.mxu0 }
 0x16c   : > { %v1817_v5 = vadd.f32 %v8053_v36, %v1816_v63  ;;  %v1864_v14 = vmax.f32 %v1822_v9, 0.0  ;;  %v8116_v63 = vld [vmem:[%s9336_s14] ss:$0 sm:$0xff]  ;;  %s9345_s14 = sld [smem:[#allocation26_spill]] }
 0x16d   : > { %v6865_v0 = vpop.f32.mrf.mxu0  ;;  %6892 = vmatmul.mubr.msk.f32.gmra.mxu1 %vm1574_vm5, %v1858_v59 }
 0x16e   : > { %6894 = vmatprep.mubr.msk.f32.mxu1 %vm1574_vm5, %v1859_v61  ;;  %v1863_v10 = vmax.f32 %v1817_v5, 0.0  ;;  %v1832_v15 = vadd.f32 %v6865_v0, %v8053_v36 }
 0x16f   : > { %v1826_v6 = vpop.f32.mrf.mxu0 }
 0x170   : > { %v1827_v11 = vadd.f32 %v8053_v36, %v1826_v6  ;;  %v1866_v19 = vmax.f32 %v1832_v15, 0.0  ;;  %v2309_v15 = vld [vmem:[%s9337_s10 + $0x8] sm:$0xff] }
 0x171   : > { %v6868_v7 = vpop.f32.mrf.mxu0  ;;  %6895 = vmatmul.mubr.msk.f32.gmra.mxu1 %vm1574_vm5, %v1860_v2  ;;  %v2229_v2 = vld [vmem:[%s9316_s12 + $0x10] sm:$0xff] }
 0x172   : > { %6897 = vmatprep.mubr.msk.f32.mxu1 %vm1574_vm5, %v1861_v4  ;;  %v1865_v16 = vmax.f32 %v1827_v11, 0.0  ;;  %v1842_v20 = vadd.f32 %v6868_v7, %v8053_v36  ;;  %v2227_v7 = vld [vmem:[%s9316_s12] sm:$0xff] }
 0x173   : > { %v1836_v12 = vpop.f32.mrf.mxu0 }
 0x174   : > { %v1837_v17 = vadd.f32 %v8053_v36, %v1836_v12  ;;  %v1868_v23 = vmax.f32 %v1842_v20, 0.0  ;;  %v2310_v12 = vld [vmem:[%s9337_s10 + $0x10] sm:$0xff]  ;;  %v2308_v20 = vld [vmem:[%s9337_s10] sm:$0xff] }
 0x175   : > { %v6871_v13 = vpop.f32.mrf.mxu0  ;;  %6898 = vmatmul.mubr.msk.f32.gmra.mxu1 %vm1574_vm5, %v1862_v8  ;;  %v2311_v8 = vld [vmem:[%s9337_s10 + $0x18] sm:$0xff] }
 0x176   : > { %6900 = vmatprep.mubr.msk.f32.mxu1 %vm1574_vm5, %v1863_v10  ;;  %v1867_v21 = vmax.f32 %v1837_v17, 0.0  ;;  %v1852_v24 = vadd.f32 %v6871_v13, %v8053_v36 }
 0x177   : > { %v1846_v18 = vpop.f32.mrf.mxu0 }
 0x178   : > { %v1847_v22 = vadd.f32 %v8053_v36, %v1846_v18  ;;  %v1870_v26 = vmax.f32 %v1852_v24, 0.0 }
 0x179   : > { %6901 = vmatmul.mubr.msk.f32.gmra.mxu1 %vm1574_vm5, %v1864_v14 }
 0x17a   : > { %6903 = vmatprep.mubr.msk.f32.mxu1 %vm1574_vm5, %v1865_v16  ;;  %v1869_v25 = vmax.f32 %v1847_v22, 0.0  ;;  %v2392_v22 = vld [vmem:[%s9338_s7 + $0x18] sm:$0xff] }
 0x17d   : > { %6904 = vmatmul.mubr.msk.f32.gmra.mxu1 %vm1574_vm5, %v1866_v19 }
 0x17e   : > { %6906 = vmatprep.mubr.msk.f32.mxu1 %vm1574_vm5, %v1867_v21 }
 0x181   : > { %6907 = vmatmul.mubr.msk.f32.gmra.mxu1 %vm1574_vm5, %v1868_v23 }
 0x182   : > { %6909 = vmatprep.mubr.msk.f32.mxu1 %vm1574_vm5, %v1869_v25 }
 0x185   : > { %6910 = vmatmul.mubr.msk.f32.gmra.mxu1 %vm1574_vm5, %v1870_v26 }
 0x219   : > { %v1644_v28 = vpop.f32.mrf.mxu1 }
 0x21a   : > { %v1645_v29 = vadd.f32 %v6339_v27, %v1644_v28 }
 0x21b   : > { %v6845_v30 = vpop.f32.mrf.mxu1 }
 0x21c   : > { %v1648_v31 = vmax.f32 %v1645_v29, 0.0 }
 0x21e   : > { %v2114_v32 = vsel %vm2113_vm6, %v1648_v31, 0.0 }
 0x21f   : > { %2115 = vadd.xlane.f32.xlu0 %v2114_v32 }
 0x229   : > { %v6890_v42 = vpop.f32.mrf.mxu1 }
 0x22a   : > { %v2006_v13 = vadd.f32 %v6890_v42, %v8116_v63 }
 0x22b   : > { %v2000_v43 = vpop.f32.mrf.mxu1 }
 0x22c   : > { %v2001_v4 = vadd.f32 %v8116_v63, %v2000_v43  ;;  %v2080_v21 = vmax.f32 %v2006_v13, 0.0  ;;  %v2534_v13 = vlaneseq }
 0x22d   : > { %v6893_v44 = vpop.f32.mrf.mxu1 }
 0x22e   : > { %v2079_v9 = vmax.f32 %v2001_v4, 0.0  ;;  %v2016_v23 = vadd.f32 %v6893_v44, %v8116_v63  ;;  %v2389_v44 = vld [vmem:[%s9338_s7] sm:$0xff]  ;;  %v2653_v4 = vld [vmem:[%s9339_s1 + $0x10] sm:$0xff] }
 0x22f   : > { %v2010_v45 = vpop.f32.mrf.mxu1 }
 0x230   : > { %v2011_v16 = vadd.f32 %v8116_v63, %v2010_v45 }
 0x231   : > { %v8104_v46 = vpop.f32.mrf.mxu1 }
 0x232   : > { %v2081_v27 = vmax.f32 %v2011_v16, 0.0  ;;  %v2026_v33 = vadd.f32 %v8104_v46, %v8116_v63 }
 0x233   : > { %v2020_v49 = vpop.f32.mrf.mxu1 }
 0x234   : > { %v2021_v24 = vadd.f32 %v8116_v63, %v2020_v49  ;;  %v2084_v45 = vmax.f32 %v2026_v33, 0.0 }
 0x235   : > { %v8106_v51 = vpop.f32.mrf.mxu1 }
 0x236   : > { %v2083_v40 = vmax.f32 %v2021_v24, 0.0  ;;  %v2036_v46 = vadd.f32 %v8106_v51, %v8116_v63 }
 0x237   : > { %v8108_v52 = vpop.f32.mrf.mxu1 }
 0x238   : > { %v2086_v51 = vmax.f32 %v2036_v46, 0.0 }
 0x239   : > { %v6902_v53 = vpop.f32.mrf.mxu1 }
 0x23a   : > { %v2046_v14 = vadd.f32 %v6902_v53, %v8116_v63 }
 0x23b   : > { %v2040_v54 = vpop.f32.mrf.mxu1 }
 0x23c   : > { %v2041_v5 = vadd.f32 %v8116_v63, %v2040_v54  ;;  %v2088_v25 = vmax.f32 %v2046_v14, 0.0  ;;  %v6378_v14 = vld [vmem:[%s9341_s5] ss:$0 sm:$0xff] }
 0x23d   : > { %v6905_v60 = vpop.f32.mrf.mxu1 }
 0x23e   : > { %v2087_v10 = vmax.f32 %v2041_v5, 0.0  ;;  %v2056_v26 = vadd.f32 %v6905_v60, %v8116_v63  ;;  %v2652_v5 = vld [vmem:[%s9339_s1 + $0x8] sm:$0xff] }
 0x23f   : > { %v2050_v0 = vpop.f32.mrf.mxu1 }
 0x240   : > { %v2095_v17 = vadd.f32 %v2087_v10, %v2079_v9  ;;  %v2051_v18 = vadd.f32 %v8116_v63, %v2050_v0  ;;  %v3008_v9 = vld [vmem:[%s9340_s3 + $0x8] sm:$0xff]  ;;  %v3007_v10 = vld [vmem:[%s9340_s3] sm:$0xff] }
 0x241   : > { %v6908_v6 = vpop.f32.mrf.mxu1 }
 0x242   : > { %v8150_v28 = vmul.f32 0.5, %v2095_v17  ;;  %v2089_v29 = vmax.f32 %v2051_v18, 0.0  ;;  %v2066_v39 = vadd.f32 %v6908_v6, %v8116_v63  ;;  %v2651_v6 = vld [vmem:[%s9339_s1] sm:$0xff]  ;;  %v2535_v18 = vshrl.u32 %v2534_v13, 7 }
 0x243   : > { %v2060_v11 = vpop.f32.mrf.mxu1 }
 0x244   : > { %v2061_v30 = vadd.f32 %v8116_v63, %v2060_v11  ;;  %v2097_v41 = vadd.f32 %v2089_v29, %v2081_v27  ;;  %v2092_v49 = vmax.f32 %v2066_v39, 0.0  ;;  %v7680_v11 = vmov 1966171168  }
 0x245   : > { %v6911_v19 = vpop.f32.mrf.mxu1 }
 0x246   : > { %v2091_v42 = vmax.f32 %v2061_v30, 0.0  ;;  %v8171_v53 = vmul.f32 0.5, %v2097_v41 }
 0x247   : > { %v2070_v32 = vpop.f32.mrf.mxu1 }
 0x248   : > { %v2071_v43 = vadd.f32 %v8116_v63, %v2070_v32  ;;  %v2099_v54 = vadd.f32 %v2091_v42, %v2083_v40 }
 0x2a8   : > { %v2116_v34 = vpop.xlane.xlu0 %2115 }
 0x2a9   : > { %v2118_v35 = vmul.f32 0.03125, %v2116_v34  ;;  %v2031_v34 = vadd.f32 %v8116_v63, %v8108_v52 }
 0x2ab   : > { %v2119_v36 = vsub.f32 %v1648_v31, %v2118_v35  ;;  %v2391_v31 = vld [vmem:[%s9338_s7 + $0x10] sm:$0xff]  ;;  %v2390_v35 = vld [vmem:[%s9338_s7 + $0x8] sm:$0xff]  ;;  %v2085_v52 = vmax.f32 %v2031_v34, 0.0  ;;  %v8222_v34 = vsub.s32 0, %v2535_v18 }
 0x2ad   : > { %v2120_v37 = vmul.f32 %v2119_v36, %v2119_v36 }
 0x2af   : > { %v2121_v38 = vsel %vm2113_vm6, %v2120_v37, 0.0  ;;  %v2096_v37 = vadd.f32 %v2088_v25, %v2080_v21 }
 0x2b0   : > { %2122 = vadd.xlane.f32.xlu0 %v2121_v38  ;;  %v2090_v38 = vmax.f32 %v2056_v26, 0.0 }
 0x339   : > { %v2123_v47 = vpop.xlane.xlu0 %2122 }
 0x33a   : > { %v2124_v48 = vmul.f32 0.03125, %v2123_v47  ;;  %v8168_v47 = vmul.f32 0.5, %v2096_v37  ;;  %v6380_v37 = vld [vmem:[%s9342_s8] ss:$0 sm:$0xff] }
 0x33c   : > { %v2125_v50 = vadd.f32 1e-05, %v2124_v48 }
 0x33e   : > { %7363 = vrsqrt.f32 %v2125_v50  ;;  %v2076_v50 = vadd.f32 %v6911_v19, %v8116_v63 }
 0x34b   : > { %v7364_v55 = vpop.eup %7363 }
 0x34c   : > { %v2127_v57 = vmul.f32 %v7364_v55, %v2119_v36  ;;  %v2082_v36 = vmax.f32 %v2016_v23, 0.0  ;;  %v2093_v55 = vmax.f32 %v2071_v43, 0.0 }
 0x34e   : > { %v2134_v59 = vmul.f32 %v6376_v56, %v2127_v57  ;;  %v2098_v48 = vadd.f32 %v2090_v38, %v2082_v36  ;;  %v2100_v57 = vadd.f32 %v2092_v49, %v2084_v45  ;;  %v2101_v60 = vadd.f32 %v2093_v55, %v2085_v52  ;;  %v8227_v38 = vld [vmem:[%s9343_s9] ss:$0 sm:$0xff] }
 0x350   : > { %v8112_v61 = vadd.f32 %v6377_v58, %v2134_v59  ;;  %v8178_v56 = vmul.f32 0.5, %v2098_v48  ;;  %v2094_v58 = vmax.f32 %v2076_v50, 0.0  ;;  %v8180_v59 = vmul.f32 0.5, %v2099_v54 }
 0x351   : > { %v8188_v0 = vmul.f32 0.5, %v2101_v60 }
 0x352   : > { %6921 = vmatmul.mubr.msk.f32.vlgmr.msra.gmra.mxu0 %vm2113_vm6, %v8112_v61  ;;  %v2102_v63 = vadd.f32 %v2094_v58, %v2086_v51 }
 0x353   : > { %6924 = vmatpush3.msra.mxu0 %v2230_v62  ;;  %6931 = vmatprep.mubr.msk.f32.mxu0 %vm7679_vm1, %v7678_v1  ;;  %v8186_v62 = vmul.f32 0.5, %v2100_v57 }
 0x354   : > { %6925 = vmatprep.subr.mxu0 %v7678_v1 }
 0x355   : > { %6926 = vmatpush3.msra.mxu0 %v2229_v2  ;;  %v8194_v2 = vmul.f32 0.5, %v2102_v63 }
 0x356   : > { %6927 = vmatprep.subr.mxu0 %v7678_v1 }
 0x357   : > { %6928 = vmatpush3.msra.mxu0 %v2228_v3  ;;  %v2654_v3 = vld [vmem:[%s9339_s1 + $0x18] sm:$0xff] }
 0x358   : > { %6929 = vmatprep.subr.mxu0 %v7678_v1  ;;  %6965 = vmatprep.subr.mxu1 %v2654_v3 }
 0x359   : > { %6930 = vmatpush3.msra.mxu0 %v2227_v7  ;;  %6966 = vmatpush3.msra.mxu1 %v2654_v3  ;;  %v3010_v7 = vld [vmem:[%s9340_s3 + $0x18] sm:$0xff] }
 0x35a   : > { %6932 = vmatmul.mubr.msk.f32.vlgmr.msra.gmra.mxu0 %vm2113_vm6, %v8112_v61  ;;  %6934 = vmatprep.subr.mxu0 %v7678_v1 }
 0x35b   : > { %6935 = vmatpush3.msra.mxu0 %v2311_v8  ;;  %6942 = vmatprep.mubr.msk.f32.mxu0 %vm7679_vm1, %v7678_v1  ;;  %v3009_v8 = vld [vmem:[%s9340_s3 + $0x10] sm:$0xff] }
 0x35c   : > { %6936 = vmatprep.subr.mxu0 %v7678_v1  ;;  %6967 = vmatprep.subr.mxu1 %v2653_v4 }
 0x35d   : > { %6937 = vmatpush3.msra.mxu0 %v2310_v12  ;;  %6968 = vmatpush3.msra.mxu1 %v2653_v4  ;;  %v2532_v12 = vunpack.c.l.s4 %v7680_v11 }
 0x35e   : > { %6938 = vmatprep.subr.mxu0 %v7678_v1  ;;  %6969 = vmatprep.subr.mxu1 %v2652_v5 }
 0x35f   : > { %6939 = vmatpush3.msra.mxu0 %v2309_v15  ;;  %6970 = vmatpush3.msra.mxu1 %v2652_v5  ;;  %v2533_v17 = vunpack.c.0.s8 %v2532_v12 }
 0x360   : > { %6940 = vmatprep.subr.mxu0 %v7678_v1  ;;  %6971 = vmatprep.subr.mxu1 %v2651_v6 }
 0x361   : > { %6941 = vmatpush3.msra.mxu0 %v2308_v20  ;;  %6972 = vmatpush3.msra.mxu1 %v2651_v6  ;;  %v8214_v21 = vsub.s32 %v2533_v17, %v2535_v18 }
 0x362   : > { %6943 = vmatmul.mubr.msk.f32.vlgmr.msra.gmra.mxu0 %vm2113_vm6, %v8112_v61  ;;  %6945 = vmatprep.subr.mxu0 %v2392_v22 }
 0x363   : > { %6946 = vmatpush3.msra.mxu0 %v2392_v22  ;;  %6953 = vmatprep.mubr.msk.f32.mxu0 %vm2113_vm6, %v8150_v28 }
 0x364   : > { %6947 = vmatprep.subr.mxu0 %v2391_v31  ;;  %6996 = vmatprep.subr.mxu1 %v7678_v1 }
 0x365   : > { %6948 = vmatpush3.msra.mxu0 %v2391_v31 }
 0x366   : > { %6949 = vmatprep.subr.mxu0 %v2390_v35 }
 0x367   : > { %6950 = vmatpush3.msra.mxu0 %v2390_v35 }
 0x368   : > { %6951 = vmatprep.subr.mxu0 %v2389_v44 }
 0x369   : > { %6952 = vmatpush3.msra.mxu0 %v2389_v44 }
 0x36a   : > { %6954 = vmatmul.mubr.msk.f32.vlgmr.msra.gmra.mxu0 %vm2113_vm6, %v8168_v47  ;;  %6985 = vmatprep.subr.mxu0 %v7678_v1 }
 0x36b   : > { %6956 = vmatprep.mubr.msk.f32.mxu0 %vm2113_vm6, %v8171_v53  ;;  %6986 = vmatpush3.msra.mxu0 %v3010_v7 }
 0x36c   : > { %6987 = vmatprep.subr.mxu0 %v7678_v1 }
 0x36d   : > { %6988 = vmatpush3.msra.mxu0 %v3009_v8 }
 0x36e   : > { %6957 = vmatmul.mubr.msk.f32.gmra.mxu0 %vm2113_vm6, %v8178_v56  ;;  %6989 = vmatprep.subr.mxu0 %v7678_v1 }
 0x36f   : > { %6959 = vmatprep.mubr.msk.f32.mxu0 %vm2113_vm6, %v8180_v59  ;;  %6990 = vmatpush3.msra.mxu0 %v3008_v9 }
 0x370   : > { %6991 = vmatprep.subr.mxu0 %v7678_v1 }
 0x371   : > { %6992 = vmatpush3.msra.mxu0 %v3007_v10 }
 0x372   : > { %6960 = vmatmul.mubr.msk.f32.gmra.mxu0 %vm2113_vm6, %v8186_v62  ;;  %7007 = vmatprep.subr.mxu0 %v7678_v1 }
 0x373   : > { %6962 = vmatprep.mubr.msk.f32.mxu0 %vm2113_vm6, %v8188_v0 }
 0x376   : > { %6963 = vmatmul.mubr.msk.f32.gmra.mxu0 %vm2113_vm6, %v8194_v2 }
 0x377   : > { %6993 = vmatprep.mubr.msk.f32.mxu0 %vm7679_vm1, %v7678_v1 }
 0x412   : > { %v2222_v15 = vpop.f32.mrf.mxu0 }
 0x413   : > { %v2223_v16 = vadd.f32 %v6378_v14, %v2222_v15 }
 0x414   : > { %v6922_v19 = vpop.f32.mrf.mxu0 }
 0x415   : > { %v2226_v20 = vmul.f32 0.35355338, %v2223_v16 }
 0x417   : > { %v2537_v23 = vrot.slane %v2226_v20, %v8214_v21  ;;  %v2530_v25 = vcombine.high %v2226_v20, %v2226_v20 }
 0x419   : > { %v2545_v26 = vcombine.high %v2537_v23, %v2537_v23  ;;  %v2544_v27 = vrot.slane %v2530_v25, %v8214_v21  ;;  %v2553_v33 = vrot.slane %v2537_v23, %v8214_v21 }
 0x41a   : > { %v2304_v22 = vpop.f32.mrf.mxu0 }
 0x41b   : > { %v2567_v30 = vrot.slane %v2545_v26, %v8214_v21  ;;  %v2546_v32 = vcombine.high %v2544_v27, %v2544_v27  ;;  %v2560_v35 = vrot.slane %v2544_v27, %v8214_v21  ;;  %v2575_v41 = vcombine.high %v2553_v33, %v2553_v33 }
 0x41c   : > { %v6933_v24 = vpop.f32.mrf.mxu0  ;;  %v2582_v43 = vrot.slane %v2553_v33, %v8222_v34  ;;  %v2305_v44 = vadd.f32 %v6380_v37, %v2304_v22 }
 0x41d   : > { %v2577_v36 = vcombine.high %v2567_v30, %v2567_v30  ;;  %v2586_v39 = vrot.slane %v2567_v30, %v8222_v34  ;;  %v2574_v40 = vrot.slane %v2546_v32, %v8214_v21  ;;  %v2576_v46 = vcombine.high %v2560_v35, %v2560_v35 }
 0x41e   : > { %v2590_v51 = vrot.slane %v2575_v41, %v8222_v34  ;;  %v2598_v57 = vrot.slane %v2560_v35, %v8222_v34  ;;  %v2619_v63 = vmul.f32 %v2582_v43, %v2305_v44 }
 0x41f   : > { %v2594_v49 = vrot.slane %v2577_v36, %v8222_v34  ;;  %v2620_v50 = vmul.f32 %v2586_v39, %v2305_v44  ;;  %v2578_v58 = vcombine.high %v2574_v40, %v2574_v40  ;;  %v2602_v7 = vrot.slane %v2574_v40, %v8222_v34 }
 0x420   : > { %v2606_v8 = vrot.slane %v2576_v46, %v8222_v34  ;;  %v2621_v13 = vmul.f32 %v2590_v51, %v2305_v44  ;;  %v2623_v15 = vmul.f32 %v2598_v57, %v2305_v44 }
 0x421   : > { %v2622_v5 = vmul.f32 %v2594_v49, %v2305_v44  ;;  %v2610_v16 = vrot.slane %v2578_v58, %v8222_v34  ;;  %v2624_v24 = vmul.f32 %v2602_v7, %v2305_v44 }
 0x422   : > { %v8218_v29 = vpop.f32.mrf.mxu0  ;;  %v2625_v26 = vmul.f32 %v2606_v8, %v2305_v44 }
 0x423   : > { %v2626_v39 = vmul.f32 %v2610_v16, %v2305_v44 }
 0x424   : > { %v6944_v31 = vpop.f32.mrf.mxu0 }
 0x42a   : > { %v6955_v42 = vpop.f32.mrf.mxu0 }
 0x42b   : > { %v2496_v45 = vadd.f32 %v6955_v42, %v8227_v38 }
 0x42c   : > { %v2490_v48 = vpop.f32.mrf.mxu0 }
 0x42d   : > { %v2628_v52 = vadd.f32 1.0, %v2496_v45  ;;  %v2491_v54 = vadd.f32 %v8227_v38, %v2490_v48 }
 0x42e   : > { %v6958_v55 = vpop.f32.mrf.mxu0 }
 0x42f   : > { %v2636_v60 = vmul.f32 %v2628_v52, %v2620_v50  ;;  %v2627_v3 = vadd.f32 1.0, %v2491_v54  ;;  %v2506_v4 = vadd.f32 %v6958_v55, %v8227_v38 }
 0x430   : > { %v2500_v6 = vpop.f32.mrf.mxu0 }
 0x431   : > { %v8240_v9 = vmul.f32 %v2636_v60, %v2496_v45  ;;  %v2635_v10 = vmul.f32 %v2627_v3, %v2619_v63  ;;  %v2630_v11 = vadd.f32 1.0, %v2506_v4  ;;  %v2501_v12 = vadd.f32 %v8227_v38, %v2500_v6 }
 0x432   : > { %v6961_v14 = vpop.f32.mrf.mxu0 }
 0x433   : > { %v2798_v17 = vsel %vm2113_vm6, %v8240_v9, -inf  ;;  %v8246_v18 = vmul.f32 %v2635_v10, %v2491_v54  ;;  %v2638_v19 = vmul.f32 %v2630_v11, %v2622_v5  ;;  %v2629_v20 = vadd.f32 1.0, %v2501_v12 }
 0x434   : > { %v2799_v22 = vrot.slane %v2798_v17, 4  ;;  %v2516_v23 = vadd.f32 %v6961_v14, %v8227_v38  ;;  %v2510_v25 = vpop.f32.mrf.mxu0 }
 0x435   : > { %v2791_v27 = vsel %vm2113_vm6, %v8246_v18, -inf  ;;  %v8251_v30 = vmul.f32 %v2638_v19, %v2506_v4  ;;  %v2637_v31 = vmul.f32 %v2629_v20, %v2621_v13  ;;  %v2511_v32 = vadd.f32 %v8227_v38, %v2510_v25  ;;  %6973 = vmatprep.mubr.msk.f32.mxu1 %vm2113_vm6, %v8246_v18 }
 0x436   : > { %v2800_v33 = vmax.f32 %v2798_v17, %v2799_v22  ;;  %v2792_v35 = vrot.slane %v2791_v27, 4  ;;  %v2632_v36 = vadd.f32 1.0, %v2516_v23  ;;  %v6964_v37 = vpop.f32.mrf.mxu0  ;;  %6974 = vmatmul.mubr.msk.f32.vlgmr.msra.gmra.mxu1 %vm2113_vm6, %v8240_v9 }
 0x437   : > { %v2812_v40 = vsel %vm2113_vm6, %v8251_v30, -inf  ;;  %v8260_v41 = vmul.f32 %v2637_v31, %v2501_v12  ;;  %v2631_v42 = vadd.f32 1.0, %v2511_v32  ;;  %v2526_v43 = vadd.f32 %v6964_v37, %v8227_v38 }
 0x438   : > { %v2801_v45 = vrot.slane %v2800_v33, 2  ;;  %v2793_v46 = vmax.f32 %v2791_v27, %v2792_v35  ;;  %v2813_v48 = vrot.slane %v2812_v40, 4  ;;  %v2640_v49 = vmul.f32 %v2632_v36, %v2624_v24  ;;  %v2520_v50 = vpop.f32.mrf.mxu0 }
 0x439   : > { %v2805_v52 = vsel %vm2113_vm6, %v8260_v41, -inf  ;;  %v2639_v44 = vmul.f32 %v2631_v42, %v2623_v15  ;;  %v2634_v54 = vadd.f32 1.0, %v2526_v43  ;;  %v2521_v55 = vadd.f32 %v8227_v38, %v2520_v50  ;;  %6976 = vmatprep.mubr.msk.f32.mxu1 %vm2113_vm6, %v8260_v41 }
 0x43a   : > { %v2802_v51 = vmax.f32 %v2800_v33, %v2801_v45  ;;  %v2794_v57 = vrot.slane %v2793_v46, 2  ;;  %v2814_v58 = vmax.f32 %v2812_v40, %v2813_v48  ;;  %v2806_v60 = vrot.slane %v2805_v52, 4  ;;  %6977 = vmatmul.mubr.msk.f32.gmra.mxu1 %vm2113_vm6, %v8251_v30 }
 0x43b   : > { %v8270_v63 = vmul.f32 %v2640_v49, %v2516_v23  ;;  %v8272_v3 = vmul.f32 %v2639_v44, %v2511_v32  ;;  %v2642_v4 = vmul.f32 %v2634_v54, %v2626_v39  ;;  %v2633_v5 = vadd.f32 1.0, %v2521_v55 }
 0x43c   : > { %v2803_v6 = vrot.slane %v2802_v51, 1  ;;  %v2795_v7 = vmax.f32 %v2793_v46, %v2794_v57  ;;  %v2815_v8 = vrot.slane %v2814_v58, 2  ;;  %v2807_v38 = vmax.f32 %v2805_v52, %v2806_v60 }
 0x43d   : > { %v2826_v10 = vsel %vm2113_vm6, %v8270_v63, -inf  ;;  %v2819_v11 = vsel %vm2113_vm6, %v8272_v3, -inf  ;;  %v8278_v12 = vmul.f32 %v2642_v4, %v2526_v43  ;;  %v2641_v13 = vmul.f32 %v2633_v5, %v2625_v26  ;;  %6979 = vmatprep.mubr.msk.f32.mxu1 %vm2113_vm6, %v8272_v3 }
 0x43e   : > { %v2804_v14 = vmax.f32 %v2802_v51, %v2803_v6  ;;  %v2796_v15 = vrot.slane %v2795_v7, 1  ;;  %v2816_v16 = vmax.f32 %v2814_v58, %v2815_v8  ;;  %v2808_v17 = vrot.slane %v2807_v38, 2  ;;  %6980 = vmatmul.mubr.msk.f32.gmra.mxu1 %vm2113_vm6, %v8270_v63 }
 0x43f   : > { %v2827_v19 = vrot.slane %v2826_v10, 4  ;;  %v2820_v20 = vrot.slane %v2819_v11, 4  ;;  %v2840_v22 = vsel %vm2113_vm6, %v8278_v12, -inf  ;;  %v2649_v23 = vmul.f32 %v2641_v13, %v2521_v55  ;;  %v6382_v13 = vld [vmem:[%s9344_s13] ss:$0 sm:$0xff] }
 0x440   : > { %v2848_v24 = vsub.f32 %v8240_v9, %v2804_v14  ;;  %v2797_v25 = vmax.f32 %v2795_v7, %v2796_v15  ;;  %v2817_v26 = vrot.slane %v2816_v16, 1  ;;  %v2809_v27 = vmax.f32 %v2807_v38, %v2808_v17 }
 0x441   : > { %v2828_v31 = vmax.f32 %v2826_v10, %v2827_v19  ;;  %v2821_v32 = vmax.f32 %v2819_v11, %v2820_v20  ;;  %v2841_v33 = vrot.slane %v2840_v22, 4  ;;  %v2833_v35 = vsel %vm2113_vm6, %v2649_v23, -inf  ;;  %6982 = vmatprep.mubr.msk.f32.mxu1 %vm2113_vm6, %v2649_v23 }
 0x442   : > { %v2857_v36 = vmul.f32 1.442695, %v2848_v24  ;;  %v2847_v37 = vsub.f32 %v8246_v18, %v2797_v25  ;;  %v2818_v39 = vmax.f32 %v2816_v16, %v2817_v26  ;;  %v2810_v40 = vrot.slane %v2809_v27, 1  ;;  %6983 = vmatmul.mubr.msk.f32.gmra.mxu1 %vm2113_vm6, %v8278_v12 }
 0x443   : > { %v2829_v42 = vrot.slane %v2828_v31, 2  ;;  %v2822_v9 = vrot.slane %v2821_v32, 2  ;;  %v2842_v43 = vmax.f32 %v2840_v22, %v2841_v33  ;;  %v2834_v45 = vrot.slane %v2833_v35, 4  ;;  %7004 = vmatprep.mubr.msk.f32.mxu1 %vm7679_vm1, %v7678_v1 }
 0x444   : > { %7365 = vpow2.f32 %v2857_v36  ;;  %v2855_v46 = vmul.f32 1.442695, %v2847_v37  ;;  %v2850_v48 = vsub.f32 %v8251_v30, %v2818_v39  ;;  %v2811_v49 = vmax.f32 %v2809_v27, %v2810_v40 }
 0x445   : > { %v2830_v50 = vmax.f32 %v2828_v31, %v2829_v42  ;;  %v2823_v52 = vmax.f32 %v2821_v32, %v2822_v9  ;;  %v2843_v18 = vrot.slane %v2842_v43, 2  ;;  %v2835_v44 = vmax.f32 %v2833_v35, %v2834_v45 }
 0x446   : > { %7367 = vpow2.f32 %v2855_v46  ;;  %v2861_v54 = vmul.f32 1.442695, %v2850_v48  ;;  %v2849_v55 = vsub.f32 %v8260_v41, %v2811_v49  ;;  %v8301_v20 = vadd.f32 %v6382_v13, %v8218_v29 }
 0x447   : > { %v2831_v51 = vrot.slane %v2830_v50, 1  ;;  %v2824_v57 = vrot.slane %v2823_v52, 1  ;;  %v2844_v58 = vmax.f32 %v2842_v43, %v2843_v18  ;;  %v2836_v60 = vrot.slane %v2835_v44, 2 }
 0x448   : > { %7369 = vpow2.f32 %v2861_v54  ;;  %v2859_v4 = vmul.f32 1.442695, %v2849_v55 }
 0x449   : > { %v2832_v5 = vmax.f32 %v2830_v50, %v2831_v51  ;;  %v2825_v6 = vmax.f32 %v2823_v52, %v2824_v57  ;;  %v2845_v7 = vrot.slane %v2844_v58, 1  ;;  %v2837_v30 = vmax.f32 %v2835_v44, %v2836_v60 }
 0x44a   : > { %7371 = vpow2.f32 %v2859_v4 }
 0x44b   : > { %v2852_v8 = vsub.f32 %v8270_v63, %v2832_v5  ;;  %v2851_v38 = vsub.f32 %v8272_v3, %v2825_v6  ;;  %v2846_v10 = vmax.f32 %v2844_v58, %v2845_v7  ;;  %v2838_v11 = vrot.slane %v2837_v30, 1 }
 0x44d   : > { %v2865_v41 = vmul.f32 1.442695, %v2852_v8  ;;  %v2863_v14 = vmul.f32 1.442695, %v2851_v38  ;;  %v2854_v15 = vsub.f32 %v8278_v12, %v2846_v10  ;;  %v2839_v16 = vmax.f32 %v2837_v30, %v2838_v11 }
 0x44f   : > { %7373 = vpow2.f32 %v2865_v41  ;;  %v2869_v17 = vmul.f32 1.442695, %v2854_v15  ;;  %v2853_v19 = vsub.f32 %v2649_v23, %v2839_v16 }
 0x450   : > { %7375 = vpow2.f32 %v2863_v14 }
 0x451   : > { %v7366_v22 = vpop.eup %7365  ;;  %v2867_v24 = vmul.f32 1.442695, %v2853_v19  ;;  %7377 = vpow2.f32 %v2869_v17 }
 0x452   : > { %v2878_v63 = vsel %vm2113_vm6, %v7366_v22, 0.0  ;;  %v2928_v3 = vmul.f32 %v7366_v22, %v8301_v20 }
 0x453   : > { %v7368_v25 = vpop.eup %7367  ;;  %v2879_v26 = vrot.slane %v2878_v63, 4  ;;  %7379 = vpow2.f32 %v2867_v24 }
 0x454   : > { %v2942_v27 = vsel %vm2113_vm6, %v2928_v3, 0.0  ;;  %v2871_v12 = vsel %vm2113_vm6, %v7368_v25, 0.0  ;;  %v2927_v31 = vmul.f32 %v7368_v25, %v8301_v20 }
 0x455   : > { %v7370_v23 = vpop.eup %7369  ;;  %v2880_v32 = vadd.f32 %v2879_v26, %v2878_v63  ;;  %v2872_v29 = vrot.slane %v2871_v12, 4  ;;  %v2943_v37 = vrot.slane %v2942_v27, 4 }
 0x456   : > { %v2892_v33 = vsel %vm2113_vm6, %v7370_v23, 0.0  ;;  %v2935_v40 = vsel %vm2113_vm6, %v2927_v31, 0.0  ;;  %v2930_v49 = vmul.f32 %v7370_v23, %v8301_v20 }
 0x457   : > { %v7372_v35 = vpop.eup %7371  ;;  %v2881_v36 = vrot.slane %v2880_v32, 2  ;;  %v2873_v39 = vadd.f32 %v2872_v29, %v2871_v12  ;;  %v2893_v42 = vrot.slane %v2892_v33, 4  ;;  %v2936_v18 = vrot.slane %v2935_v40, 4 }
 0x458   : > { %v2885_v9 = vsel %vm2113_vm6, %v7372_v35, 0.0  ;;  %v2929_v43 = vmul.f32 %v7372_v35, %v8301_v20  ;;  %v2944_v54 = vadd.f32 %v2943_v37, %v2942_v27  ;;  %v2956_v5 = vsel %vm2113_vm6, %v2930_v49, 0.0 }
 0x459   : > { %v2882_v45 = vadd.f32 %v2881_v36, %v2880_v32  ;;  %v2874_v46 = vrot.slane %v2873_v39, 2  ;;  %v2894_v48 = vadd.f32 %v2893_v42, %v2892_v33  ;;  %v2886_v50 = vrot.slane %v2885_v9, 4 }
 0x45a   : > { %v2949_v57 = vsel %vm2113_vm6, %v2929_v43, 0.0  ;;  %v2937_v7 = vadd.f32 %v2936_v18, %v2935_v40  ;;  %v2945_v10 = vrot.slane %v2944_v54, 2  ;;  %v2957_v15 = vrot.slane %v2956_v5, 4 }
 0x45b   : > { %v2875_v52 = vadd.f32 %v2874_v46, %v2873_v39  ;;  %v2895_v55 = vrot.slane %v2894_v48, 2  ;;  %v2887_v51 = vadd.f32 %v2886_v50, %v2885_v9  ;;  %v2883_v58 = vrot.slane %v2882_v45, 1 }
 0x45c   : > { %v7374_v44 = vpop.eup %7373  ;;  %v2950_v30 = vrot.slane %v2949_v57, 4  ;;  %v2938_v25 = vrot.slane %v2937_v7, 2 }
 0x45d   : > { %v7376_v60 = vpop.eup %7375  ;;  %v2876_v4 = vrot.slane %v2875_v52, 1  ;;  %v2888_v6 = vrot.slane %v2887_v51, 2  ;;  %v2906_v8 = vsel %vm2113_vm6, %v7374_v44, 0.0  ;;  %v2896_v11 = vadd.f32 %v2895_v55, %v2894_v48 }
 0x45e   : > { %v7378_v38 = vpop.eup %7377  ;;  %v2907_v41 = vrot.slane %v2906_v8, 4  ;;  %v2884_v14 = vadd.f32 %v2883_v58, %v2882_v45  ;;  %v2899_v16 = vsel %vm2113_vm6, %v7376_v60, 0.0  ;;  %v2931_v17 = vmul.f32 %v7376_v60, %v8301_v20 }
 0x45f   : > { %v2889_v13 = vadd.f32 %v2888_v6, %v2887_v51  ;;  %v2877_v22 = vadd.f32 %v2876_v4, %v2875_v52  ;;  %v2932_v3 = vmul.f32 %v7374_v44, %v8301_v20  ;;  %v2951_v26 = vadd.f32 %v2950_v30, %v2949_v57 }
 0x460   : > { %v7380_v19 = vpop.eup %7379  ;;  %v2908_v63 = vadd.f32 %v2907_v41, %v2906_v8  ;;  %v2900_v27 = vrot.slane %v2899_v16, 4  ;;  %v2920_v12 = vsel %vm2113_vm6, %v7378_v38, 0.0  ;;  %v2897_v31 = vrot.slane %v2896_v11, 1 }
 0x461   : > { %v2890_v24 = vrot.slane %v2889_v13, 1  ;;  %v2963_v29 = vsel %vm2113_vm6, %v2931_v17, 0.0  ;;  %7381 = vrcp.f32 %v2884_v14  ;;  %v2921_v35 = vrot.slane %v2920_v12, 4 }
 0x462   : > { %v2909_v32 = vrot.slane %v2908_v63, 2  ;;  %v2901_v33 = vadd.f32 %v2900_v27, %v2899_v16  ;;  %v2913_v36 = vsel %vm2113_vm6, %v7380_v19, 0.0  ;;  %7383 = vrcp.f32 %v2877_v22 }
 0x463   : > { %v2891_v23 = vadd.f32 %v2890_v24, %v2889_v13  ;;  %v2970_v39 = vsel %vm2113_vm6, %v2932_v3, 0.0  ;;  %v2914_v40 = vrot.slane %v2913_v36, 4  ;;  %v2964_v9 = vrot.slane %v2963_v29, 4 }
 0x464   : > { %v2910_v37 = vadd.f32 %v2909_v32, %v2908_v63  ;;  %v2902_v42 = vrot.slane %v2901_v33, 2  ;;  %v2922_v43 = vadd.f32 %v2921_v35, %v2920_v12  ;;  %v2898_v45 = vadd.f32 %v2897_v31, %v2896_v11 }
 0x465   : > { %7385 = vrcp.f32 %v2891_v23  ;;  %v2952_v46 = vrot.slane %v2951_v26, 2  ;;  %v2915_v49 = vadd.f32 %v2914_v40, %v2913_v36  ;;  %v2971_v50 = vrot.slane %v2970_v39, 4 }
 0x466   : > { %v2911_v48 = vrot.slane %v2910_v37, 1  ;;  %v2903_v52 = vadd.f32 %v2902_v42, %v2901_v33  ;;  %v2923_v18 = vrot.slane %v2922_v43, 2  ;;  %v2933_v44 = vmul.f32 %v7380_v19, %v8301_v20 }
 0x467   : > { %v2946_v55 = vadd.f32 %v2945_v10, %v2944_v54  ;;  %v2958_v51 = vadd.f32 %v2957_v15, %v2956_v5  ;;  %v2916_v58 = vrot.slane %v2915_v49, 2  ;;  %v2965_v4 = vadd.f32 %v2964_v9, %v2963_v29 }
 0x468   : > { %v2912_v57 = vadd.f32 %v2911_v48, %v2910_v37  ;;  %v2904_v60 = vrot.slane %v2903_v52, 1  ;;  %v2924_v6 = vadd.f32 %v2923_v18, %v2922_v43  ;;  %v2934_v30 = vmul.f32 %v7378_v38, %v8301_v20 }
 0x469   : > { %v2939_v8 = vadd.f32 %v2938_v25, %v2937_v7  ;;  %7387 = vrcp.f32 %v2898_v45  ;;  %v2953_v11 = vadd.f32 %v2952_v46, %v2951_v26  ;;  %v2917_v13 = vadd.f32 %v2916_v58, %v2915_v49 }
 0x46a   : > { %v2905_v41 = vadd.f32 %v2904_v60, %v2903_v52  ;;  %v2925_v14 = vrot.slane %v2924_v6, 1  ;;  %v2972_v16 = vadd.f32 %v2971_v50, %v2970_v39  ;;  %v2977_v17 = vsel %vm2113_vm6, %v2933_v44, 0.0 }
 0x46b   : > { %v2959_v22 = vrot.slane %v2958_v51, 2  ;;  %7389 = vrcp.f32 %v2912_v57  ;;  %v2918_v54 = vrot.slane %v2917_v13, 1  ;;  %v2978_v5 = vrot.slane %v2977_v17, 4 }
 0x46c   : > { %7391 = vrcp.f32 %v2905_v41  ;;  %v2926_v10 = vadd.f32 %v2925_v14, %v2924_v6  ;;  %v2966_v15 = vrot.slane %v2965_v4, 2  ;;  %v2984_v19 = vsel %vm2113_vm6, %v2934_v30, 0.0 }
 0x46d   : > { %v2940_v24 = vrot.slane %v2939_v8, 1  ;;  %v2919_v20 = vadd.f32 %v2918_v54, %v2917_v13  ;;  %v2979_v7 = vadd.f32 %v2978_v5, %v2977_v17  ;;  %v2954_v38 = vrot.slane %v2953_v11, 1 }
 0x46e   : > { %v2973_v63 = vrot.slane %v2972_v16, 2  ;;  %v2985_v3 = vrot.slane %v2984_v19, 4  ;;  %7393 = vrcp.f32 %v2926_v10  ;;  %v7382_v25 = vpop.eup %7381  ;;  %v2947_v26 = vrot.slane %v2946_v55, 1 }
 0x46f   : > { %7395 = vrcp.f32 %v2919_v20  ;;  %v2960_v27 = vadd.f32 %v2959_v22, %v2958_v51  ;;  %v2980_v12 = vrot.slane %v2979_v7, 2  ;;  %v7384_v31 = vpop.eup %7383  ;;  %v2967_v23 = vadd.f32 %v2966_v15, %v2965_v4 }
 0x470   : > { %v2986_v32 = vadd.f32 %v2985_v3, %v2984_v19  ;;  %v2941_v33 = vadd.f32 %v2940_v24, %v2939_v8  ;;  %v2955_v35 = vadd.f32 %v2954_v38, %v2953_v11  ;;  %v2974_v36 = vadd.f32 %v2973_v63, %v2972_v16  ;;  %v6393_v19 = vld [vmem:[%s9345_s14] ss:$0 sm:$0xff] }
 0x471   : > { %v2948_v39 = vadd.f32 %v2947_v26, %v2946_v55  ;;  %v2961_v40 = vrot.slane %v2960_v27, 1  ;;  %v2981_v42 = vadd.f32 %v2980_v12, %v2979_v7  ;;  %v2968_v43 = vrot.slane %v2967_v23, 1 }
 0x472   : > { %v7386_v29 = vpop.eup %7385  ;;  %v2987_v37 = vrot.slane %v2986_v32, 2  ;;  %v2992_v9 = vmul.f32 %v7384_v31, %v2941_v33  ;;  %v2975_v50 = vrot.slane %v2974_v36, 1 }
 0x473   : > { %v2996_v46 = vmul.f32 %v7386_v29, %v2955_v35  ;;  %v2994_v48 = vmul.f32 %v7382_v25, %v2948_v39  ;;  %v2962_v52 = vadd.f32 %v2961_v40, %v2960_v27  ;;  %v2982_v18 = vrot.slane %v2981_v42, 1 }
 0x474   : > { %v2988_v45 = vadd.f32 %v2987_v37, %v2986_v32  ;;  %v2969_v57 = vadd.f32 %v2968_v43, %v2967_v23  ;;  %v2976_v6 = vadd.f32 %v2975_v50, %v2974_v36 }
 0x475   : > { %v3027_v44 = vsel %vm3026_vm7, %v2994_v48, %v2992_v9  ;;  %v2983_v11 = vadd.f32 %v2982_v18, %v2981_v42 }
 0x476   : > { %v7388_v49 = vpop.eup %7387  ;;  %v2989_v58 = vrot.slane %v2988_v45, 1  ;;  %v3029_v55 = vsel %vm3028_vm8, %v2996_v46, %v3027_v44 }
 0x477   : > { %v2998_v4 = vmul.f32 %v7388_v49, %v2962_v52 }
 0x478   : > { %v7390_v51 = vpop.eup %7389  ;;  %v2990_v14 = vadd.f32 %v2989_v58, %v2988_v45 }
 0x479   : > { %v7392_v60 = vpop.eup %7391  ;;  %v3031_v13 = vsel %vm3030_vm9, %v2998_v4, %v3029_v55  ;;  %v3002_v16 = vmul.f32 %v7390_v51, %v2976_v6 }
 0x47a   : > { %v3000_v30 = vmul.f32 %v7392_v60, %v2969_v57 }
 0x47b   : > { %v7394_v8 = vpop.eup %7393 }
 0x47c   : > { %v7396_v41 = vpop.eup %7395  ;;  %v3033_v17 = vsel %vm3032_vm10, %v3000_v30, %v3031_v13  ;;  %v3006_v54 = vmul.f32 %v7394_v8, %v2990_v14 }
 0x47d   : > { %v3004_v22 = vmul.f32 %v7396_v41, %v2983_v11  ;;  %v3035_v5 = vsel %vm3034_vm11, %v3002_v16, %v3033_v17 }
 0x47f   : > { %v3037_v10 = vsel %vm3036_vm12, %v3004_v22, %v3035_v5 }
 0x480   : > { %v3039_v15 = vsel %vm3038_vm13, %v3006_v54, %v3037_v10 }
 0x481   : > { %6994 = vmatmul.mubr.msk.f32.vlgmr.msra.gmra.mxu0 %vm2113_vm6, %v3039_v15 }
 0x482   : > { %7023 = vmatprep.mubr.msk.f32.mxu0 %vm7679_vm1, %v7678_v1 }
 0x4f6   : > { %v6975_v24 = vpop.f32.mrf.mxu1 }
 0x4f7   : > { %v8338_v20 = vadd.f32 %v6975_v24, %v6393_v19 }
 0x4f8   : > { %v2752_v7 = vpop.f32.mrf.mxu1 }
 0x4f9   : > { %v2753_v38 = vadd.f32 %v6393_v19, %v2752_v7  ;;  %v3143_v15 = vadd.f32 %v8338_v20, %v8168_v47  ;;  %v3287_v20 = vld [vmem:[%s9347_s21 + $0x18] sm:$0xff] }
 0x4fa   : > { %v6978_v63 = vpop.f32.mrf.mxu1  ;;  %6997 = vmatpush3.msra.mxu1 %v3287_v20 }
 0x4fb   : > { %v2768_v3 = vadd.f32 %v6978_v63, %v6393_v19  ;;  %v3142_v25 = vadd.f32 %v2753_v38, %v8150_v28  ;;  %6998 = vmatprep.subr.mxu1 %v7678_v1 }
 0x4fc   : > { %v2762_v26 = vpop.f32.mrf.mxu1 }
 0x4fd   : > { %v2763_v27 = vadd.f32 %v6393_v19, %v2762_v26  ;;  %v3152_v12 = vsel %vm2113_vm6, %v3142_v25, 0.0  ;;  %v3145_v24 = vadd.f32 %v2768_v3, %v8178_v56  ;;  %v3286_v26 = vld [vmem:[%s9347_s21 + $0x10] sm:$0xff]  ;;  %v3285_v56 = vld [vmem:[%s9347_s21 + $0x8] sm:$0xff]  ;;  %v3284_v3 = vld [vmem:[%s9347_s21] sm:$0xff] }
 0x4fe   : > { %v6981_v31 = vpop.f32.mrf.mxu1  ;;  %3153 = vadd.xlane.f32.xlu0 %v3152_v12  ;;  %6999 = vmatpush3.msra.mxu1 %v3286_v26 }
 0x4ff   : > { %v2778_v23 = vadd.f32 %v6981_v31, %v6393_v19  ;;  %v3144_v32 = vadd.f32 %v2763_v27, %v8171_v53  ;;  %v6402_v53 = vld [vmem:[%s9346_s17] ss:$0 sm:$0xff]  ;;  %v3161_v7 = vsel %vm2113_vm6, %v3145_v24, 0.0  ;;  %7000 = vmatprep.subr.mxu1 %v7678_v1 }
 0x500   : > { %v2772_v29 = vpop.f32.mrf.mxu1  ;;  %7001 = vmatpush3.msra.mxu1 %v3285_v56 }
 0x501   : > { %v2773_v33 = vadd.f32 %v6393_v19, %v2772_v29  ;;  %v3158_v35 = vsel %vm2113_vm6, %v3144_v32, 0.0  ;;  %v3147_v38 = vadd.f32 %v2778_v23, %v8186_v62  ;;  %7002 = vmatprep.subr.mxu1 %v7678_v1 }
 0x502   : > { %v6984_v36 = vpop.f32.mrf.mxu1  ;;  %3159 = vadd.xlane.f32.xlu0 %v3158_v35  ;;  %7003 = vmatpush3.msra.mxu1 %v3284_v3 }
 0x503   : > { %v2788_v37 = vadd.f32 %v6984_v36, %v6393_v19  ;;  %v3146_v39 = vadd.f32 %v2773_v33, %v8180_v59  ;;  %v3167_v63 = vsel %vm2113_vm6, %v3147_v38, 0.0 }
 0x504   : > { %v2782_v28 = vpop.f32.mrf.mxu1 }
 0x505   : > { %v2783_v40 = vadd.f32 %v6393_v19, %v2782_v28  ;;  %v3164_v42 = vsel %vm2113_vm6, %v3146_v39, 0.0  ;;  %v3155_v19 = vsel %vm2113_vm6, %v3143_v15, 0.0 }
 0x506   : > { %3165 = vadd.xlane.f32.xlu0 %v3164_v42 }
 0x507   : > { %v3148_v9 = vadd.f32 %v2783_v40, %v8188_v0 }
 0x509   : > { %v3170_v43 = vsel %vm2113_vm6, %v3148_v9, 0.0 }
 0x50a   : > { %3171 = vadd.xlane.f32.xlu0 %v3170_v43 }
 0x541   : > { %v3108_v45 = vpop.f32.mrf.mxu0 }
 0x542   : > { %v3109_v46 = vadd.f32 %v6402_v53, %v3108_v45 }
 0x543   : > { %v6995_v48 = vpop.f32.mrf.mxu0 }
 0x544   : > { %v3112_v49 = vadd.f32 %v3109_v46, %v8112_v61 }
 0x546   : > { %v3115_v50 = vsel %vm2113_vm6, %v3112_v49, 0.0 }
 0x547   : > { %3116 = vadd.xlane.f32.xlu1 %v3115_v50 }
 0x587   : > { %v3154_v59 = vpop.xlane.xlu0 %3153 }
 0x588   : > { %v3176_v52 = vmul.f32 0.03125, %v3154_v59  ;;  %v8404_v59 = vld [vmem:[%s9348_s25] ss:$0 sm:$0xff] }
 0x58a   : > { %v8351_v18 = vsub.f32 %v3142_v25, %v3176_v52  ;;  %v3149_v25 = vadd.f32 %v2788_v37, %v8194_v2 }
 0x58b   : > { %v3160_v44 = vpop.xlane.xlu0 %3159 }
 0x58c   : > { %v3178_v51 = vmul.f32 0.03125, %v3160_v44  ;;  %v3192_v0 = vmul.f32 %v8351_v18, %v8351_v18  ;;  %v3173_v47 = vsel %vm2113_vm6, %v3149_v25, 0.0  ;;  %v6404_v44 = vld [vmem:[%s9349_s29] ss:$0 sm:$0xff] }
 0x58e   : > { %v8355_v57 = vsub.f32 %v3144_v32, %v3178_v51  ;;  %v3200_v58 = vsel %vm2113_vm6, %v3192_v0, 0.0 }
 0x58f   : > { %3201 = vadd.xlane.f32.xlu0 %v3200_v58  ;;  %v3166_v55 = vpop.xlane.xlu0 %3165 }
 0x590   : > { %v3180_v60 = vmul.f32 0.03125, %v3166_v55  ;;  %v3194_v61 = vmul.f32 %v8355_v57, %v8355_v57  ;;  %v6405_v55 = vld [vmem:[%s9350_s11] ss:$0 sm:$0xff] }
 0x592   : > { %v8360_v4 = vsub.f32 %v3146_v39, %v3180_v60  ;;  %v3206_v6 = vsel %vm2113_vm6, %v3194_v61, 0.0 }
 0x593   : > { %3207 = vadd.xlane.f32.xlu0 %v3206_v6  ;;  %v3172_v30 = vpop.xlane.xlu0 %3171  ;;  %v8415_v6 = vld [vmem:[%s9351_s26] ss:$0 sm:$0xff]  ;;  %s9356_s26 = sld [smem:[#allocation43_spill]] }
 0x594   : > { %v3182_v8 = vmul.f32 0.03125, %v3172_v30  ;;  %v3196_v11 = vmul.f32 %v8360_v4, %v8360_v4 }
 0x596   : > { %v8365_v13 = vsub.f32 %v3148_v9, %v3182_v8  ;;  %v3212_v41 = vsel %vm2113_vm6, %v3196_v11, 0.0 }
 0x597   : > { %3213 = vadd.xlane.f32.xlu0 %v3212_v41  ;;  %v3460_v41 = vld [vmem:[%s9353_s16 + $0x18] sm:$0xff] }
 0x598   : > { %v3198_v14 = vmul.f32 %v8365_v13, %v8365_v13  ;;  %7026 = vmatprep.subr.mxu1 %v3460_v41 }
 0x599   : > { %s9357_s6 = smov %s9356_s26 }
 0x59a   : > { %v3218_v16 = vsel %vm2113_vm6, %v3198_v14, 0.0  ;;  %v3459_v14 = vld [vmem:[%s9353_s16 + $0x10] sm:$0xff] }
 0x59b   : > { %3219 = vadd.xlane.f32.xlu0 %v3218_v16  ;;  %v3458_v16 = vld [vmem:[%s9353_s16 + $0x8] sm:$0xff] }
 0x5d0   : > { %v3117_v17 = vpop.xlane.xlu1 %3116 }
 0x5d1   : > { %v3118_v22 = vmul.f32 0.03125, %v3117_v17  ;;  %v3457_v17 = vld [vmem:[%s9353_s16] sm:$0xff] }
 0x5d3   : > { %v3119_v54 = vsub.f32 %v3112_v49, %v3118_v22  ;;  %v3376_v22 = vld [vmem:[%s9354_s22 + $0x38] sm:$0xff]  ;;  %s9358_s22 = sld [smem:[#allocation38_spill]] }
 0x5d4   : > { %7008 = vmatpush3.msra.mxu0 %v3376_v22 }
 0x5d5   : > { %v3120_v5 = vmul.f32 %v3119_v54, %v3119_v54  ;;  %7009 = vmatprep.subr.mxu0 %v7678_v1 }
 0x5d7   : > { %v3121_v10 = vsel %vm2113_vm6, %v3120_v5, 0.0  ;;  %v3374_v5 = vld [vmem:[%s9355_s20 + $0x28] sm:$0xff] }
 0x5d8   : > { %3122 = vadd.xlane.f32.xlu1 %v3121_v10  ;;  %v3373_v10 = vld [vmem:[%s9355_s20 + $0x20] sm:$0xff] }
 0x5d9   : > { %s9359_s18 = smov %s9358_s22 }
 0x5dc   : > { %3156 = vadd.xlane.f32.xlu1 %v3155_v19  ;;  %v3371_v19 = vld [vmem:[%s9355_s20 + $0x10] sm:$0xff] }
 0x5e0   : > { %3162 = vadd.xlane.f32.xlu1 %v3161_v7  ;;  %v3369_v7 = vld [vmem:[%s9355_s20] sm:$0xff] }
 0x5e4   : > { %3168 = vadd.xlane.f32.xlu1 %v3167_v63 }
 0x5e8   : > { %3174 = vadd.xlane.f32.xlu1 %v3173_v47 }
 0x618   : > { %v3202_v62 = vpop.xlane.xlu0 %3201 }
 0x619   : > { %v3224_v2 = vmul.f32 0.03125, %v3202_v62 }
 0x61b   : > { %v3232_v27 = vadd.f32 1e-05, %v3224_v2 }
 0x61c   : > { %v3208_v63 = vpop.xlane.xlu0 %3207 }
 0x61d   : > { %7397 = vrsqrt.f32 %v3232_v27  ;;  %v3226_v47 = vmul.f32 0.03125, %v3208_v63  ;;  %v3606_v63 = vld [vmem:[%s9357_s6 + $0x8] sm:$0xff] }
 0x61f   : > { %v3234_v20 = vadd.f32 1e-05, %v3226_v47 }
 0x62a   : > { %v7398_v42 = vpop.eup %7397 }
 0x62b   : > { %v3248_v48 = vmul.f32 %v7398_v42, %v8351_v18 }
 0x62d   : > { %v3262_v18 = vmul.f32 %v8404_v59, %v3248_v48 }
 0x62f   : > { %v8421_v11 = vadd.f32 %v8415_v6, %v3262_v18 }
 0x661   : > { %v3123_v12 = vpop.xlane.xlu1 %3122 }
 0x662   : > { %v3124_v31 = vmul.f32 0.03125, %v3123_v12 }
 0x664   : > { %v3125_v23 = vadd.f32 1e-05, %v3124_v31 }
 0x665   : > { %v3157_v32 = vpop.xlane.xlu1 %3156 }
 0x666   : > { %7399 = vrsqrt.f32 %v3125_v23  ;;  %v3177_v29 = vmul.f32 0.03125, %v3157_v32 }
 0x667   : > { %7401 = vrsqrt.f32 %v3234_v20 }
 0x668   : > { %v8388_v33 = vsub.f32 %v3143_v15, %v3177_v29  ;;  %v3372_v15 = vld [vmem:[%s9355_s20 + $0x18] sm:$0xff] }
 0x669   : > { %v3163_v35 = vpop.xlane.xlu1 %3162 }
 0x66a   : > { %v3179_v36 = vmul.f32 0.03125, %v3163_v35  ;;  %v3193_v37 = vmul.f32 %v8388_v33, %v8388_v33 }
 0x66c   : > { %v8392_v39 = vsub.f32 %v3145_v24, %v3179_v36  ;;  %v3203_v28 = vsel %vm2113_vm6, %v3193_v37, 0.0  ;;  %v3370_v24 = vld [vmem:[%s9355_s20 + $0x8] sm:$0xff] }
 0x66d   : > { %v3169_v40 = vpop.xlane.xlu1 %3168  ;;  %3204 = vadd.xlane.f32.xlu1 %v3203_v28 }
 0x66e   : > { %v3181_v9 = vmul.f32 0.03125, %v3169_v40  ;;  %v3195_v43 = vmul.f32 %v8392_v39, %v8392_v39 }
 0x670   : > { %v8397_v53 = vsub.f32 %v3147_v38, %v3181_v9  ;;  %v3209_v45 = vsel %vm2113_vm6, %v3195_v43, 0.0  ;;  %v3612_v38 = vld [vmem:[%s9356_s26 + $0x38] sm:$0xff]  ;;  %s9360_s26 = sld [smem:[#allocation42_spill]] }
 0x671   : > { %3210 = vadd.xlane.f32.xlu1 %v3209_v45  ;;  %v3175_v46 = vpop.xlane.xlu1 %3174 }
 0x672   : > { %v3183_v49 = vmul.f32 0.03125, %v3175_v46  ;;  %v3197_v50 = vmul.f32 %v8397_v53, %v8397_v53 }
 0x673   : > { %v7400_v52 = vpop.eup %7399 }
 0x674   : > { %v3127_v51 = vmul.f32 %v7400_v52, %v3119_v54  ;;  %v8407_v0 = vsub.f32 %v3149_v25, %v3183_v49  ;;  %v3215_v58 = vsel %vm2113_vm6, %v3197_v50, 0.0  ;;  %v3375_v54 = vld [vmem:[%s9355_s20 + $0x30] sm:$0xff]  ;;  %v3214_v25 = vpop.xlane.xlu0 %3213  ;;  %v7402_v40 = vpop.eup %7401 }
 0x675   : > { %3216 = vadd.xlane.f32.xlu1 %v3215_v58  ;;  %7010 = vmatpush3.msra.mxu0 %v3375_v54  ;;  %v3228_v26 = vmul.f32 0.03125, %v3214_v25  ;;  %v3250_v43 = vmul.f32 %v7402_v40, %v8355_v57  ;;  %v3605_v25 = vld [vmem:[%s9357_s6] sm:$0xff] }
 0x676   : > { %v3134_v60 = vmul.f32 %v6404_v44, %v3127_v51  ;;  %v3199_v61 = vmul.f32 %v8407_v0, %v8407_v0  ;;  %7011 = vmatprep.subr.mxu0 %v7678_v1  ;;  %s9361_s4 = smov %s9360_s26  ;;  %v6412_v47 = vld [vmem:[%s9360_s26] ss:$0 sm:$0xff]  ;;  %s9364_s26 = sld [smem:[#allocation44_spill]] }
 0x677   : > { %7012 = vmatpush3.msra.mxu0 %v3374_v5  ;;  %v3236_v3 = vadd.f32 1e-05, %v3228_v26  ;;  %v3264_v49 = vmul.f32 %v8404_v59, %v3250_v43 }
 0x678   : > { %v3221_v30 = vsel %vm2113_vm6, %v3199_v61, 0.0  ;;  %v8418_v8 = vadd.f32 %v6405_v55, %v3134_v60  ;;  %7013 = vmatprep.subr.mxu0 %v7678_v1  ;;  %v3220_v56 = vpop.xlane.xlu0 %3219  ;;  %v3611_v60 = vld [vmem:[%s9357_s6 + $0x30] sm:$0xff] }
 0x679   : > { %3222 = vadd.xlane.f32.xlu1 %v3221_v30  ;;  %7014 = vmatpush3.msra.mxu0 %v3373_v10  ;;  %v3230_v62 = vmul.f32 0.03125, %v3220_v56  ;;  %7403 = vrsqrt.f32 %v3236_v3  ;;  %v8458_v57 = vadd.f32 %v8415_v6, %v3264_v49 }
 0x67a   : > { %7005 = vmatmul.mubr.msk.f32.vlgmr.msra.gmra.mxu1 %vm2113_vm6, %v8418_v8  ;;  %7015 = vmatprep.subr.mxu0 %v7678_v1 }
 0x67b   : > { %7034 = vmatprep.mubr.msk.f32.mxu1 %vm2113_vm6, %v8421_v11  ;;  %7027 = vmatpush3.msra.mxu1 %v3460_v41  ;;  %v3238_v31 = vadd.f32 1e-05, %v3230_v62 }
 0x67c   : > { %7028 = vmatprep.subr.mxu1 %v3459_v14  ;;  %7016 = vmatpush3.msra.mxu0 %v3372_v15 }
 0x67d   : > { %7029 = vmatpush3.msra.mxu1 %v3459_v14  ;;  %7017 = vmatprep.subr.mxu0 %v7678_v1 }
 0x67e   : > { %7030 = vmatprep.subr.mxu1 %v3458_v16  ;;  %7018 = vmatpush3.msra.mxu0 %v3371_v19 }
 0x67f   : > { %7031 = vmatpush3.msra.mxu1 %v3458_v16  ;;  %7019 = vmatprep.subr.mxu0 %v7678_v1  ;;  %v3609_v16 = vld [vmem:[%s9357_s6 + $0x20] sm:$0xff] }
 0x680   : > { %7032 = vmatprep.subr.mxu1 %v3457_v17  ;;  %7020 = vmatpush3.msra.mxu0 %v3370_v24 }
 0x681   : > { %7033 = vmatpush3.msra.mxu1 %v3457_v17  ;;  %7021 = vmatprep.subr.mxu0 %v7678_v1 }
 0x682   : > { %7046 = vmatprep.subr.mxu1 %v3612_v38  ;;  %7022 = vmatpush3.msra.mxu0 %v3369_v7 }
 0x683   : > { %7074 = vmatprep.subr.mxu0 %v7678_v1 }
 0x686   : > { %v7404_v45 = vpop.eup %7403 }
 0x687   : > { %v3252_v50 = vmul.f32 %v7404_v45, %v8360_v4 }
 0x6f6   : > { %v3205_v2 = vpop.xlane.xlu1 %3204 }
 0x6f7   : > { %v3225_v27 = vmul.f32 0.03125, %v3205_v2 }
 0x6f9   : > { %v3233_v12 = vadd.f32 1e-05, %v3225_v27 }
 0x6fa   : > { %v3211_v23 = vpop.xlane.xlu1 %3210 }
 0x6fb   : > { %7405 = vrsqrt.f32 %v3233_v12  ;;  %v3227_v32 = vmul.f32 0.03125, %v3211_v23 }
 0x6fc   : > { %7407 = vrsqrt.f32 %v3238_v31 }
 0x6fd   : > { %v3235_v29 = vadd.f32 1e-05, %v3227_v32 }
 0x6fe   : > { %v3217_v35 = vpop.xlane.xlu1 %3216 }
 0x6ff   : > { %7409 = vrsqrt.f32 %v3235_v29  ;;  %v3229_v36 = vmul.f32 0.03125, %v3217_v35 }
 0x701   : > { %v3237_v37 = vadd.f32 1e-05, %v3229_v36 }
 0x702   : > { %v3223_v28 = vpop.xlane.xlu1 %3222 }
 0x703   : > { %7411 = vrsqrt.f32 %v3237_v37  ;;  %v3231_v42 = vmul.f32 0.03125, %v3223_v28 }
 0x705   : > { %v3239_v9 = vadd.f32 1e-05, %v3231_v42 }
 0x707   : > { %7413 = vrsqrt.f32 %v3239_v9 }
 0x708   : > { %v7406_v46 = vpop.eup %7405 }
 0x709   : > { %v3249_v48 = vmul.f32 %v7406_v46, %v8388_v33  ;;  %v7408_v52 = vpop.eup %7407  ;;  %v3266_v33 = vmul.f32 %v8404_v59, %v3252_v50 }
 0x70a   : > { %v3254_v18 = vmul.f32 %v7408_v52, %v8365_v13 }
 0x70b   : > { %v3263_v44 = vmul.f32 %v8404_v59, %v3249_v48  ;;  %v8474_v13 = vadd.f32 %v8415_v6, %v3266_v33 }
 0x70c   : > { %v7410_v51 = vpop.eup %7409  ;;  %v3268_v14 = vmul.f32 %v8404_v59, %v3254_v18 }
 0x70d   : > { %v8454_v58 = vadd.f32 %v8415_v6, %v3263_v44  ;;  %v3251_v55 = vmul.f32 %v7410_v51, %v8392_v39  ;;  %v3610_v39 = vld [vmem:[%s9357_s6 + $0x28] sm:$0xff] }
 0x70e   : > { %v8488_v5 = vadd.f32 %v8415_v6, %v3268_v14  ;;  %v6421_v14 = vld [vmem:[%s9364_s26] ss:$0 sm:$0xff]  ;;  %s9367_s26 = sld [smem:[#allocation34_spill]] }
 0x70f   : > { %7035 = vmatmul.mubr.msk.f32.vlgmr.msra.gmra.mxu1 %vm2113_vm6, %v8454_v58  ;;  %v3265_v4 = vmul.f32 %v8404_v59, %v3251_v55 }
 0x710   : > { %v7412_v61 = vpop.eup %7411  ;;  %7037 = vmatprep.mubr.msk.f32.mxu1 %vm2113_vm6, %v8458_v57  ;;  %7047 = vmatpush3.msra.mxu1 %v3612_v38 }
 0x711   : > { %v8470_v30 = vadd.f32 %v8415_v6, %v3265_v4  ;;  %v3253_v41 = vmul.f32 %v7412_v61, %v8397_v53  ;;  %7048 = vmatprep.subr.mxu1 %v3611_v60 }
 0x712   : > { %7049 = vmatpush3.msra.mxu1 %v3611_v60 }
 0x713   : > { %7038 = vmatmul.mubr.msk.f32.gmra.mxu1 %vm2113_vm6, %v8470_v30  ;;  %v3267_v17 = vmul.f32 %v8404_v59, %v3253_v41  ;;  %7050 = vmatprep.subr.mxu1 %v3610_v39 }
 0x714   : > { %v7414_v22 = vpop.eup %7413  ;;  %7040 = vmatprep.mubr.msk.f32.mxu1 %vm2113_vm6, %v8474_v13  ;;  %7051 = vmatpush3.msra.mxu1 %v3610_v39 }
 0x715   : > { %v8484_v53 = vadd.f32 %v8415_v6, %v3267_v17  ;;  %v3255_v54 = vmul.f32 %v7414_v22, %v8407_v0  ;;  %7052 = vmatprep.subr.mxu1 %v3609_v16  ;;  %v6408_v0 = vld [vmem:[%s9358_s22] ss:$0 sm:$0xff]  ;;  %s9362_s22 = sld [smem:[#allocation40_spill]] }
 0x716   : > { %7053 = vmatpush3.msra.mxu1 %v3609_v16 }
 0x717   : > { %7041 = vmatmul.mubr.msk.f32.gmra.mxu1 %vm2113_vm6, %v8484_v53  ;;  %v3269_v10 = vmul.f32 %v8404_v59, %v3255_v54  ;;  %v3608_v59 = vld [vmem:[%s9357_s6 + $0x18] sm:$0xff] }
 0x718   : > { %7043 = vmatprep.mubr.msk.f32.mxu1 %vm2113_vm6, %v8488_v5  ;;  %7054 = vmatprep.subr.mxu1 %v3608_v59 }
 0x719   : > { %v8496_v15 = vadd.f32 %v8415_v6, %v3269_v10  ;;  %7055 = vmatpush3.msra.mxu1 %v3608_v59  ;;  %v3607_v6 = vld [vmem:[%s9357_s6 + $0x10] sm:$0xff] }
 0x71a   : > { %7056 = vmatprep.subr.mxu1 %v3607_v6 }
 0x71b   : > { %7044 = vmatmul.mubr.msk.f32.gmra.mxu1 %vm2113_vm6, %v8496_v15  ;;  %s9363_s15 = smov %s9362_s22  ;;  %v6410_v50 = vld [vmem:[%s9362_s22] ss:$0 sm:$0xff]  ;;  %s9365_s22 = sld [smem:[#allocation33_spill]] }
 0x71c   : > { %7057 = vmatpush3.msra.mxu1 %v3607_v6 }
 0x71d   : > { %7058 = vmatprep.subr.mxu1 %v3606_v63 }
 0x71e   : > { %7059 = vmatpush3.msra.mxu1 %v3606_v63 }
 0x71f   : > { %7060 = vmatprep.subr.mxu1 %v3605_v25 }
 0x720   : > { %7061 = vmatpush3.msra.mxu1 %v3605_v25 }
 0x721   : > { %s9366_s0 = smov %s9365_s22 }
 0x73a   : > { %v3364_v19 = vpop.f32.mrf.mxu1 }
 0x73b   : > { %v3365_v24 = vadd.f32 %v6408_v0, %v3364_v19 }
 0x73c   : > { %v7006_v7 = vpop.f32.mrf.mxu1 }
 0x73d   : > { %v3368_v38 = vmax.f32 %v3365_v24, 0.0 }
 0x73f   : > { %7024 = vmatmul.mubr.msk.f32.vlgmr.msra.gmra.mxu0 %vm1574_vm5, %v3368_v38 }
 0x740   : > { %7082 = vmatprep.mubr.msk.f32.mxu0 %vm7679_vm1, %v7678_v1 }
 0x7cf   : > { %v7036_v20 = vpop.f32.mrf.mxu1 }
 0x7d0   : > { %v3564_v26 = vadd.f32 %v7036_v20, %v6412_v47 }
 0x7d1   : > { %v3558_v56 = vpop.f32.mrf.mxu1 }
 0x7d2   : > { %v3559_v3 = vadd.f32 %v6412_v47, %v3558_v56  ;;  %v3598_v27 = vmax.f32 %v3564_v26, 0.0 }
 0x7d3   : > { %v7039_v62 = vpop.f32.mrf.mxu1 }
 0x7d4   : > { %v3597_v2 = vmax.f32 %v3559_v3, 0.0  ;;  %v3574_v12 = vadd.f32 %v7039_v62, %v6412_v47 }
 0x7d5   : > { %v3568_v31 = vpop.f32.mrf.mxu1 }
 0x7d6   : > { %v3569_v23 = vadd.f32 %v6412_v47, %v3568_v31  ;;  %7062 = vmatprep.mubr.msk.f32.mxu1 %vm1574_vm5, %v3597_v2  ;;  %v3600_v35 = vmax.f32 %v3574_v12, 0.0 }
 0x7d7   : > { %v7042_v32 = vpop.f32.mrf.mxu1  ;;  %7063 = vmatmul.mubr.msk.f32.vlgmr.msra.gmra.mxu1 %vm1574_vm5, %v3598_v27 }
 0x7d8   : > { %v3599_v29 = vmax.f32 %v3569_v23, 0.0  ;;  %v3584_v36 = vadd.f32 %v7042_v32, %v6412_v47  ;;  %v6430_v23 = vld [vmem:[%s9365_s22] ss:$0 sm:$0xff]  ;;  %s9368_s22 = sld [smem:[#allocation35_spill]] }
 0x7d9   : > { %v3578_v37 = vpop.f32.mrf.mxu1 }
 0x7da   : > { %v3579_v28 = vadd.f32 %v6412_v47, %v3578_v37  ;;  %7065 = vmatprep.mubr.msk.f32.mxu1 %vm1574_vm5, %v3599_v29  ;;  %v3602_v9 = vmax.f32 %v3584_v36, 0.0  ;;  %v6431_v29 = vld [vmem:[%s9367_s26] ss:$0 sm:$0xff]  ;;  %s9370_s26 = sld [smem:[#allocation36_spill]] }
 0x7db   : > { %v7045_v40 = vpop.f32.mrf.mxu1  ;;  %7066 = vmatmul.mubr.msk.f32.gmra.mxu1 %vm1574_vm5, %v3600_v35 }
 0x7dc   : > { %v3601_v42 = vmax.f32 %v3579_v28, 0.0  ;;  %v3594_v43 = vadd.f32 %v7045_v40, %v6412_v47 }
 0x7dd   : > { %v3588_v45 = vpop.f32.mrf.mxu1 }
 0x7de   : > { %v3589_v46 = vadd.f32 %v6412_v47, %v3588_v45  ;;  %7068 = vmatprep.mubr.msk.f32.mxu1 %vm1574_vm5, %v3601_v42  ;;  %v3604_v49 = vmax.f32 %v3594_v43, 0.0 }
 0x7df   : > { %7069 = vmatmul.mubr.msk.f32.gmra.mxu1 %vm1574_vm5, %v3602_v9 }
 0x7e0   : > { %v3603_v48 = vmax.f32 %v3589_v46, 0.0  ;;  %s9371_s27 = smov %s9370_s26 }
 0x7e2   : > { %7071 = vmatprep.mubr.msk.f32.mxu1 %vm1574_vm5, %v3603_v48 }
 0x7e3   : > { %7072 = vmatmul.mubr.msk.f32.gmra.mxu1 %vm1574_vm5, %v3604_v49 }
 0x7ff   : > { %v3453_v52 = vpop.f32.mrf.mxu0 }
 0x800   : > { %v3454_v44 = vadd.f32 %v6410_v50, %v3453_v52 }
 0x801   : > { %v7025_v51 = vpop.f32.mrf.mxu0 }
 0x802   : > { %v3749_v55 = vadd.f32 %v3454_v44, %v8418_v8 }
 0x804   : > { %v3752_v33 = vsel %vm2113_vm6, %v3749_v55, 0.0 }
 0x805   : > { %3753 = vadd.xlane.f32.xlu0 %v3752_v33 }
 0x88e   : > { %v3754_v18 = vpop.xlane.xlu0 %3753 }
 0x88f   : > { %v3755_v60 = vmul.f32 0.03125, %v3754_v18 }
 0x891   : > { %v3756_v4 = vsub.f32 %v3749_v55, %v3755_v60 }
 0x893   : > { %v3757_v61 = vmul.f32 %v3756_v4, %v3756_v4 }
 0x895   : > { %v3758_v39 = vsel %vm2113_vm6, %v3757_v61, 0.0 }
 0x896   : > { %3759 = vadd.xlane.f32.xlu1 %v3758_v39 }
 0x897   : > { %v7064_v41 = vpop.f32.mrf.mxu1 }
 0x898   : > { %v3716_v17 = vadd.f32 %v7064_v41, %v6421_v14 }
 0x899   : > { %v3710_v16 = vpop.f32.mrf.mxu1 }
 0x89a   : > { %v3711_v22 = vadd.f32 %v6421_v14, %v3710_v16  ;;  %v3780_v7 = vadd.f32 %v3716_v17, %v8454_v58 }
 0x89b   : > { %v7067_v54 = vpop.f32.mrf.mxu1 }
 0x89c   : > { %v3779_v10 = vadd.f32 %v3711_v22, %v8421_v11  ;;  %v3726_v8 = vadd.f32 %v7067_v54, %v6421_v14  ;;  %v3792_v25 = vsel %vm2113_vm6, %v3780_v7, 0.0 }
 0x89d   : > { %v3720_v0 = vpop.f32.mrf.mxu1 }
 0x89e   : > { %v3721_v19 = vadd.f32 %v6421_v14, %v3720_v0  ;;  %v3789_v24 = vsel %vm2113_vm6, %v3779_v10, 0.0  ;;  %v3782_v47 = vadd.f32 %v3726_v8, %v8470_v30  ;;  %v6462_v0 = vld [vmem:[%s9338_s7 + $0x38] sm:$0xff]  ;;  %v6461_v8 = vld [vmem:[%s9338_s7 + $0x30] sm:$0xff] }
 0x89f   : > { %v7070_v38 = vpop.f32.mrf.mxu1  ;;  %3790 = vadd.xlane.f32.xlu0 %v3789_v24  ;;  %7107 = vmatprep.subr.mxu1 %v6462_v0  ;;  %v6459_v24 = vld [vmem:[%s9338_s7 + $0x20] sm:$0xff] }
 0x8a0   : > { %v3736_v6 = vadd.f32 %v7070_v38, %v6421_v14  ;;  %v3798_v26 = vsel %vm2113_vm6, %v3782_v47, 0.0  ;;  %7108 = vmatpush3.msra.mxu1 %v6462_v0 }
 0x8a1   : > { %v3730_v59 = vpop.f32.mrf.mxu1  ;;  %7109 = vmatprep.subr.mxu1 %v6461_v8 }
 0x8a2   : > { %v3731_v63 = vadd.f32 %v6421_v14, %v3730_v59  ;;  %v3784_v56 = vadd.f32 %v3736_v6, %v8484_v53  ;;  %7110 = vmatpush3.msra.mxu1 %v6461_v8 }
 0x8a3   : > { %3793 = vadd.xlane.f32.xlu0 %v3792_v25  ;;  %v7073_v20 = vpop.f32.mrf.mxu1 }
 0x8a4   : > { %v3746_v11 = vadd.f32 %v7073_v20, %v6421_v14  ;;  %v3804_v58 = vsel %vm2113_vm6, %v3784_v56, 0.0  ;;  %v3783_v43 = vadd.f32 %v3731_v63, %v8474_v13 }
 0x8a5   : > { %v3740_v28 = vpop.f32.mrf.mxu1 }
 0x8a6   : > { %v3786_v3 = vadd.f32 %v3746_v11, %v8496_v15  ;;  %v3781_v15 = vadd.f32 %v3721_v19, %v8458_v57  ;;  %v3741_v40 = vadd.f32 %v6421_v14, %v3740_v28  ;;  %v3801_v49 = vsel %vm2113_vm6, %v3783_v43, 0.0  ;;  %v6460_v19 = vld [vmem:[%s9338_s7 + $0x28] sm:$0xff]  ;;  %s9369_s7 = smov %s9368_s22  ;;  %v8592_v28 = vld [vmem:[%s9368_s22] ss:$0 sm:$0xff]  ;;  %s9372_s22 = sld [smem:[#allocation44_spill]] }
 0x8a7   : > { %3799 = vadd.xlane.f32.xlu0 %v3798_v26  ;;  %7111 = vmatprep.subr.mxu1 %v6460_v19 }
 0x8a8   : > { %v3810_v62 = vsel %vm2113_vm6, %v3786_v3, 0.0  ;;  %v3795_v9 = vsel %vm2113_vm6, %v3781_v15, 0.0  ;;  %v3785_v50 = vadd.f32 %v3741_v40, %v8488_v5  ;;  %7112 = vmatpush3.msra.mxu1 %v6460_v19 }
 0x8a9   : > { %7113 = vmatprep.subr.mxu1 %v6459_v24 }
 0x8aa   : > { %v3807_v51 = vsel %vm2113_vm6, %v3785_v50, 0.0  ;;  %7114 = vmatpush3.msra.mxu1 %v6459_v24 }
 0x8ab   : > { %3805 = vadd.xlane.f32.xlu0 %v3804_v58  ;;  %7147 = vmatprep.subr.mxu1 %v7678_v1 }
 0x8af   : > { %3811 = vadd.xlane.f32.xlu0 %v3810_v62 }
 0x91f   : > { %v3760_v2 = vpop.xlane.xlu1 %3759 }
 0x920   : > { %v3761_v30 = vmul.f32 0.03125, %v3760_v2 }
 0x922   : > { %v3762_v27 = vadd.f32 1e-05, %v3761_v30 }
 0x924   : > { %7415 = vrsqrt.f32 %v3762_v27 }
 0x928   : > { %v3791_v31 = vpop.xlane.xlu0 %3790 }
 0x929   : > { %v3813_v42 = vmul.f32 0.03125, %v3791_v31 }
 0x92b   : > { %v8538_v46 = vsub.f32 %v3779_v10, %v3813_v42  ;;  %v8596_v42 = vld [vmem:[%s9370_s26] ss:$0 sm:$0xff]  ;;  %s9373_s26 = sld [smem:[#allocation45_spill]] }
 0x92c   : > { %v3794_v36 = vpop.xlane.xlu0 %3793 }
 0x92d   : > { %v3814_v48 = vmul.f32 0.03125, %v3794_v36  ;;  %v3829_v55 = vmul.f32 %v8538_v46, %v8538_v46 }
 0x92f   : > { %v8542_v57 = vsub.f32 %v3780_v7, %v3814_v48  ;;  %v3837_v18 = vsel %vm2113_vm6, %v3829_v55, 0.0 }
 0x930   : > { %v3800_v45 = vpop.xlane.xlu0 %3799 }
 0x931   : > { %v7416_v12 = vpop.eup %7415  ;;  %v3816_v44 = vmul.f32 0.03125, %v3800_v45  ;;  %v3830_v60 = vmul.f32 %v8542_v57, %v8542_v57 }
 0x932   : > { %v3764_v32 = vmul.f32 %v7416_v12, %v3756_v4 }
 0x933   : > { %v8547_v13 = vsub.f32 %v3782_v47, %v3816_v44  ;;  %v3840_v39 = vsel %vm2113_vm6, %v3830_v60, 0.0 }
 0x934   : > { %v3771_v35 = vmul.f32 %v6430_v23, %v3764_v32  ;;  %v3806_v52 = vpop.xlane.xlu0 %3805 }
 0x935   : > { %v3818_v33 = vmul.f32 0.03125, %v3806_v52  ;;  %v3832_v41 = vmul.f32 %v8547_v13, %v8547_v13 }
 0x936   : > { %v3778_v53 = vadd.f32 %v6431_v29, %v3771_v35 }
 0x937   : > { %v8552_v4 = vsub.f32 %v3784_v56, %v3818_v33  ;;  %v3846_v16 = vsel %vm2113_vm6, %v3832_v41, 0.0 }
 0x938   : > { %v3925_v37 = vsel %vm2113_vm6, %v3778_v53, 0.0  ;;  %v3812_v5 = vpop.xlane.xlu0 %3811 }
 0x939   : > { %3926 = vadd.xlane.f32.xlu1 %v3925_v37  ;;  %v3820_v61 = vmul.f32 0.03125, %v3812_v5  ;;  %v3834_v17 = vmul.f32 %v8552_v4, %v8552_v4 }
 0x93b   : > { %v8557_v14 = vsub.f32 %v3786_v3, %v3820_v61  ;;  %v3852_v22 = vsel %vm2113_vm6, %v3834_v17, 0.0 }
 0x93d   : > { %3796 = vadd.xlane.f32.xlu1 %v3795_v9  ;;  %v3836_v54 = vmul.f32 %v8557_v14, %v8557_v14  ;;  %v6441_v9 = vld [vmem:[%s7753_s30 + $0x38] sm:$0xff] }
 0x93e   : > { %7075 = vmatpush3.msra.mxu0 %v6441_v9 }
 0x93f   : > { %v3858_v10 = vsel %vm2113_vm6, %v3836_v54, 0.0  ;;  %7076 = vmatprep.subr.mxu0 %v7678_v1 }
 0x941   : > { %3802 = vadd.xlane.f32.xlu1 %v3801_v49  ;;  %v6439_v49 = vld [vmem:[%s7753_s30 + $0x28] sm:$0xff] }
 0x945   : > { %3808 = vadd.xlane.f32.xlu1 %v3807_v51 }
 0x949   : > { %3838 = vadd.xlane.f32.xlu1 %v3837_v18 }
 0x94d   : > { %3841 = vadd.xlane.f32.xlu1 %v3840_v39 }
 0x951   : > { %3847 = vadd.xlane.f32.xlu1 %v3846_v16 }
 0x955   : > { %3853 = vadd.xlane.f32.xlu1 %v3852_v22 }
 0x959   : > { %3859 = vadd.xlane.f32.xlu1 %v3858_v10 }
 0x9c2   : > { %v3927_v7 = vpop.xlane.xlu1 %3926 }
 0x9c3   : > { %v3928_v38 = vmul.f32 0.03125, %v3927_v7 }
 0x9c5   : > { %v8571_v59 = vsub.f32 %v3778_v53, %v3928_v38 }
 0x9c6   : > { %v3797_v6 = vpop.xlane.xlu1 %3796 }
 0x9c7   : > { %v3815_v63 = vmul.f32 0.03125, %v3797_v6  ;;  %v3930_v25 = vmul.f32 %v8571_v59, %v8571_v59 }
 0x9c9   : > { %v8575_v47 = vsub.f32 %v3781_v15, %v3815_v63  ;;  %v3931_v20 = vsel %vm2113_vm6, %v3930_v25, 0.0 }
 0x9ca   : > { %3932 = vadd.xlane.f32.xlu0 %v3931_v20  ;;  %v3803_v11 = vpop.xlane.xlu1 %3802  ;;  %v6436_v20 = vld [vmem:[%s7743_s19 + $0x1] ss:$0 sm:$0xff] }
 0x9cb   : > { %v3817_v26 = vmul.f32 0.03125, %v3803_v11  ;;  %v3831_v56 = vmul.f32 %v8575_v47, %v8575_v47 }
 0x9cd   : > { %v8580_v58 = vsub.f32 %v3783_v43, %v3817_v26  ;;  %v3843_v3 = vsel %vm2113_vm6, %v3831_v56, 0.0  ;;  %v6440_v43 = vld [vmem:[%s7753_s30 + $0x30] sm:$0xff]  ;;  %v6437_v26 = vld [vmem:[%s7748_s24 + $0x1] ss:$0 sm:$0xff] }
 0x9ce   : > { %3844 = vadd.xlane.f32.xlu0 %v3843_v3  ;;  %v3809_v62 = vpop.xlane.xlu1 %3808  ;;  %7077 = vmatpush3.msra.mxu0 %v6440_v43 }
 0x9cf   : > { %v3819_v2 = vmul.f32 0.03125, %v3809_v62  ;;  %v3833_v30 = vmul.f32 %v8580_v58, %v8580_v58  ;;  %7078 = vmatprep.subr.mxu0 %v7678_v1 }
 0x9d0   : > { %7079 = vmatpush3.msra.mxu0 %v6439_v49  ;;  %v6454_v49 = vld [vmem:[%s9337_s10 + $0x30] sm:$0xff] }
 0x9d1   : > { %v8585_v27 = vsub.f32 %v3785_v50, %v3819_v2  ;;  %v3849_v12 = vsel %vm2113_vm6, %v3833_v30, 0.0  ;;  %7080 = vmatprep.subr.mxu0 %v7678_v1 }
 0x9d2   : > { %3850 = vadd.xlane.f32.xlu0 %v3849_v12  ;;  %v3839_v31 = vpop.xlane.xlu1 %3838  ;;  %v6448_v12 = vld [vmem:[%s9316_s12 + $0x38] sm:$0xff] }
 0x9d3   : > { %v3861_v23 = vmul.f32 0.03125, %v3839_v31  ;;  %v3835_v32 = vmul.f32 %v8585_v27, %v8585_v27 }
 0x9d5   : > { %v3869_v29 = vadd.f32 1e-05, %v3861_v23  ;;  %v3855_v35 = vsel %vm2113_vm6, %v3835_v32, 0.0 }
 0x9d6   : > { %3856 = vadd.xlane.f32.xlu0 %v3855_v35  ;;  %v3842_v53 = vpop.xlane.xlu1 %3841 }
 0x9d7   : > { %7417 = vrsqrt.f32 %v3869_v29  ;;  %v3862_v36 = vmul.f32 0.03125, %v3842_v53 }
 0x9d9   : > { %v3870_v37 = vadd.f32 1e-05, %v3862_v36 }
 0x9db   : > { %7419 = vrsqrt.f32 %v3870_v37 }
 0x9e4   : > { %v7418_v15 = vpop.eup %7417 }
 0x9e5   : > { %v3885_v40 = vmul.f32 %v7418_v15, %v8538_v46  ;;  %v6438_v46 = vld [vmem:[%s7753_s30 + $0x20] sm:$0xff] }
 0x9e6   : > { %7081 = vmatpush3.msra.mxu0 %v6438_v46 }
 0x9e7   : > { %v3899_v45 = vmul.f32 %v8592_v28, %v3885_v40  ;;  %7085 = vmatprep.subr.mxu0 %v7678_v1 }
 0x9e8   : > { %v7420_v48 = vpop.eup %7419 }
 0x9e9   : > { %v3886_v50 = vmul.f32 %v7420_v48, %v8542_v57  ;;  %v8605_v52 = vadd.f32 %v8596_v42, %v3899_v45  ;;  %v3848_v57 = vpop.xlane.xlu1 %3847 }
 0x9ea   : > { %v3864_v33 = vmul.f32 0.03125, %v3848_v57  ;;  %v6452_v57 = vld [vmem:[%s9337_s10 + $0x20] sm:$0xff] }
 0x9eb   : > { %v3900_v44 = vmul.f32 %v8592_v28, %v3886_v50  ;;  %7115 = vmatprep.mubr.msk.f32.mxu1 %vm2113_vm6, %v8605_v52 }
 0x9ec   : > { %v3872_v18 = vadd.f32 1e-05, %v3864_v33  ;;  %v6474_v33 = vld [vmem:[%s9339_s1 + $0x28] sm:$0xff] }
 0x9ed   : > { %v8614_v51 = vadd.f32 %v8596_v42, %v3900_v44  ;;  %v3854_v55 = vpop.xlane.xlu1 %3853 }
 0x9ee   : > { %v3866_v60 = vmul.f32 0.03125, %v3854_v55  ;;  %7421 = vrsqrt.f32 %v3872_v18  ;;  %v6476_v55 = vld [vmem:[%s9339_s1 + $0x38] sm:$0xff]  ;;  %v6473_v18 = vld [vmem:[%s9339_s1 + $0x20] sm:$0xff] }
 0x9ef   : > { %7116 = vmatmul.mubr.msk.f32.vlgmr.msra.gmra.mxu1 %vm2113_vm6, %v8614_v51 }
 0x9f0   : > { %v3874_v16 = vadd.f32 1e-05, %v3866_v60  ;;  %v6490_v60 = vld [vmem:[%s9340_s3 + $0x38] sm:$0xff] }
 0x9f1   : > { %v3860_v61 = vpop.xlane.xlu1 %3859  ;;  %7148 = vmatpush3.msra.mxu1 %v6490_v60 }
 0x9f2   : > { %v3868_v17 = vmul.f32 0.03125, %v3860_v61  ;;  %7149 = vmatprep.subr.mxu1 %v7678_v1  ;;  %v6488_v61 = vld [vmem:[%s9340_s3 + $0x28] sm:$0xff] }
 0x9f4   : > { %v3876_v0 = vadd.f32 1e-05, %v3868_v17 }
 0x9fb   : > { %v7422_v63 = vpop.eup %7421 }
 0x9fc   : > { %v3888_v56 = vmul.f32 %v7422_v63, %v8547_v13 }
 0x9fe   : > { %v3902_v23 = vmul.f32 %v8592_v28, %v3888_v56 }
 0xa00   : > { %v8642_v37 = vadd.f32 %v8596_v42, %v3902_v23 }
 0xa53   : > { %v3933_v5 = vpop.xlane.xlu0 %3932 }
 0xa54   : > { %v3934_v39 = vmul.f32 0.03125, %v3933_v5  ;;  %v6489_v5 = vld [vmem:[%s9340_s3 + $0x30] sm:$0xff] }
 0xa55   : > { %7150 = vmatpush3.msra.mxu1 %v6489_v5 }
 0xa56   : > { %v3935_v41 = vadd.f32 1e-05, %v3934_v39  ;;  %7151 = vmatprep.subr.mxu1 %v7678_v1  ;;  %v6487_v39 = vld [vmem:[%s9340_s3 + $0x20] sm:$0xff] }
 0xa57   : > { %v3845_v22 = vpop.xlane.xlu0 %3844  ;;  %7152 = vmatpush3.msra.mxu1 %v6488_v61 }
 0xa58   : > { %7423 = vrsqrt.f32 %v3935_v41  ;;  %v3863_v54 = vmul.f32 0.03125, %v3845_v22  ;;  %7153 = vmatprep.subr.mxu1 %v7678_v1  ;;  %v6443_v41 = vld [vmem:[%s9341_s5 + $0x1] ss:$0 sm:$0xff] }
 0xa59   : > { %7425 = vrsqrt.f32 %v3874_v16  ;;  %7154 = vmatpush3.msra.mxu1 %v6487_v39  ;;  %v6464_v22 = vld [vmem:[%s9343_s9 + $0x1] ss:$0 sm:$0xff] }
 0xa5a   : > { %v3871_v10 = vadd.f32 1e-05, %v3863_v54  ;;  %7169 = vmatprep.subr.mxu1 %v7678_v1 }
 0xa5b   : > { %v3851_v8 = vpop.xlane.xlu0 %3850 }
 0xa5c   : > { %7427 = vrsqrt.f32 %v3871_v10  ;;  %v3865_v19 = vmul.f32 0.03125, %v3851_v8 }
 0xa5d   : > { %7429 = vrsqrt.f32 %v3876_v0 }
 0xa5e   : > { %v3873_v24 = vadd.f32 1e-05, %v3865_v19 }
 0xa5f   : > { %v3857_v7 = vpop.xlane.xlu0 %3856 }
 0xa60   : > { %7431 = vrsqrt.f32 %v3873_v24  ;;  %v3867_v38 = vmul.f32 0.03125, %v3857_v7 }
 0xa62   : > { %v3875_v6 = vadd.f32 1e-05, %v3867_v38 }
 0xa64   : > { %7433 = vrsqrt.f32 %v3875_v6 }
 0xa65   : > { %v7424_v25 = vpop.eup %7423 }
 0xa66   : > { %v3937_v11 = vmul.f32 %v7424_v25, %v8571_v59  ;;  %v7426_v3 = vpop.eup %7425  ;;  %v6447_v59 = vld [vmem:[%s9316_s12 + $0x30] sm:$0xff] }
 0xa67   : > { %v3890_v13 = vmul.f32 %v7426_v3, %v8552_v4  ;;  %v6445_v4 = vld [vmem:[%s9316_s12 + $0x20] sm:$0xff] }
 0xa68   : > { %v3944_v62 = vmul.f32 %v6436_v20, %v3937_v11 }
 0xa69   : > { %v7428_v2 = vpop.eup %7427  ;;  %v3904_v40 = vmul.f32 %v8592_v28, %v3890_v13 }
 0xa6a   : > { %v8623_v30 = vadd.f32 %v6437_v26, %v3944_v62  ;;  %v3887_v31 = vmul.f32 %v7428_v2, %v8575_v47  ;;  %v7430_v32 = vpop.eup %7429  ;;  %v6446_v47 = vld [vmem:[%s9316_s12 + $0x28] sm:$0xff]  ;;  %v6450_v26 = vld [vmem:[%s9342_s8 + $0x1] ss:$0 sm:$0xff] }
 0xa6b   : > { %v3892_v9 = vmul.f32 %v7430_v32, %v8557_v14  ;;  %v8663_v14 = vadd.f32 %v8596_v42, %v3904_v40 }
 0xa6c   : > { %7083 = vmatmul.mubr.msk.f32.vlgmr.msra.gmra.mxu0 %vm2113_vm6, %v8623_v30  ;;  %v3901_v29 = vmul.f32 %v8592_v28, %v3887_v31 }
 0xa6d   : > { %v7432_v35 = vpop.eup %7431  ;;  %7086 = vmatpush3.msra.mxu0 %v6448_v12  ;;  %7093 = vmatprep.mubr.msk.f32.mxu0 %vm7679_vm1, %v7678_v1  ;;  %v3906_v46 = vmul.f32 %v8592_v28, %v3892_v9 }
 0xa6e   : > { %7087 = vmatprep.subr.mxu0 %v7678_v1  ;;  %v8638_v53 = vadd.f32 %v8596_v42, %v3901_v29  ;;  %v3889_v36 = vmul.f32 %v7432_v35, %v8580_v58  ;;  %v6455_v58 = vld [vmem:[%s9337_s10 + $0x38] sm:$0xff] }
 0xa6f   : > { %7088 = vmatpush3.msra.mxu0 %v6447_v59 }
 0xa70   : > { %7089 = vmatprep.subr.mxu0 %v7678_v1  ;;  %7118 = vmatprep.mubr.msk.f32.mxu1 %vm2113_vm6, %v8638_v53  ;;  %v3903_v15 = vmul.f32 %v8592_v28, %v3889_v36 }
 0xa71   : > { %v7434_v43 = vpop.eup %7433  ;;  %7090 = vmatpush3.msra.mxu0 %v6446_v47  ;;  %7119 = vmatmul.mubr.msk.f32.gmra.mxu1 %vm2113_vm6, %v8642_v37 }
 0xa72   : > { %7091 = vmatprep.subr.mxu0 %v7678_v1  ;;  %v8656_v45 = vadd.f32 %v8596_v42, %v3903_v15  ;;  %v3891_v48 = vmul.f32 %v7434_v43, %v8585_v27  ;;  %v6453_v27 = vld [vmem:[%s9337_s10 + $0x28] sm:$0xff]  ;;  %s7681_s10 = smov [#allocation2]  }
 0xa73   : > { %7092 = vmatpush3.msra.mxu0 %v6445_v4 }
 0xa74   : > { %7094 = vmatmul.mubr.msk.f32.vlgmr.msra.gmra.mxu0 %vm2113_vm6, %v8623_v30  ;;  %7096 = vmatprep.subr.mxu0 %v7678_v1  ;;  %v3905_v50 = vmul.f32 %v8592_v28, %v3891_v48  ;;  %v8683_v28 = vadd.f32 %v8596_v42, %v3906_v46 }
 0xa75   : > { %7097 = vmatpush3.msra.mxu0 %v6455_v58  ;;  %7121 = vmatprep.mubr.msk.f32.mxu1 %vm2113_vm6, %v8656_v45 }
 0xa76   : > { %7098 = vmatprep.subr.mxu0 %v7678_v1  ;;  %7122 = vmatmul.mubr.msk.f32.gmra.mxu1 %vm2113_vm6, %v8663_v14  ;;  %v8675_v44 = vadd.f32 %v8596_v42, %v3905_v50  ;;  %v6475_v42 = vld [vmem:[%s9339_s1 + $0x30] sm:$0xff]  ;;  %s9374_s1 = smov %s9373_s26 }
 0xa77   : > { %7099 = vmatpush3.msra.mxu0 %v6454_v49  ;;  %7104 = vmatprep.mubr.msk.f32.mxu0 %vm7679_vm1, %v7678_v1 }
 0xa78   : > { %7100 = vmatprep.subr.mxu0 %v7678_v1  ;;  %7124 = vmatprep.mubr.msk.f32.mxu1 %vm2113_vm6, %v8675_v44 }
 0xa79   : > { %7101 = vmatpush3.msra.mxu0 %v6453_v27 }
 0xa7a   : > { %7102 = vmatprep.subr.mxu0 %v7678_v1  ;;  %7125 = vmatmul.mubr.msk.f32.gmra.mxu1 %vm2113_vm6, %v8683_v28 }
 0xa7b   : > { %7103 = vmatpush3.msra.mxu0 %v6452_v57  ;;  %7155 = vmatprep.mubr.msk.f32.mxu1 %vm7679_vm1, %v7678_v1 }
 0xa7c   : > { %7105 = vmatmul.mubr.msk.f32.vlgmr.msra.gmra.mxu0 %vm2113_vm6, %v8623_v30  ;;  %7127 = vmatprep.subr.mxu0 %v6476_v55 }
 0xa7d   : > { %7128 = vmatpush3.msra.mxu0 %v6476_v55 }
 0xa7e   : > { %7129 = vmatprep.subr.mxu0 %v6475_v42 }
 0xa7f   : > { %7130 = vmatpush3.msra.mxu0 %v6475_v42 }
 0xa80   : > { %7131 = vmatprep.subr.mxu0 %v6474_v33 }
 0xa81   : > { %7132 = vmatpush3.msra.mxu0 %v6474_v33 }
 0xa82   : > { %7133 = vmatprep.subr.mxu0 %v6473_v18 }
 0xa83   : > { %7134 = vmatpush3.msra.mxu0 %v6473_v18 }
 0xa84   : > { %7158 = vmatprep.subr.mxu0 %v7678_v1 }
 0xaaf   : > { %v7117_v16 = vpop.f32.mrf.mxu1 }
 0xab0   : > { %v8708_v19 = vadd.f32 %v7117_v16, %v6464_v22 }
 0xab1   : > { %v4308_v0 = vpop.f32.mrf.mxu1 }
 0xab2   : > { %v4309_v6 = vadd.f32 %v6464_v22, %v4308_v0  ;;  %v4446_v3 = vadd.f32 1.0, %v8708_v19 }
 0xab4   : > { %v4445_v59 = vadd.f32 1.0, %v4309_v6 }
 0xb2c   : > { %v4034_v17 = vpop.f32.mrf.mxu0 }
 0xb2d   : > { %v4035_v54 = vadd.f32 %v6443_v41, %v4034_v17 }
 0xb2e   : > { %v7084_v10 = vpop.f32.mrf.mxu0 }
 0xb2f   : > { %v4038_v8 = vmul.f32 0.35355338, %v4035_v54 }
 0xb31   : > { %v4348_v24 = vcombine.high %v4038_v8, %v4038_v8  ;;  %v4355_v7 = vrot.slane %v4038_v8, %v8214_v21  ;;  %v7120_v38 = vpop.f32.mrf.mxu1 }
 0xb32   : > { %v8711_v63 = vadd.f32 %v7120_v38, %v6464_v22 }
 0xb33   : > { %v4362_v25 = vrot.slane %v4348_v24, %v8214_v21  ;;  %v4363_v20 = vcombine.high %v4355_v7, %v4355_v7  ;;  %v4371_v11 = vrot.slane %v4355_v7, %v8214_v21  ;;  %v4318_v56 = vpop.f32.mrf.mxu1 }
 0xb34   : > { %v4118_v62 = vpop.f32.mrf.mxu0  ;;  %v4319_v2 = vadd.f32 %v6464_v22, %v4318_v56  ;;  %v4448_v13 = vadd.f32 1.0, %v8711_v63 }
 0xb35   : > { %v4364_v12 = vcombine.high %v4362_v25, %v4362_v25  ;;  %v4378_v31 = vrot.slane %v4362_v25, %v8214_v21  ;;  %v4385_v23 = vrot.slane %v4363_v20, %v8214_v21  ;;  %v4393_v32 = vcombine.high %v4371_v11, %v4371_v11 }
 0xb36   : > { %v4400_v29 = vrot.slane %v4371_v11, %v8222_v34  ;;  %v4119_v35 = vadd.f32 %v6450_v26, %v4118_v62  ;;  %v7095_v47 = vpop.f32.mrf.mxu0  ;;  %v7123_v36 = vpop.f32.mrf.mxu1  ;;  %v4447_v46 = vadd.f32 1.0, %v4319_v2 }
 0xb37   : > { %v4392_v4 = vrot.slane %v4364_v12, %v8214_v21  ;;  %v4394_v15 = vcombine.high %v4378_v31, %v4378_v31  ;;  %v4395_v40 = vcombine.high %v4385_v23, %v4385_v23  ;;  %v4404_v9 = vrot.slane %v4385_v23, %v8222_v34 }
 0xb38   : > { %v4408_v43 = vrot.slane %v4393_v32, %v8222_v34  ;;  %v4334_v58 = vadd.f32 %v7123_v36, %v6464_v22  ;;  %v4328_v48 = vpop.f32.mrf.mxu1  ;;  %v4416_v49 = vrot.slane %v4378_v31, %v8222_v34  ;;  %v4437_v50 = vmul.f32 %v4400_v29, %v4119_v35 }
 0xb39   : > { %v4420_v27 = vrot.slane %v4392_v4, %v8222_v34  ;;  %v4329_v57 = vadd.f32 %v6464_v22, %v4328_v48  ;;  %v4396_v55 = vcombine.high %v4392_v4, %v4392_v4  ;;  %v4424_v60 = vrot.slane %v4394_v15, %v8222_v34 }
 0xb3a   : > { %v4439_v42 = vmul.f32 %v4408_v43, %v4119_v35  ;;  %v4450_v33 = vadd.f32 1.0, %v4334_v58  ;;  %v4441_v18 = vmul.f32 %v4416_v49, %v4119_v35  ;;  %v7126_v21 = vpop.f32.mrf.mxu1  ;;  %v4412_v16 = vrot.slane %v4395_v40, %v8222_v34 }
 0xb3b   : > { %v4442_v5 = vmul.f32 %v4420_v27, %v4119_v35  ;;  %v4449_v61 = vadd.f32 1.0, %v4329_v57  ;;  %v4344_v39 = vadd.f32 %v7126_v21, %v6464_v22  ;;  %v4428_v41 = vrot.slane %v4396_v55, %v8222_v34 }
 0xb3c   : > { %v4455_v17 = vmul.f32 %v4447_v46, %v4439_v42  ;;  %v8729_v54 = vpop.f32.mrf.mxu0  ;;  %v4338_v10 = vpop.f32.mrf.mxu1  ;;  %v4453_v0 = vmul.f32 %v4445_v59, %v4437_v50  ;;  %v4438_v8 = vmul.f32 %v4404_v9, %v4119_v35  ;;  %v4443_v26 = vmul.f32 %v4424_v60, %v4119_v35 }
 0xb3d   : > { %v4458_v24 = vmul.f32 %v4450_v33, %v4442_v5  ;;  %v4457_v7 = vmul.f32 %v4449_v61, %v4441_v18  ;;  %v4444_v38 = vmul.f32 %v4428_v41, %v4119_v35  ;;  %v4452_v25 = vadd.f32 1.0, %v4344_v39 }
 0xb3e   : > { %v8731_v20 = vmul.f32 %v4455_v17, %v4319_v2  ;;  %v4339_v11 = vadd.f32 %v6464_v22, %v4338_v10  ;;  %v7106_v56 = vpop.f32.mrf.mxu0  ;;  %v8733_v62 = vmul.f32 %v4453_v0, %v4309_v6  ;;  %v4454_v23 = vmul.f32 %v4446_v3, %v4438_v8 }
 0xb3f   : > { %v8735_v12 = vmul.f32 %v4458_v24, %v4334_v58  ;;  %v8737_v34 = vmul.f32 %v4457_v7, %v4329_v57  ;;  %v4460_v31 = vmul.f32 %v4452_v25, %v4444_v38  ;;  %v4440_v2 = vmul.f32 %v4412_v16, %v4119_v35 }
 0xb40   : > { %v4625_v32 = vsel %vm2113_vm6, %v8731_v20, -inf  ;;  %v4451_v59 = vadd.f32 1.0, %v4339_v11  ;;  %7135 = vmatprep.mubr.msk.f32.mxu0 %vm2113_vm6, %v8733_v62  ;;  %v4611_v22 = vsel %vm2113_vm6, %v8733_v62, -inf  ;;  %v8754_v58 = vmul.f32 %v4454_v23, %v8708_v19 }
 0xb41   : > { %v4626_v29 = vrot.slane %v4625_v32, 4  ;;  %v4646_v6 = vsel %vm2113_vm6, %v8735_v12, -inf  ;;  %v4639_v47 = vsel %vm2113_vm6, %v8737_v34, -inf  ;;  %v8749_v36 = vmul.f32 %v4460_v31, %v4344_v39 }
 0xb42   : > { %v4647_v3 = vrot.slane %v4646_v6, 4  ;;  %v4640_v4 = vrot.slane %v4639_v47, 4  ;;  %v4459_v15 = vmul.f32 %v4451_v59, %v4443_v26  ;;  %v4612_v40 = vrot.slane %v4611_v22, 4  ;;  %7136 = vmatmul.mubr.msk.f32.vlgmr.msra.gmra.mxu0 %vm2113_vm6, %v8754_v58 }
 0xb43   : > { %v4627_v9 = vmax.f32 %v4625_v32, %v4626_v29  ;;  %v4660_v43 = vsel %vm2113_vm6, %v8749_v36, -inf  ;;  %v4456_v35 = vmul.f32 %v4448_v13, %v4440_v2  ;;  %v4618_v55 = vsel %vm2113_vm6, %v8754_v58, -inf  ;;  %7138 = vmatprep.mubr.msk.f32.mxu0 %vm2113_vm6, %v8731_v20 }
 0xb44   : > { %v4648_v48 = vmax.f32 %v4646_v6, %v4647_v3  ;;  %v4641_v49 = vmax.f32 %v4639_v47, %v4640_v4  ;;  %v4661_v50 = vrot.slane %v4660_v43, 4  ;;  %v8756_v46 = vmul.f32 %v4459_v15, %v4339_v11 }
 0xb45   : > { %v4628_v27 = vrot.slane %v4627_v9, 2  ;;  %v4613_v57 = vmax.f32 %v4611_v22, %v4612_v40  ;;  %v8763_v42 = vmul.f32 %v4456_v35, %v8711_v63  ;;  %v4619_v61 = vrot.slane %v4618_v55, 4 }
 0xb46   : > { %v4649_v33 = vrot.slane %v4648_v48, 2  ;;  %v4642_v19 = vrot.slane %v4641_v49, 2  ;;  %v4662_v18 = vmax.f32 %v4660_v43, %v4661_v50  ;;  %v4653_v13 = vsel %vm2113_vm6, %v8756_v46, -inf }
 0xb47   : > { %v4629_v21 = vmax.f32 %v4627_v9, %v4628_v27  ;;  %v4654_v60 = vrot.slane %v4653_v13, 4  ;;  %v4614_v5 = vrot.slane %v4613_v57, 2  ;;  %v4632_v63 = vsel %vm2113_vm6, %v8763_v42, -inf  ;;  %7139 = vmatmul.mubr.msk.f32.gmra.mxu0 %vm2113_vm6, %v8763_v42 }
 0xb48   : > { %v4650_v39 = vmax.f32 %v4648_v48, %v4649_v33  ;;  %v4643_v41 = vmax.f32 %v4641_v49, %v4642_v19  ;;  %v4663_v16 = vrot.slane %v4662_v18, 2  ;;  %v4620_v8 = vmax.f32 %v4618_v55, %v4619_v61  ;;  %7141 = vmatprep.mubr.msk.f32.mxu0 %vm2113_vm6, %v8737_v34 }
 0xb49   : > { %v4630_v17 = vrot.slane %v4629_v21, 1  ;;  %v4655_v10 = vmax.f32 %v4653_v13, %v4654_v60  ;;  %v4615_v0 = vmax.f32 %v4613_v57, %v4614_v5  ;;  %v4633_v25 = vrot.slane %v4632_v63, 4 }
 0xb4a   : > { %v4651_v24 = vrot.slane %v4650_v39, 1  ;;  %v4644_v7 = vrot.slane %v4643_v41, 1  ;;  %v4664_v38 = vmax.f32 %v4662_v18, %v4663_v16  ;;  %v4621_v31 = vrot.slane %v4620_v8, 2 }
 0xb4b   : > { %v4631_v11 = vmax.f32 %v4629_v21, %v4630_v17  ;;  %v4656_v26 = vrot.slane %v4655_v10, 2  ;;  %v4616_v56 = vrot.slane %v4615_v0, 1  ;;  %v4634_v22 = vmax.f32 %v4632_v63, %v4633_v25  ;;  %7142 = vmatmul.mubr.msk.f32.gmra.mxu0 %vm2113_vm6, %v8735_v12 }
 0xb4c   : > { %v4652_v23 = vmax.f32 %v4650_v39, %v4651_v24  ;;  %v4645_v32 = vmax.f32 %v4643_v41, %v4644_v7  ;;  %v4665_v59 = vrot.slane %v4664_v38, 1  ;;  %v4622_v47 = vmax.f32 %v4620_v8, %v4621_v31  ;;  %7144 = vmatprep.mubr.msk.f32.mxu0 %vm2113_vm6, %v8756_v46  ;;  %v6457_v41 = vld [vmem:[%s9344_s13 + $0x1] ss:$0 sm:$0xff] }
 0xb4d   : > { %v4669_v2 = vsub.f32 %v8731_v20, %v4631_v11  ;;  %v4657_v29 = vmax.f32 %v4655_v10, %v4656_v26  ;;  %v4617_v6 = vmax.f32 %v4615_v0, %v4616_v56  ;;  %v4635_v40 = vrot.slane %v4634_v22, 2 }
 0xb4e   : > { %v4672_v3 = vsub.f32 %v8735_v12, %v4652_v23  ;;  %v4671_v4 = vsub.f32 %v8737_v34, %v4645_v32  ;;  %v4666_v15 = vmax.f32 %v4664_v38, %v4665_v59  ;;  %v4623_v20 = vrot.slane %v4622_v47, 1 }
 0xb4f   : > { %v4679_v9 = vmul.f32 1.442695, %v4669_v2  ;;  %v4658_v43 = vrot.slane %v4657_v29, 1  ;;  %v4667_v35 = vsub.f32 %v8733_v62, %v4617_v6  ;;  %v4636_v27 = vmax.f32 %v4634_v22, %v4635_v40  ;;  %7145 = vmatmul.mubr.msk.f32.gmra.mxu0 %vm2113_vm6, %v8749_v36 }
 0xb50   : > { %v4685_v48 = vmul.f32 1.442695, %v4672_v3  ;;  %v4683_v49 = vmul.f32 1.442695, %v4671_v4  ;;  %v4674_v50 = vsub.f32 %v8749_v36, %v4666_v15  ;;  %v4624_v55 = vmax.f32 %v4622_v47, %v4623_v20  ;;  %7166 = vmatprep.mubr.msk.f32.mxu0 %vm7679_vm1, %v7678_v1 }
 0xb51   : > { %7435 = vpow2.f32 %v4679_v9  ;;  %v4659_v57 = vmax.f32 %v4657_v29, %v4658_v43  ;;  %v4675_v12 = vmul.f32 1.442695, %v4667_v35  ;;  %v4637_v33 = vrot.slane %v4636_v27, 1 }
 0xb52   : > { %7437 = vpow2.f32 %v4685_v48  ;;  %v4689_v34 = vmul.f32 1.442695, %v4674_v50  ;;  %v4668_v19 = vsub.f32 %v8754_v58, %v4624_v55  ;;  %v4202_v7 = vadd.f32 %v6457_v41, %v8729_v54 }
 0xb53   : > { %7439 = vpow2.f32 %v4683_v49  ;;  %v4673_v62 = vsub.f32 %v8756_v46, %v4659_v57  ;;  %v4638_v18 = vmax.f32 %v4636_v27, %v4637_v33 }
 0xb54   : > { %7441 = vpow2.f32 %v4689_v34  ;;  %v4677_v21 = vmul.f32 1.442695, %v4668_v19 }
 0xb55   : > { %v4687_v13 = vmul.f32 1.442695, %v4673_v62  ;;  %7443 = vpow2.f32 %v4675_v12  ;;  %v4670_v36 = vsub.f32 %v8763_v42, %v4638_v18 }
 0xb57   : > { %7445 = vpow2.f32 %v4687_v13  ;;  %v4681_v60 = vmul.f32 1.442695, %v4670_v36 }
 0xb58   : > { %7447 = vpow2.f32 %v4677_v21 }
 0xb59   : > { %7449 = vpow2.f32 %v4681_v60 }
 0xb5e   : > { %v7436_v5 = vpop.eup %7435 }
 0xb5f   : > { %v7438_v61 = vpop.eup %7437  ;;  %v4705_v39 = vsel %vm2113_vm6, %v7436_v5, 0.0  ;;  %v4749_v23 = vmul.f32 %v7436_v5, %v4202_v7 }
 0xb60   : > { %v7440_v16 = vpop.eup %7439  ;;  %v4706_v46 = vrot.slane %v4705_v39, 4  ;;  %v4726_v58 = vsel %vm2113_vm6, %v7438_v61, 0.0  ;;  %v4752_v34 = vmul.f32 %v7438_v61, %v4202_v7 }
 0xb61   : > { %v7442_v63 = vpop.eup %7441  ;;  %v4727_v17 = vrot.slane %v4726_v58, 4  ;;  %v4719_v10 = vsel %vm2113_vm6, %v7440_v16, 0.0  ;;  %v4769_v48 = vsel %vm2113_vm6, %v4749_v23, 0.0  ;;  %v4751_v18 = vmul.f32 %v7440_v16, %v4202_v7 }
 0xb62   : > { %v7444_v0 = vpop.eup %7443  ;;  %v4707_v8 = vadd.f32 %v4706_v46, %v4705_v39  ;;  %v4720_v24 = vrot.slane %v4719_v10, 4  ;;  %v4740_v42 = vsel %vm2113_vm6, %v7442_v63, 0.0  ;;  %v4754_v13 = vmul.f32 %v7442_v63, %v4202_v7 }
 0xb63   : > { %v4728_v38 = vadd.f32 %v4727_v17, %v4726_v58  ;;  %v4741_v25 = vrot.slane %v4740_v42, 4  ;;  %v4691_v11 = vsel %vm2113_vm6, %v7444_v0, 0.0  ;;  %v4747_v6 = vmul.f32 %v7444_v0, %v4202_v7 }
 0xb64   : > { %v7446_v26 = vpop.eup %7445  ;;  %v4708_v56 = vrot.slane %v4707_v8, 2  ;;  %v4721_v31 = vadd.f32 %v4720_v24, %v4719_v10  ;;  %v4692_v32 = vrot.slane %v4691_v11, 4  ;;  %v4770_v5 = vrot.slane %v4769_v48, 4 }
 0xb65   : > { %v7448_v59 = vpop.eup %7447  ;;  %v4729_v22 = vrot.slane %v4728_v38, 2  ;;  %v4742_v2 = vadd.f32 %v4741_v25, %v4740_v42  ;;  %v4733_v29 = vsel %vm2113_vm6, %v7446_v26, 0.0  ;;  %v4755_v57 = vsel %vm2113_vm6, %v4747_v6, 0.0 }
 0xb66   : > { %v4709_v47 = vadd.f32 %v4708_v56, %v4707_v8  ;;  %v4722_v3 = vrot.slane %v4721_v31, 2  ;;  %v4734_v4 = vrot.slane %v4733_v29, 4  ;;  %v4693_v15 = vadd.f32 %v4692_v32, %v4691_v11  ;;  %v7450_v33 = vpop.eup %7449 }
 0xb67   : > { %v4698_v54 = vsel %vm2113_vm6, %v7448_v59, 0.0  ;;  %v4730_v40 = vadd.f32 %v4729_v22, %v4728_v38  ;;  %v4743_v35 = vrot.slane %v4742_v2, 2  ;;  %v4756_v36 = vrot.slane %v4755_v57, 4 }
 0xb68   : > { %v4735_v9 = vadd.f32 %v4734_v4, %v4733_v29  ;;  %v4694_v43 = vrot.slane %v4693_v15, 2  ;;  %v4699_v20 = vrot.slane %v4698_v54, 4  ;;  %v4710_v49 = vrot.slane %v4709_v47, 1 }
 0xb69   : > { %v4723_v50 = vadd.f32 %v4722_v3, %v4721_v31  ;;  %v4731_v62 = vrot.slane %v4730_v40, 1  ;;  %v4744_v21 = vadd.f32 %v4743_v35, %v4742_v2  ;;  %v4753_v46 = vmul.f32 %v7446_v26, %v4202_v7 }
 0xb6a   : > { %v4695_v27 = vadd.f32 %v4694_v43, %v4693_v15  ;;  %v4736_v12 = vrot.slane %v4735_v9, 2  ;;  %v4700_v55 = vadd.f32 %v4699_v20, %v4698_v54  ;;  %v4711_v39 = vadd.f32 %v4710_v49, %v4709_v47 }
 0xb6b   : > { %v4724_v41 = vrot.slane %v4723_v50, 1  ;;  %v4748_v58 = vmul.f32 %v7448_v59, %v4202_v7  ;;  %v4712_v0 = vsel %vm2113_vm6, %v7450_v33, 0.0  ;;  %v4750_v8 = vmul.f32 %v7450_v33, %v4202_v7 }
 0xb6c   : > { %v4696_v19 = vrot.slane %v4695_v27, 1  ;;  %v4701_v60 = vrot.slane %v4700_v55, 2  ;;  %v4737_v17 = vadd.f32 %v4736_v12, %v4735_v9  ;;  %v4732_v24 = vadd.f32 %v4731_v62, %v4730_v40 }
 0xb6d   : > { %v4713_v42 = vrot.slane %v4712_v0, 4  ;;  %v4762_v38 = vsel %vm2113_vm6, %v4748_v58, 0.0  ;;  %v4745_v16 = vrot.slane %v4744_v21, 1  ;;  %v4757_v63 = vadd.f32 %v4756_v36, %v4755_v57 }
 0xb6e   : > { %v4702_v10 = vadd.f32 %v4701_v60, %v4700_v55  ;;  %v4697_v61 = vadd.f32 %v4696_v19, %v4695_v27  ;;  %v4763_v11 = vrot.slane %v4762_v38, 4  ;;  %7451 = vrcp.f32 %v4711_v39 }
 0xb6f   : > { %v4714_v56 = vadd.f32 %v4713_v42, %v4712_v0  ;;  %v4776_v31 = vsel %vm2113_vm6, %v4750_v8, 0.0  ;;  %v4783_v26 = vsel %vm2113_vm6, %v4751_v18, 0.0  ;;  %v4738_v23 = vrot.slane %v4737_v17, 1 }
 0xb70   : > { %v4703_v25 = vrot.slane %v4702_v10, 1  ;;  %v4764_v59 = vadd.f32 %v4763_v11, %v4762_v38  ;;  %v4771_v22 = vadd.f32 %v4770_v5, %v4769_v48  ;;  %7453 = vrcp.f32 %v4697_v61 }
 0xb71   : > { %v4715_v7 = vrot.slane %v4714_v56, 2  ;;  %v4777_v2 = vrot.slane %v4776_v31, 4  ;;  %v4790_v29 = vsel %vm2113_vm6, %v4752_v34, 0.0  ;;  %v4725_v6 = vadd.f32 %v4724_v41, %v4723_v50 }
 0xb72   : > { %v4704_v32 = vadd.f32 %v4703_v25, %v4702_v10  ;;  %v4765_v47 = vrot.slane %v4764_v59, 2  ;;  %v4784_v3 = vrot.slane %v4783_v26, 4  ;;  %v4758_v4 = vrot.slane %v4757_v63, 2 }
 0xb73   : > { %v4716_v15 = vadd.f32 %v4715_v7, %v4714_v56  ;;  %v4791_v54 = vrot.slane %v4790_v29, 4  ;;  %v4797_v40 = vsel %vm2113_vm6, %v4753_v46, 0.0  ;;  %v4739_v9 = vadd.f32 %v4738_v23, %v4737_v17 }
 0xb74   : > { %7455 = vrcp.f32 %v4704_v32  ;;  %v4772_v43 = vrot.slane %v4771_v22, 2  ;;  %v4798_v35 = vrot.slane %v4797_v40, 4  ;;  %v4746_v20 = vadd.f32 %v4745_v16, %v4744_v21 }
 0xb75   : > { %7457 = vrcp.f32 %v4732_v24  ;;  %v4717_v48 = vrot.slane %v4716_v15, 1  ;;  %v4778_v49 = vadd.f32 %v4777_v2, %v4776_v31  ;;  %v4804_v27 = vsel %vm2113_vm6, %v4754_v13, 0.0 }
 0xb76   : > { %7459 = vrcp.f32 %v4725_v6  ;;  %v4766_v57 = vadd.f32 %v4765_v47, %v4764_v59  ;;  %v4785_v50 = vadd.f32 %v4784_v3, %v4783_v26  ;;  %v4799_v12 = vadd.f32 %v4798_v35, %v4797_v40 }
 0xb77   : > { %v4718_v55 = vadd.f32 %v4717_v48, %v4716_v15  ;;  %v4759_v34 = vadd.f32 %v4758_v4, %v4757_v63  ;;  %v4792_v33 = vadd.f32 %v4791_v54, %v4790_v29  ;;  %v4805_v62 = vrot.slane %v4804_v27, 4 }
 0xb78   : > { %7461 = vrcp.f32 %v4739_v9  ;;  %v4773_v19 = vadd.f32 %v4772_v43, %v4771_v22  ;;  %v4779_v18 = vrot.slane %v4778_v49, 2  ;;  %v4767_v60 = vrot.slane %v4766_v57, 1 }
 0xb79   : > { %7463 = vrcp.f32 %v4718_v55  ;;  %v4806_v36 = vadd.f32 %v4805_v62, %v4804_v27  ;;  %v4786_v5 = vrot.slane %v4785_v50, 2  ;;  %v4800_v21 = vrot.slane %v4799_v12, 2 }
 0xb7a   : > { %v4760_v39 = vrot.slane %v4759_v34, 1  ;;  %v4793_v41 = vrot.slane %v4792_v33, 2  ;;  %7465 = vrcp.f32 %v4746_v20  ;;  %v4774_v46 = vrot.slane %v4773_v19, 1 }
 0xb7b   : > { %v7452_v13 = vpop.eup %7451  ;;  %v4780_v58 = vadd.f32 %v4779_v18, %v4778_v49  ;;  %v4807_v17 = vrot.slane %v4806_v36, 2  ;;  %v4768_v0 = vadd.f32 %v4767_v60, %v4766_v57  ;;  %v4787_v8 = vadd.f32 %v4786_v5, %v4785_v50 }
 0xb7c   : > { %v4801_v24 = vadd.f32 %v4800_v21, %v4799_v12  ;;  %v4761_v42 = vadd.f32 %v4760_v39, %v4759_v34  ;;  %v4794_v38 = vadd.f32 %v4793_v41, %v4792_v33  ;;  %v4775_v16 = vadd.f32 %v4774_v46, %v4773_v19  ;;  %v6478_v34 = vld [vmem:[%s9345_s14 + $0x1] ss:$0 sm:$0xff] }
 0xb7d   : > { %v7454_v10 = vpop.eup %7453  ;;  %v4781_v11 = vrot.slane %v4780_v58, 1  ;;  %v4808_v56 = vadd.f32 %v4807_v17, %v4806_v36  ;;  %v4788_v26 = vrot.slane %v4787_v8, 1 }
 0xb7e   : > { %v4812_v31 = vmul.f32 %v7454_v10, %v4761_v42  ;;  %v4802_v23 = vrot.slane %v4801_v24, 1  ;;  %v4816_v32 = vmul.f32 %v7452_v13, %v4775_v16  ;;  %v4795_v22 = vrot.slane %v4794_v38, 1 }
 0xb7f   : > { %v4782_v29 = vadd.f32 %v4781_v11, %v4780_v58  ;;  %v4809_v6 = vrot.slane %v4808_v56, 1  ;;  %v4789_v3 = vadd.f32 %v4788_v26, %v4787_v8 }
 0xb80   : > { %v4803_v4 = vadd.f32 %v4802_v23, %v4801_v24  ;;  %v4796_v54 = vadd.f32 %v4795_v22, %v4794_v38 }
 0xb81   : > { %v7456_v61 = vpop.eup %7455  ;;  %v4810_v20 = vadd.f32 %v4809_v6, %v4808_v56 }
 0xb82   : > { %v4814_v63 = vmul.f32 %v7456_v61, %v4768_v0  ;;  %v7458_v25 = vpop.eup %7457 }
 0xb83   : > { %v7460_v59 = vpop.eup %7459  ;;  %v4822_v48 = vmul.f32 %v7458_v25, %v4796_v54 }
 0xb84   : > { %v4848_v7 = vsel %vm3026_vm7, %v4814_v63, %v4812_v31  ;;  %v4820_v43 = vmul.f32 %v7460_v59, %v4789_v3 }
 0xb85   : > { %v7462_v2 = vpop.eup %7461  ;;  %v4849_v15 = vsel %vm3028_vm8, %v4816_v32, %v4848_v7 }
 0xb86   : > { %v7464_v47 = vpop.eup %7463  ;;  %v4824_v35 = vmul.f32 %v7462_v2, %v4803_v4 }
 0xb87   : > { %v4818_v40 = vmul.f32 %v7464_v47, %v4782_v29  ;;  %v7466_v9 = vpop.eup %7465 }
 0xb88   : > { %v4826_v57 = vmul.f32 %v7466_v9, %v4810_v20 }
 0xb89   : > { %v4850_v49 = vsel %vm3030_vm9, %v4818_v40, %v4849_v15 }
 0xb8a   : > { %v4851_v27 = vsel %vm3032_vm10, %v4820_v43, %v4850_v49 }
 0xb8b   : > { %v4852_v50 = vsel %vm3034_vm11, %v4822_v48, %v4851_v27 }
 0xb8c   : > { %v4853_v12 = vsel %vm3036_vm12, %v4824_v35, %v4852_v50 }
 0xb8d   : > { %v4854_v55 = vsel %vm3038_vm13, %v4826_v57, %v4853_v12 }
 0xb8e   : > { %7156 = vmatmul.mubr.msk.f32.vlgmr.msra.gmra.mxu1 %vm2113_vm6, %v4854_v55 }
 0xb8f   : > { %7185 = vmatprep.mubr.msk.f32.mxu1 %vm7679_vm1, %v7678_v1 }
 0xc02   : > { %v7137_v33 = vpop.f32.mrf.mxu0 }
 0xc03   : > { %v4578_v62 = vadd.f32 %v7137_v33, %v6478_v34 }
 0xc04   : > { %v4572_v19 = vpop.f32.mrf.mxu0 }
 0xc05   : > { %v4573_v18 = vadd.f32 %v6478_v34, %v4572_v19 }
 0xc07   : > { %v7140_v36 = vpop.f32.mrf.mxu0  ;;  %v4959_v5 = vadd.f32 %v4573_v18, %v8605_v52 }
 0xc08   : > { %v4588_v60 = vadd.f32 %v7140_v36, %v6478_v34 }
 0xc09   : > { %v4582_v21 = vpop.f32.mrf.mxu0  ;;  %v4971_v41 = vsel %vm2113_vm6, %v4959_v5, 0.0 }
 0xc0a   : > { %v4583_v39 = vadd.f32 %v6478_v34, %v4582_v21  ;;  %4972 = vadd.xlane.f32.xlu1 %v4971_v41  ;;  %v4962_v32 = vadd.f32 %v4588_v60, %v8642_v37 }
 0xc0b   : > { %v7143_v13 = vpop.f32.mrf.mxu0 }
 0xc0c   : > { %v4598_v46 = vadd.f32 %v7143_v13, %v6478_v34  ;;  %v4961_v58 = vadd.f32 %v4583_v39, %v8638_v53  ;;  %v6492_v53 = vld [vmem:[%s9346_s17 + $0x1] ss:$0 sm:$0xff] }
 0xc0d   : > { %v4592_v17 = vpop.f32.mrf.mxu0 }
 0xc0e   : > { %v4593_v10 = vadd.f32 %v6478_v34, %v4592_v17  ;;  %v4977_v0 = vsel %vm2113_vm6, %v4961_v58, 0.0  ;;  %v4964_v59 = vadd.f32 %v4598_v46, %v8663_v14 }
 0xc0f   : > { %4978 = vadd.xlane.f32.xlu1 %v4977_v0  ;;  %v7146_v8 = vpop.f32.mrf.mxu0 }
 0xc10   : > { %v4608_v24 = vadd.f32 %v7146_v8, %v6478_v34  ;;  %v4963_v61 = vadd.f32 %v4593_v10, %v8656_v45  ;;  %v4960_v45 = vadd.f32 %v4578_v62, %v8614_v51  ;;  %v4986_v22 = vsel %vm2113_vm6, %v4964_v59, 0.0 }
 0xc11   : > { %v4602_v52 = vpop.f32.mrf.mxu0 }
 0xc12   : > { %v4603_v42 = vadd.f32 %v6478_v34, %v4602_v52  ;;  %v4983_v38 = vsel %vm2113_vm6, %v4963_v61, 0.0  ;;  %v4974_v23 = vsel %vm2113_vm6, %v4960_v45, 0.0  ;;  %v4966_v7 = vadd.f32 %v4608_v24, %v8683_v28 }
 0xc13   : > { %4984 = vadd.xlane.f32.xlu1 %v4983_v38  ;;  %v6504_v38 = vld [vmem:[%s9347_s21 + $0x30] sm:$0xff] }
 0xc14   : > { %v4965_v16 = vadd.f32 %v4603_v42, %v8675_v44  ;;  %v4980_v44 = vsel %vm2113_vm6, %v4962_v32, 0.0  ;;  %v6505_v42 = vld [vmem:[%s9347_s21 + $0x38] sm:$0xff] }
 0xc15   : > { %7159 = vmatpush3.msra.mxu0 %v6505_v42  ;;  %v6521_v42 = vld [vmem:[%s9353_s16 + $0x28] sm:$0xff] }
 0xc16   : > { %v4989_v63 = vsel %vm2113_vm6, %v4965_v16, 0.0  ;;  %7160 = vmatprep.subr.mxu0 %v7678_v1 }
 0xc17   : > { %4990 = vadd.xlane.f32.xlu1 %v4989_v63  ;;  %7161 = vmatpush3.msra.mxu0 %v6504_v38  ;;  %v6502_v63 = vld [vmem:[%s9347_s21 + $0x20] sm:$0xff] }
 0xc18   : > { %7162 = vmatprep.subr.mxu0 %v7678_v1 }
 0xc4e   : > { %v4923_v25 = vpop.f32.mrf.mxu1 }
 0xc4f   : > { %v4924_v11 = vadd.f32 %v6492_v53, %v4923_v25  ;;  %v8891_v53 = vld [vmem:[%s9353_s16 + $0x38] sm:$0xff] }
 0xc50   : > { %v7157_v56 = vpop.f32.mrf.mxu1  ;;  %v6516_v25 = vld [vmem:[%s9355_s20 + $0x78] sm:$0xff] }
 0xc51   : > { %v4927_v31 = vadd.f32 %v4924_v11, %v8623_v30  ;;  %v4992_v30 = vsel %vm2113_vm6, %v4966_v7, 0.0  ;;  %v6515_v11 = vld [vmem:[%s9355_s20 + $0x70] sm:$0xff]  ;;  %7170 = vmatpush3.msra.mxu1 %v6516_v25  ;;  %v6514_v56 = vld [vmem:[%s9355_s20 + $0x68] sm:$0xff] }
 0xc52   : > { %7171 = vmatprep.subr.mxu1 %v7678_v1 }
 0xc53   : > { %v4932_v26 = vsel %vm2113_vm6, %v4927_v31, 0.0  ;;  %7172 = vmatpush3.msra.mxu1 %v6515_v11 }
 0xc54   : > { %4933 = vadd.xlane.f32.xlu0 %v4932_v26  ;;  %7173 = vmatprep.subr.mxu1 %v7678_v1  ;;  %v6512_v26 = vld [vmem:[%s9355_s20 + $0x58] sm:$0xff] }
 0xc55   : > { %7174 = vmatpush3.msra.mxu1 %v6514_v56  ;;  %v6541_v56 = vld [vmem:[%s9357_s6 + $0x78] sm:$0xff] }
 0xc56   : > { %7175 = vmatprep.subr.mxu1 %v7678_v1 }
 0xc58   : > { %4975 = vadd.xlane.f32.xlu0 %v4974_v23 }
 0xc5c   : > { %4981 = vadd.xlane.f32.xlu0 %v4980_v44 }
 0xc60   : > { %4987 = vadd.xlane.f32.xlu0 %v4986_v22 }
 0xc64   : > { %4993 = vadd.xlane.f32.xlu0 %v4992_v30 }
 0xc93   : > { %v4973_v51 = vpop.xlane.xlu1 %4972 }
 0xc94   : > { %v4995_v2 = vmul.f32 0.03125, %v4973_v51 }
 0xc96   : > { %v8839_v29 = vsub.f32 %v4959_v5, %v4995_v2 }
 0xc98   : > { %v4979_v6 = vpop.xlane.xlu1 %4978  ;;  %v5011_v47 = vmul.f32 %v8839_v29, %v8839_v29 }
 0xc99   : > { %v4997_v37 = vmul.f32 0.03125, %v4979_v6 }
 0xc9a   : > { %v5019_v14 = vsel %vm2113_vm6, %v5011_v47, 0.0 }
 0xc9b   : > { %v8843_v3 = vsub.f32 %v4961_v58, %v4997_v37  ;;  %5020 = vadd.xlane.f32.xlu0 %v5019_v14 }
 0xc9c   : > { %v4985_v4 = vpop.xlane.xlu1 %4984 }
 0xc9d   : > { %v4999_v28 = vmul.f32 0.03125, %v4985_v4  ;;  %v5013_v15 = vmul.f32 %v8843_v3, %v8843_v3 }
 0xc9f   : > { %v8848_v54 = vsub.f32 %v4963_v61, %v4999_v28  ;;  %v5025_v40 = vsel %vm2113_vm6, %v5013_v15, 0.0 }
 0xca0   : > { %5026 = vadd.xlane.f32.xlu0 %v5025_v40  ;;  %v4991_v9 = vpop.xlane.xlu1 %4990 }
 0xca1   : > { %v5001_v43 = vmul.f32 0.03125, %v4991_v9  ;;  %v5015_v35 = vmul.f32 %v8848_v54, %v8848_v54 }
 0xca3   : > { %v8853_v20 = vsub.f32 %v4965_v16, %v5001_v43  ;;  %v5031_v48 = vsel %vm2113_vm6, %v5015_v35, 0.0  ;;  %v6503_v16 = vld [vmem:[%s9347_s21 + $0x28] sm:$0xff] }
 0xca4   : > { %5032 = vadd.xlane.f32.xlu0 %v5031_v48  ;;  %7163 = vmatpush3.msra.mxu0 %v6503_v16  ;;  %v6520_v16 = vld [vmem:[%s9353_s16 + $0x20] sm:$0xff] }
 0xca5   : > { %v5017_v49 = vmul.f32 %v8853_v20, %v8853_v20  ;;  %7164 = vmatprep.subr.mxu0 %v7678_v1 }
 0xca6   : > { %7165 = vmatpush3.msra.mxu0 %v6502_v63 }
 0xca7   : > { %v5037_v27 = vsel %vm2113_vm6, %v5017_v49, 0.0  ;;  %7188 = vmatprep.subr.mxu0 %v8891_v53 }
 0xca8   : > { %5038 = vadd.xlane.f32.xlu0 %v5037_v27 }
 0xcdd   : > { %v4934_v57 = vpop.xlane.xlu0 %4933 }
 0xcde   : > { %v4935_v50 = vmul.f32 0.03125, %v4934_v57 }
 0xce0   : > { %v8859_v12 = vsub.f32 %v4927_v31, %v4935_v50  ;;  %v6513_v31 = vld [vmem:[%s9355_s20 + $0x60] sm:$0xff] }
 0xce1   : > { %v4976_v55 = vpop.xlane.xlu0 %4975  ;;  %7176 = vmatpush3.msra.mxu1 %v6513_v31 }
 0xce2   : > { %v4996_v34 = vmul.f32 0.03125, %v4976_v55  ;;  %v4937_v33 = vmul.f32 %v8859_v12, %v8859_v12  ;;  %7177 = vmatprep.subr.mxu1 %v7678_v1 }
 0xce3   : > { %7178 = vmatpush3.msra.mxu1 %v6512_v26 }
 0xce4   : > { %v8863_v62 = vsub.f32 %v4960_v45, %v4996_v34  ;;  %v4938_v19 = vsel %vm2113_vm6, %v4937_v33, 0.0  ;;  %7179 = vmatprep.subr.mxu1 %v7678_v1  ;;  %v6500_v33 = vld [vmem:[%s9348_s25 + $0x1] ss:$0 sm:$0xff] }
 0xce5   : > { %v4982_v18 = vpop.xlane.xlu0 %4981  ;;  %4939 = vadd.xlane.f32.xlu1 %v4938_v19 }
 0xce6   : > { %v4998_v36 = vmul.f32 0.03125, %v4982_v18  ;;  %v5012_v60 = vmul.f32 %v8863_v62, %v8863_v62  ;;  %v6496_v18 = vld [vmem:[%s9349_s29 + $0x1] ss:$0 sm:$0xff] }
 0xce8   : > { %v8868_v5 = vsub.f32 %v4962_v32, %v4998_v36  ;;  %v5022_v21 = vsel %vm2113_vm6, %v5012_v60, 0.0 }
 0xce9   : > { %v4988_v39 = vpop.xlane.xlu0 %4987  ;;  %5023 = vadd.xlane.f32.xlu1 %v5022_v21  ;;  %v6497_v21 = vld [vmem:[%s9350_s11 + $0x1] ss:$0 sm:$0xff]  ;;  %s7543_s11 = sshll.u32 %s7681_s10, 4  ;;  %s7544_s11 = int_to_ptr.vmem [resolvable:$false] %s7543_s11 }
 0xcea   : > { %v5000_v41 = vmul.f32 0.03125, %v4988_v39  ;;  %v5014_v13 = vmul.f32 %v8868_v5, %v8868_v5  ;;  %s7545_s12 = scalar_lea.vmem %s7544_s11, 256 }
 0xcec   : > { %v8873_v46 = vsub.f32 %v4964_v59, %v5000_v41  ;;  %v5028_v58 = vsel %vm2113_vm6, %v5014_v13, 0.0 }
 0xced   : > { %v4994_v17 = vpop.xlane.xlu0 %4993  ;;  %5029 = vadd.xlane.f32.xlu1 %v5028_v58  ;;  %v6501_v58 = vld [vmem:[%s9352_s2 + $0x1] ss:$0 sm:$0xff] }
 0xcee   : > { %v5002_v10 = vmul.f32 0.03125, %v4994_v17  ;;  %v5016_v0 = vmul.f32 %v8873_v46, %v8873_v46 }
 0xcf0   : > { %v8878_v8 = vsub.f32 %v4966_v7, %v5002_v10  ;;  %v5034_v24 = vsel %vm2113_vm6, %v5016_v0, 0.0  ;;  %v6522_v0 = vld [vmem:[%s9353_s16 + $0x30] sm:$0xff] }
 0xcf1   : > { %5035 = vadd.xlane.f32.xlu1 %v5034_v24 }
 0xcf2   : > { %v5018_v61 = vmul.f32 %v8878_v8, %v8878_v8 }
 0xcf4   : > { %v5040_v52 = vsel %vm2113_vm6, %v5018_v61, 0.0 }
 0xcf5   : > { %5041 = vadd.xlane.f32.xlu1 %v5040_v52 }
 0xd24   : > { %v5021_v45 = vpop.xlane.xlu0 %5020 }
 0xd25   : > { %v5043_v23 = vmul.f32 0.03125, %v5021_v45 }
 0xd27   : > { %v5051_v44 = vadd.f32 1e-05, %v5043_v23 }
 0xd29   : > { %v5027_v32 = vpop.xlane.xlu0 %5026  ;;  %7467 = vrsqrt.f32 %v5051_v44 }
 0xd2a   : > { %v5045_v22 = vmul.f32 0.03125, %v5027_v32 }
 0xd2c   : > { %v5053_v2 = vadd.f32 1e-05, %v5045_v22 }
 0xd2d   : > { %v5033_v59 = vpop.xlane.xlu0 %5032 }
 0xd2e   : > { %v5047_v6 = vmul.f32 0.03125, %v5033_v59 }
 0xd30   : > { %v5055_v28 = vadd.f32 1e-05, %v5047_v6  ;;  %v6510_v6 = vld [vmem:[%s9355_s20 + $0x48] sm:$0xff] }
 0xd31   : > { %v5039_v47 = vpop.xlane.xlu0 %5038 }
 0xd32   : > { %v5049_v15 = vmul.f32 0.03125, %v5039_v47  ;;  %v6509_v47 = vld [vmem:[%s9355_s20 + $0x40] sm:$0xff] }
 0xd34   : > { %v5057_v35 = vadd.f32 1e-05, %v5049_v15  ;;  %v6535_v15 = vld [vmem:[%s9357_s6 + $0x48] sm:$0xff] }
 0xd36   : > { %v7468_v49 = vpop.eup %7467 }
 0xd37   : > { %v5067_v55 = vmul.f32 %v7468_v49, %v8839_v29 }
 0xd39   : > { %v5081_v39 = vmul.f32 %v6500_v33, %v5067_v55 }
 0xd3b   : > { %v8915_v24 = vadd.f32 %v6501_v58, %v5081_v39 }
 0xd6e   : > { %v4940_v7 = vpop.xlane.xlu1 %4939 }
 0xd6f   : > { %v4941_v30 = vmul.f32 0.03125, %v4940_v7 }
 0xd71   : > { %v4942_v51 = vadd.f32 1e-05, %v4941_v30 }
 0xd72   : > { %v5024_v37 = vpop.xlane.xlu1 %5023 }
 0xd73   : > { %7469 = vrsqrt.f32 %v4942_v51  ;;  %v5044_v14 = vmul.f32 0.03125, %v5024_v37  ;;  %v6511_v51 = vld [vmem:[%s9355_s20 + $0x50] sm:$0xff]  ;;  %v6539_v37 = vld [vmem:[%s9357_s6 + $0x68] sm:$0xff] }
 0xd74   : > { %7471 = vrsqrt.f32 %v5053_v2  ;;  %v6540_v2 = vld [vmem:[%s9357_s6 + $0x70] sm:$0xff]  ;;  %7180 = vmatpush3.msra.mxu1 %v6511_v51 }
 0xd75   : > { %v5052_v4 = vadd.f32 1e-05, %v5044_v14  ;;  %7181 = vmatprep.subr.mxu1 %v7678_v1  ;;  %v6538_v14 = vld [vmem:[%s9357_s6 + $0x60] sm:$0xff] }
 0xd76   : > { %v5030_v40 = vpop.xlane.xlu1 %5029  ;;  %7182 = vmatpush3.msra.mxu1 %v6510_v6 }
 0xd77   : > { %7473 = vrsqrt.f32 %v5052_v4  ;;  %v5046_v9 = vmul.f32 0.03125, %v5030_v40  ;;  %7183 = vmatprep.subr.mxu1 %v7678_v1  ;;  %v6537_v4 = vld [vmem:[%s9357_s6 + $0x58] sm:$0xff]  ;;  %v6534_v40 = vld [vmem:[%s9357_s6 + $0x40] sm:$0xff] }
 0xd78   : > { %7475 = vrsqrt.f32 %v5055_v28  ;;  %7184 = vmatpush3.msra.mxu1 %v6509_v47  ;;  %v6536_v28 = vld [vmem:[%s9357_s6 + $0x50] sm:$0xff] }
 0xd79   : > { %v5054_v43 = vadd.f32 1e-05, %v5046_v9  ;;  %7236 = vmatprep.subr.mxu1 %v7678_v1  ;;  %v6507_v9 = vld [vmem:[%s9359_s18 + $0x1] ss:$0 sm:$0xff] }
 0xd7a   : > { %v5036_v48 = vpop.xlane.xlu1 %5035 }
 0xd7b   : > { %7477 = vrsqrt.f32 %v5054_v43  ;;  %v5048_v27 = vmul.f32 0.03125, %v5036_v48 }
 0xd7c   : > { %7479 = vrsqrt.f32 %v5057_v35 }
 0xd7d   : > { %v5056_v57 = vadd.f32 1e-05, %v5048_v27  ;;  %v6525_v27 = vld [vmem:[%s9361_s4 + $0x1] ss:$0 sm:$0xff] }
 0xd7e   : > { %v5042_v50 = vpop.xlane.xlu1 %5041 }
 0xd7f   : > { %7481 = vrsqrt.f32 %v5056_v57  ;;  %v5050_v34 = vmul.f32 0.03125, %v5042_v50 }
 0xd80   : > { %v7470_v19 = vpop.eup %7469 }
 0xd81   : > { %v4944_v36 = vmul.f32 %v7470_v19, %v8859_v12  ;;  %v5058_v60 = vadd.f32 1e-05, %v5050_v34  ;;  %v7472_v41 = vpop.eup %7471 }
 0xd82   : > { %v5069_v61 = vmul.f32 %v7472_v41, %v8843_v3 }
 0xd83   : > { %v4951_v13 = vmul.f32 %v6496_v18, %v4944_v36  ;;  %7483 = vrsqrt.f32 %v5058_v60 }
 0xd84   : > { %v7474_v17 = vpop.eup %7473  ;;  %v5083_v63 = vmul.f32 %v6500_v33, %v5069_v61 }
 0xd85   : > { %v5068_v29 = vmul.f32 %v7474_v17, %v8863_v62  ;;  %v8912_v10 = vadd.f32 %v6497_v21, %v4951_v13  ;;  %v7476_v12 = vpop.eup %7475 }
 0xd86   : > { %v5071_v3 = vmul.f32 %v7476_v12, %v8848_v54  ;;  %v8931_v45 = vadd.f32 %v6501_v58, %v5083_v63  ;;  %v6518_v63 = vld [vmem:[%s9363_s15 + $0x1] ss:$0 sm:$0xff] }
 0xd87   : > { %7167 = vmatmul.mubr.msk.f32.vlgmr.msra.gmra.mxu0 %vm2113_vm6, %v8912_v10  ;;  %v5082_v62 = vmul.f32 %v6500_v33, %v5068_v29 }
 0xd88   : > { %v7478_v52 = vpop.eup %7477  ;;  %7189 = vmatpush3.msra.mxu0 %v8891_v53  ;;  %7196 = vmatprep.mubr.msk.f32.mxu0 %vm2113_vm6, %v8915_v24 }
 0xd89   : > { %7190 = vmatprep.subr.mxu0 %v6522_v0  ;;  %v5070_v38 = vmul.f32 %v7478_v52, %v8868_v5  ;;  %v7480_v25 = vpop.eup %7479  ;;  %v8928_v53 = vadd.f32 %v6501_v58, %v5082_v62  ;;  %v5085_v5 = vmul.f32 %v6500_v33, %v5071_v3 }
 0xd8a   : > { %7191 = vmatpush3.msra.mxu0 %v6522_v0  ;;  %v5073_v23 = vmul.f32 %v7480_v25, %v8853_v20 }
 0xd8b   : > { %7192 = vmatprep.subr.mxu0 %v6521_v42  ;;  %v5084_v31 = vmul.f32 %v6500_v33, %v5070_v38  ;;  %v8941_v59 = vadd.f32 %v6501_v58, %v5085_v5 }
 0xd8c   : > { %v7482_v11 = vpop.eup %7481  ;;  %7193 = vmatpush3.msra.mxu0 %v6521_v42  ;;  %v5087_v20 = vmul.f32 %v6500_v33, %v5073_v23 }
 0xd8d   : > { %7194 = vmatprep.subr.mxu0 %v6520_v16  ;;  %v5072_v26 = vmul.f32 %v7482_v11, %v8873_v46  ;;  %v8938_v32 = vadd.f32 %v6501_v58, %v5084_v31 }
 0xd8e   : > { %7195 = vmatpush3.msra.mxu0 %v6520_v16  ;;  %v8949_v30 = vadd.f32 %v6501_v58, %v5087_v20 }
 0xd8f   : > { %7197 = vmatmul.mubr.msk.f32.vlgmr.msra.gmra.mxu0 %vm2113_vm6, %v8928_v53  ;;  %7208 = vmatprep.subr.mxu0 %v6541_v56  ;;  %v5086_v46 = vmul.f32 %v6500_v33, %v5072_v26  ;;  %v6543_v26 = vld [vmem:[%s9372_s22 + $0x1] ss:$0 sm:$0xff]  ;;  %s9375_s22 = sld [smem:[#allocation47_spill]] }
 0xd90   : > { %v7484_v54 = vpop.eup %7483  ;;  %7199 = vmatprep.mubr.msk.f32.mxu0 %vm2113_vm6, %v8931_v45  ;;  %7209 = vmatpush3.msra.mxu0 %v6541_v56 }
 0xd91   : > { %v5074_v44 = vmul.f32 %v7484_v54, %v8878_v8  ;;  %v8947_v22 = vadd.f32 %v6501_v58, %v5086_v46  ;;  %7210 = vmatprep.subr.mxu0 %v6540_v2 }
 0xd92   : > { %7211 = vmatpush3.msra.mxu0 %v6540_v2 }
 0xd93   : > { %7200 = vmatmul.mubr.msk.f32.gmra.mxu0 %vm2113_vm6, %v8938_v32  ;;  %v5088_v7 = vmul.f32 %v6500_v33, %v5074_v44  ;;  %7212 = vmatprep.subr.mxu0 %v6539_v37 }
 0xd94   : > { %7202 = vmatprep.mubr.msk.f32.mxu0 %vm2113_vm6, %v8941_v59  ;;  %7213 = vmatpush3.msra.mxu0 %v6539_v37 }
 0xd95   : > { %v8955_v8 = vadd.f32 %v6501_v58, %v5088_v7  ;;  %7214 = vmatprep.subr.mxu0 %v6538_v14  ;;  %s9376_s2 = smov %s9375_s22 }
 0xd96   : > { %7215 = vmatpush3.msra.mxu0 %v6538_v14 }
 0xd97   : > { %7203 = vmatmul.mubr.msk.f32.gmra.mxu0 %vm2113_vm6, %v8947_v22  ;;  %7216 = vmatprep.subr.mxu0 %v6537_v4 }
 0xd98   : > { %7205 = vmatprep.mubr.msk.f32.mxu0 %vm2113_vm6, %v8949_v30  ;;  %7217 = vmatpush3.msra.mxu0 %v6537_v4 }
 0xd99   : > { %7218 = vmatprep.subr.mxu0 %v6536_v28 }
 0xd9a   : > { %7219 = vmatpush3.msra.mxu0 %v6536_v28 }
 0xd9b   : > { %7206 = vmatmul.mubr.msk.f32.gmra.mxu0 %vm2113_vm6, %v8955_v8  ;;  %7220 = vmatprep.subr.mxu0 %v6535_v15 }
 0xd9c   : > { %7221 = vmatpush3.msra.mxu0 %v6535_v15 }
 0xd9d   : > { %7222 = vmatprep.subr.mxu0 %v6534_v40 }
 0xd9e   : > { %7223 = vmatpush3.msra.mxu0 %v6534_v40 }
 0xe47   : > { %v5185_v43 = vpop.f32.mrf.mxu0 }
 0xe48   : > { %v5186_v35 = vadd.f32 %v6507_v9, %v5185_v43 }
 0xe49   : > { %v7168_v48 = vpop.f32.mrf.mxu0 }
 0xe4a   : > { %v5189_v49 = vmax.f32 %v5186_v35, 0.0 }
 0xe4c   : > { %7186 = vmatmul.mubr.msk.f32.vlgmr.msra.gmra.mxu1 %vm1574_vm5, %v5189_v49 }
 0xe4d   : > { %7244 = vmatprep.mubr.msk.f32.mxu1 %vm7679_vm1, %v7678_v1 }
 0xe4f   : > { %v7198_v57 = vpop.f32.mrf.mxu0 }
 0xe50   : > { %v5389_v50 = vadd.f32 %v7198_v57, %v6525_v27 }
 0xe51   : > { %v5383_v55 = vpop.f32.mrf.mxu0 }
 0xe52   : > { %v5384_v34 = vadd.f32 %v6525_v27, %v5383_v55  ;;  %v5423_v18 = vmax.f32 %v5389_v50, 0.0 }
 0xe53   : > { %v7201_v33 = vpop.f32.mrf.mxu0 }
 0xe54   : > { %v5422_v19 = vmax.f32 %v5384_v34, 0.0  ;;  %v5399_v36 = vadd.f32 %v7201_v33, %v6525_v27 }
 0xe55   : > { %v5393_v60 = vpop.f32.mrf.mxu0 }
 0xe56   : > { %v5394_v21 = vadd.f32 %v6525_v27, %v5393_v60  ;;  %7224 = vmatprep.mubr.msk.f32.mxu0 %vm1574_vm5, %v5422_v19  ;;  %v5425_v13 = vmax.f32 %v5399_v36, 0.0 }
 0xe57   : > { %v7204_v39 = vpop.f32.mrf.mxu0  ;;  %7225 = vmatmul.mubr.msk.f32.vlgmr.msra.gmra.mxu0 %vm1574_vm5, %v5423_v18 }
 0xe58   : > { %v5424_v41 = vmax.f32 %v5394_v21, 0.0  ;;  %v5409_v58 = vadd.f32 %v7204_v39, %v6525_v27 }
 0xe59   : > { %v5403_v17 = vpop.f32.mrf.mxu0 }
 0xe5a   : > { %v5404_v29 = vadd.f32 %v6525_v27, %v5403_v17  ;;  %7227 = vmatprep.mubr.msk.f32.mxu0 %vm1574_vm5, %v5424_v41  ;;  %v5427_v12 = vmax.f32 %v5409_v58, 0.0 }
 0xe5b   : > { %v7207_v0 = vpop.f32.mrf.mxu0  ;;  %7228 = vmatmul.mubr.msk.f32.gmra.mxu0 %vm1574_vm5, %v5425_v13 }
 0xe5c   : > { %v5426_v61 = vmax.f32 %v5404_v29, 0.0  ;;  %v5419_v52 = vadd.f32 %v7207_v0, %v6525_v27 }
 0xe5d   : > { %v5413_v42 = vpop.f32.mrf.mxu0 }
 0xe5e   : > { %v5414_v62 = vadd.f32 %v6525_v27, %v5413_v42  ;;  %7230 = vmatprep.mubr.msk.f32.mxu0 %vm1574_vm5, %v5426_v61  ;;  %v5429_v16 = vmax.f32 %v5419_v52, 0.0 }
 0xe5f   : > { %7231 = vmatmul.mubr.msk.f32.gmra.mxu0 %vm1574_vm5, %v5427_v12 }
 0xe60   : > { %v5428_v38 = vmax.f32 %v5414_v62, 0.0 }
 0xe62   : > { %7233 = vmatprep.mubr.msk.f32.mxu0 %vm1574_vm5, %v5428_v38 }
 0xe63   : > { %7234 = vmatmul.mubr.msk.f32.gmra.mxu0 %vm1574_vm5, %v5429_v16 }
 0xf0c   : > { %v5276_v3 = vpop.f32.mrf.mxu1 }
 0xf0d   : > { %v5277_v25 = vadd.f32 %v6518_v63, %v5276_v3 }
 0xf0e   : > { %v7187_v11 = vpop.f32.mrf.mxu1 }
 0xf0f   : > { %v5576_v56 = vadd.f32 %v5277_v25, %v8912_v10 }
 0xf11   : > { %v5581_v31 = vsel %vm2113_vm6, %v5576_v56, 0.0 }
 0xf12   : > { %5582 = vadd.xlane.f32.xlu0 %v5581_v31 }
 0xf17   : > { %v7226_v5 = vpop.f32.mrf.mxu0 }
 0xf18   : > { %v5543_v23 = vadd.f32 %v7226_v5, %v6543_v26 }
 0xf19   : > { %v5537_v54 = vpop.f32.mrf.mxu0 }
 0xf1a   : > { %v5538_v46 = vadd.f32 %v6543_v26, %v5537_v54  ;;  %v5609_v44 = vadd.f32 %v5543_v23, %v8928_v53 }
 0xf1b   : > { %v7229_v20 = vpop.f32.mrf.mxu0 }
 0xf1c   : > { %v5553_v7 = vadd.f32 %v7229_v20, %v6543_v26  ;;  %v5623_v51 = vsel %vm2113_vm6, %v5609_v44, 0.0  ;;  %v5608_v2 = vadd.f32 %v5538_v46, %v8915_v24 }
 0xf1d   : > { %5624 = vadd.xlane.f32.xlu0 %v5623_v51  ;;  %v5547_v6 = vpop.f32.mrf.mxu0 }
 0xf1e   : > { %v5548_v37 = vadd.f32 %v6543_v26, %v5547_v6  ;;  %v5620_v10 = vsel %vm2113_vm6, %v5608_v2, 0.0  ;;  %v5611_v47 = vadd.f32 %v5553_v7, %v8938_v32 }
 0xf1f   : > { %v7232_v14 = vpop.f32.mrf.mxu0  ;;  %5621 = vadd.xlane.f32.xlu1 %v5620_v10 }
 0xf20   : > { %v5563_v4 = vadd.f32 %v7232_v14, %v6543_v26  ;;  %v5629_v28 = vsel %vm2113_vm6, %v5611_v47, 0.0  ;;  %v5610_v53 = vadd.f32 %v5548_v37, %v8931_v45 }
 0xf21   : > { %5630 = vadd.xlane.f32.xlu0 %v5629_v28  ;;  %v5557_v15 = vpop.f32.mrf.mxu0  ;;  %v5754_v28 = vld [vmem:[%s9374_s1 + $0x10] sm:$0xff] }
 0xf22   : > { %v5558_v40 = vadd.f32 %v6543_v26, %v5557_v15  ;;  %v5626_v9 = vsel %vm2113_vm6, %v5610_v53, 0.0  ;;  %v5613_v24 = vadd.f32 %v5563_v4, %v8947_v22  ;;  %v5755_v4 = vld [vmem:[%s9373_s26 + $0x18] sm:$0xff]  ;;  %v5752_v15 = vld [vmem:[%s9374_s1] sm:$0xff]  ;;  %s9377_s26 = sld [smem:[#allocation34_spill]] }
 0xf23   : > { %5627 = vadd.xlane.f32.xlu1 %v5626_v9  ;;  %v7235_v43 = vpop.f32.mrf.mxu0  ;;  %7237 = vmatpush3.msra.mxu1 %v5755_v4 }
 0xf24   : > { %v5573_v35 = vadd.f32 %v7235_v43, %v6543_v26  ;;  %v5635_v48 = vsel %vm2113_vm6, %v5613_v24, 0.0  ;;  %v5612_v32 = vadd.f32 %v5558_v40, %v8941_v59  ;;  %7238 = vmatprep.subr.mxu1 %v7678_v1  ;;  %v5849_v40 = vld [vmem:[%s9375_s22 + $0x18] sm:$0xff] }
 0xf25   : > { %5636 = vadd.xlane.f32.xlu0 %v5635_v48  ;;  %v5567_v49 = vpop.f32.mrf.mxu0  ;;  %7239 = vmatpush3.msra.mxu1 %v5754_v28 }
 0xf26   : > { %v5568_v27 = vadd.f32 %v6543_v26, %v5567_v49  ;;  %v5632_v57 = vsel %vm2113_vm6, %v5612_v32, 0.0  ;;  %v5615_v45 = vadd.f32 %v5573_v35, %v8955_v8  ;;  %7240 = vmatprep.subr.mxu1 %v7678_v1 }
 0xf27   : > { %5633 = vadd.xlane.f32.xlu1 %v5632_v57 }
 0xf28   : > { %v5641_v50 = vsel %vm2113_vm6, %v5615_v45, 0.0  ;;  %v5614_v55 = vadd.f32 %v5568_v27, %v8949_v30 }
 0xf29   : > { %5642 = vadd.xlane.f32.xlu0 %v5641_v50 }
 0xf2a   : > { %v5638_v22 = vsel %vm2113_vm6, %v5614_v55, 0.0 }
 0xf2b   : > { %5639 = vadd.xlane.f32.xlu1 %v5638_v22 }
 0xf9b   : > { %v5583_v34 = vpop.xlane.xlu0 %5582 }
 0xf9c   : > { %v5584_v33 = vmul.f32 0.03125, %v5583_v34 }
 0xf9e   : > { %v9005_v19 = vsub.f32 %v5576_v56, %v5584_v33  ;;  %v6554_v33 = vld [vmem:[%s9366_s0 + $0x1] ss:$0 sm:$0xff] }
 0xfa0   : > { %v5586_v59 = vmul.f32 %v9005_v19, %v9005_v19 }
 0xfa2   : > { %v5587_v18 = vsel %vm2113_vm6, %v5586_v59, 0.0 }
 0xfa3   : > { %5588 = vadd.xlane.f32.xlu1 %v5587_v18 }
 0xfa6   : > { %v5625_v8 = vpop.xlane.xlu0 %5624 }
 0xfa7   : > { %v5645_v36 = vmul.f32 0.03125, %v5625_v8 }
 0xfa8   : > { %v5622_v60 = vpop.xlane.xlu1 %5621 }
 0xfa9   : > { %v9010_v21 = vsub.f32 %v5609_v44, %v5645_v36  ;;  %v5644_v30 = vmul.f32 0.03125, %v5622_v60  ;;  %v6555_v60 = vld [vmem:[%s9377_s26 + $0x1] ss:$0 sm:$0xff] }
 0xfaa   : > { %v5631_v39 = vpop.xlane.xlu0 %5630 }
 0xfab   : > { %v9012_v41 = vsub.f32 %v5608_v2, %v5644_v30  ;;  %v5647_v13 = vmul.f32 0.03125, %v5631_v39  ;;  %v5661_v58 = vmul.f32 %v9010_v21, %v9010_v21 }
 0xfac   : > { %v5628_v17 = vpop.xlane.xlu1 %5627 }
 0xfad   : > { %v9016_v29 = vsub.f32 %v5611_v47, %v5647_v13  ;;  %v5646_v0 = vmul.f32 0.03125, %v5628_v17  ;;  %v5671_v61 = vsel %vm2113_vm6, %v5661_v58, 0.0  ;;  %v5660_v12 = vmul.f32 %v9012_v41, %v9012_v41 }
 0xfae   : > { %v5637_v52 = vpop.xlane.xlu0 %5636  ;;  %5672 = vadd.xlane.f32.xlu1 %v5671_v61 }
 0xfaf   : > { %v9021_v42 = vsub.f32 %v5610_v53, %v5646_v0  ;;  %v5649_v62 = vmul.f32 0.03125, %v5637_v52  ;;  %v5668_v38 = vsel %vm2113_vm6, %v5660_v12, 0.0  ;;  %v5663_v16 = vmul.f32 %v9016_v29, %v9016_v29  ;;  %v5753_v53 = vld [vmem:[%s9374_s1 + $0x8] sm:$0xff]  ;;  %s9059_s1 = sand.u32 1, %s7621_s23  }
 0xfb0   : > { %v5634_v63 = vpop.xlane.xlu1 %5633  ;;  %5669 = vadd.xlane.f32.xlu0 %v5668_v38  ;;  %7241 = vmatpush3.msra.mxu1 %v5753_v53  ;;  %s6328_s22 = sshll.u32 %s9059_s1, 3  ;;  %s6329_s26 = sshll.u32 %s9059_s1, 6 }
 0xfb1   : > { %v9026_v3 = vsub.f32 %v5613_v24, %v5649_v62  ;;  %v5648_v25 = vmul.f32 0.03125, %v5634_v63  ;;  %v5677_v11 = vsel %vm2113_vm6, %v5663_v16, 0.0  ;;  %v5662_v56 = vmul.f32 %v9021_v42, %v9021_v42  ;;  %7242 = vmatprep.subr.mxu1 %v7678_v1  ;;  %s9067_s0 = scalar_lea.vmem [#allocation2], %s6328_s22  ;;  %v5847_v16 = vld [vmem:[%s9376_s2 + $0x8] sm:$0xff]  ;;  %s9080_s22 = scalar_lea.vmem [#allocation4], %s6329_s26 }
 0xfb2   : > { %v5643_v31 = vpop.xlane.xlu0 %5642  ;;  %5678 = vadd.xlane.f32.xlu1 %v5677_v11  ;;  %7243 = vmatpush3.msra.mxu1 %v5752_v15  ;;  %s9378_s26 = sld [smem:[#allocation46_spill]]  ;;  %s6103_s6 = sshll.u32 %s9067_s0, 4  ;;  %s6104_s6 = int_to_ptr.vmem [resolvable:$true] %s6103_s6 }
 0xfb3   : > { %v9031_v26 = vsub.f32 %v5612_v32, %v5648_v25  ;;  %v5651_v5 = vmul.f32 0.03125, %v5643_v31  ;;  %v5674_v23 = vsel %vm2113_vm6, %v5662_v56, 0.0  ;;  %v5665_v54 = vmul.f32 %v9026_v3, %v9026_v3  ;;  %7247 = vmatprep.subr.mxu1 %v5849_v40  ;;  %v5846_v25 = vld [vmem:[%s9376_s2] sm:$0xff]  ;;  %s6076_s8 = scalar_lea.sflag [#allocation3], %s9059_s1  ;;  %s7539_s9 = scalar_lea.vmem %s6104_s6, 128 }
 0xfb4   : > { %5675 = vadd.xlane.f32.xlu0 %v5674_v23  ;;  %v5640_v46 = vpop.xlane.xlu1 %5639  ;;  %v6558_v56 = vld [vmem:[%s9369_s7 + $0x1] ss:$0 sm:$0xff]  ;;  %p7540_p11 = scmp.ne.s32.totalorder %s6104_s6, %s7539_s9  ;;  %p7546_p0 = scmp.lt.s32.totalorder %s6104_s6, %s7544_s11 }
 0xfb5   : > { %v9036_v44 = vsub.f32 %v5615_v45, %v5651_v5  ;;  %v5650_v20 = vmul.f32 0.03125, %v5640_v46  ;;  %v5683_v7 = vsel %vm2113_vm6, %v5665_v54, 0.0  ;;  %v5664_v51 = vmul.f32 %v9031_v26, %v9031_v26  ;;  %v6559_v23 = vld [vmem:[%s9371_s27 + $0x1] ss:$0 sm:$0xff]  ;;  %p7547_p1 = scmp.lt.s32.totalorder %s7545_s12, %s7539_s9 }
 0xfb6   : > { %5684 = vadd.xlane.f32.xlu1 %v5683_v7  ;;  %p7541_p12 = pnand %p7540_p11, %p7968_p5 }
 0xfb7   : > { %v9041_v2 = vsub.f32 %v5614_v55, %v5650_v20  ;;  %v5680_v6 = vsel %vm2113_vm6, %v5664_v51, 0.0  ;;  %v5667_v37 = vmul.f32 %v9036_v44, %v9036_v44  ;;  %p7548_p2 = por %p7547_p1, %p7546_p0 }
 0xfb8   : > { %5681 = vadd.xlane.f32.xlu0 %v5680_v6  ;;  %p7542_p13 = pneg %p7541_p12 }
 0xfb9   : > { %v5689_v10 = vsel %vm2113_vm6, %v5667_v37, 0.0  ;;  %v5666_v47 = vmul.f32 %v9041_v2, %v9041_v2 }
 0xfba   : > { %5690 = vadd.xlane.f32.xlu1 %v5689_v10  ;;  %p7549_p3 = pnand %p7548_p2, %p7542_p13 }
 0xfbb   : > { %v5686_v14 = vsel %vm2113_vm6, %v5666_v47, 0.0 }
 0xfbc   : > { %5687 = vadd.xlane.f32.xlu0 %v5686_v14 }
0x102c   : > { %v5589_v9 = vpop.xlane.xlu1 %5588 }
0x102d   : > { %v5590_v24 = vmul.f32 0.03125, %v5589_v9 }
0x102f   : > { %v5591_v43 = vadd.f32 1e-05, %v5590_v24 }
0x1031   : > { %7485 = vrsqrt.f32 %v5591_v43 }
0x1037   : > { %v5673_v35 = vpop.xlane.xlu1 %5672 }
0x1038   : > { %v5693_v48 = vmul.f32 0.03125, %v5673_v35 }
0x1039   : > { %v5670_v32 = vpop.xlane.xlu0 %5669 }
0x103a   : > { %v5701_v49 = vadd.f32 1e-05, %v5693_v48  ;;  %v5692_v27 = vmul.f32 0.03125, %v5670_v32 }
0x103b   : > { %v5679_v57 = vpop.xlane.xlu1 %5678 }
0x103c   : > { %7487 = vrsqrt.f32 %v5701_v49  ;;  %v5700_v45 = vadd.f32 1e-05, %v5692_v27  ;;  %v5695_v1 = vmul.f32 0.03125, %v5679_v57 }
0x103d   : > { %v5676_v50 = vpop.xlane.xlu0 %5675 }
0x103e   : > { %v7486_v55 = vpop.eup %7485  ;;  %7489 = vrsqrt.f32 %v5700_v45  ;;  %v5703_v22 = vadd.f32 1e-05, %v5695_v1  ;;  %v5694_v34 = vmul.f32 0.03125, %v5676_v50 }
0x103f   : > { %v5593_v59 = vmul.f32 %v7486_v55, %v9005_v19  ;;  %v5685_v18 = vpop.xlane.xlu1 %5684  ;;  %v5848_v19 = vld [vmem:[%s9376_s2 + $0x10] sm:$0xff]  ;;  %s9379_s2 = sld [smem:[#allocation48_spill]] }
0x1040   : > { %7491 = vrsqrt.f32 %v5703_v22  ;;  %v5702_v8 = vadd.f32 1e-05, %v5694_v34  ;;  %v5697_v36 = vmul.f32 0.03125, %v5685_v18 }
0x1041   : > { %v5682_v30 = vpop.xlane.xlu0 %5681  ;;  %v5600_v39 = vmul.f32 %v6554_v33, %v5593_v59 }
0x1042   : > { %7493 = vrsqrt.f32 %v5702_v8  ;;  %v5705_v13 = vadd.f32 1e-05, %v5697_v36  ;;  %v5696_v58 = vmul.f32 0.03125, %v5682_v30 }
0x1043   : > { %v5691_v17 = vpop.xlane.xlu1 %5690  ;;  %v5607_v0 = vadd.f32 %v6555_v60, %v5600_v39 }
0x1044   : > { %7495 = vrsqrt.f32 %v5705_v13  ;;  %v5704_v61 = vadd.f32 1e-05, %v5696_v58  ;;  %v5699_v12 = vmul.f32 0.03125, %v5691_v17 }
0x1045   : > { %v5688_v52 = vpop.xlane.xlu0 %5687  ;;  %7245 = vmatmul.mubr.msk.f32.vlgmr.msra.gmra.mxu1 %vm2113_vm6, %v5607_v0  ;;  %6066 = vst.msk [vmem:[%s9067_s0] sm:$0xff] %vm2113_vm6, %v5607_v0  ;;  %v6562_v1 = vld [vmem:[%s9379_s2] ss:$0 sm:$0xff]  ;;  %s9380_s2 = sld [smem:[#allocation55_spill]] }
0x1046   : > { %7497 = vrsqrt.f32 %v5704_v61  ;;  %v5707_v62 = vadd.f32 1e-05, %v5699_v12  ;;  %v5698_v38 = vmul.f32 0.03125, %v5688_v52  ;;  %7248 = vmatpush3.msra.mxu1 %v5849_v40 }
0x1047   : > { %7249 = vmatprep.subr.mxu1 %v5848_v19 }
0x1048   : > { %7499 = vrsqrt.f32 %v5707_v62  ;;  %v5706_v63 = vadd.f32 1e-05, %v5698_v38  ;;  %7250 = vmatpush3.msra.mxu1 %v5848_v19 }
0x1049   : > { %v7488_v11 = vpop.eup %7487  ;;  %7251 = vmatprep.subr.mxu1 %v5847_v16 }
0x104a   : > { %v5717_v31 = vmul.f32 %v7488_v11, %v9010_v21  ;;  %7501 = vrsqrt.f32 %v5706_v63  ;;  %7252 = vmatpush3.msra.mxu1 %v5847_v16 }
0x104b   : > { %v7490_v5 = vpop.eup %7489  ;;  %7253 = vmatprep.subr.mxu1 %v5846_v25  ;;  %s6573_s5 = sshll.u32 %s9380_s2, 7 }
0x104c   : > { %7254 = vmatpush3.msra.mxu1 %v5846_v25  ;;  %v5716_v54 = vmul.f32 %v7490_v5, %v9012_v41  ;;  %v5731_v46 = vmul.f32 %v6558_v56, %v5717_v31 }
0x104d   : > { %v7492_v20 = vpop.eup %7491 }
0x104e   : > { %v5730_v7 = vmul.f32 %v6558_v56, %v5716_v54  ;;  %v5745_v51 = vadd.f32 %v6559_v23, %v5731_v46  ;;  %v5719_v6 = vmul.f32 %v7492_v20, %v9016_v29 }
0x104f   : > { %v7494_v37 = vpop.eup %7493 }
0x1050   : > { %v5744_v10 = vadd.f32 %v6559_v23, %v5730_v7  ;;  %v5718_v47 = vmul.f32 %v7494_v37, %v9021_v42  ;;  %v5733_v21 = vmul.f32 %v6558_v56, %v5719_v6  ;;  %6068 = vst.msk [vmem:[%s9080_s22 + $0x8] sm:$0xff] %vm2113_vm6, %v5745_v51 }
0x1051   : > { %v7496_v14 = vpop.eup %7495 }
0x1052   : > { %7255 = vmatprep.mubr.msk.f32.mxu1 %vm2113_vm6, %v5744_v10  ;;  %v5732_v41 = vmul.f32 %v6558_v56, %v5718_v47  ;;  %v5747_v4 = vadd.f32 %v6559_v23, %v5733_v21  ;;  %v5721_v29 = vmul.f32 %v7496_v14, %v9026_v3  ;;  %6067 = vst.msk [vmem:[%s9080_s22] sm:$0xff] %vm2113_vm6, %v5744_v10 }
0x1053   : > { %v7498_v28 = vpop.eup %7497  ;;  %7256 = vmatmul.mubr.msk.f32.vlgmr.msra.gmra.mxu1 %vm2113_vm6, %v5745_v51 }
0x1054   : > { %v5746_v42 = vadd.f32 %v6559_v23, %v5732_v41  ;;  %v5720_v53 = vmul.f32 %v7498_v28, %v9031_v26  ;;  %v5735_v15 = vmul.f32 %v6558_v56, %v5721_v29  ;;  %6070 = vst.msk [vmem:[%s9080_s22 + $0x18] sm:$0xff] %vm2113_vm6, %v5747_v4 }
0x1055   : > { %v7500_v40 = vpop.eup %7499 }
0x1056   : > { %7258 = vmatprep.mubr.msk.f32.mxu1 %vm2113_vm6, %v5746_v42  ;;  %v5734_v9 = vmul.f32 %v6558_v56, %v5720_v53  ;;  %v5749_v24 = vadd.f32 %v6559_v23, %v5735_v15  ;;  %v5723_v3 = vmul.f32 %v7500_v40, %v9036_v44  ;;  %6069 = vst.msk [vmem:[%s9080_s22 + $0x10] sm:$0xff] %vm2113_vm6, %v5746_v42 }
0x1057   : > { %v7502_v43 = vpop.eup %7501  ;;  %7259 = vmatmul.mubr.msk.f32.gmra.mxu1 %vm2113_vm6, %v5747_v4 }
0x1058   : > { %v5748_v26 = vadd.f32 %v6559_v23, %v5734_v9  ;;  %v5722_v35 = vmul.f32 %v7502_v43, %v9041_v2  ;;  %v5737_v48 = vmul.f32 %v6558_v56, %v5723_v3  ;;  %6072 = vst.msk [vmem:[%s9080_s22 + $0x28] sm:$0xff] %vm2113_vm6, %v5749_v24  ;;  %v6560_v2 = vld [vmem:[%s9378_s26] ss:$0 sm:$0xff]  ;;  %s9381_s26 = sld [smem:[#allocation49_spill]] }
0x105a   : > { %7261 = vmatprep.mubr.msk.f32.mxu1 %vm2113_vm6, %v5748_v26  ;;  %v5736_v32 = vmul.f32 %v6558_v56, %v5722_v35  ;;  %v5751_v49 = vadd.f32 %v6559_v23, %v5737_v48  ;;  %6071 = vst.msk [vmem:[%s9080_s22 + $0x20] sm:$0xff] %vm2113_vm6, %v5748_v26 }
0x105b   : > { %7262 = vmatmul.mubr.msk.f32.gmra.mxu1 %vm2113_vm6, %v5749_v24 }
0x105c   : > { %v5750_v44 = vadd.f32 %v6559_v23, %v5736_v32  ;;  %6074 = vst.msk [vmem:[%s9080_s22 + $0x38] sm:$0xff] %vm2113_vm6, %v5751_v49 }
0x105e   : > { %7264 = vmatprep.mubr.msk.f32.mxu1 %vm2113_vm6, %v5750_v44  ;;  %6073 = vst.msk [vmem:[%s9080_s22 + $0x30] sm:$0xff] %vm2113_vm6, %v5750_v44  ;;  %s9382_s3 = smov %s9381_s26  ;;  %s6101_s7 = scalar_lea.hbm %s9381_s26, %s6573_s5 }
0x105f   : > { %7265 = vmatmul.mubr.msk.f32.gmra.mxu1 %vm2113_vm6, %v5751_v49 }
0x1105   : > { %v5832_v27 = vpop.f32.mrf.mxu1 }
0x1106   : > { %v5833_v57 = vadd.f32 %v6560_v2, %v5832_v27 }
0x1107   : > { %v7246_v45 = vpop.f32.mrf.mxu1 }
0x1108   : > { %5836 = vmax.xlane.f32.xlu0 %v5833_v57 }
0x1113   : > { %v7257_v50 = vpop.f32.mrf.mxu1 }
0x1114   : > { %v5953_v55 = vadd.f32 %v7257_v50, %v6562_v1 }
0x1115   : > { %v5947_v22 = vpop.f32.mrf.mxu1 }
0x1116   : > { %v5948_v34 = vadd.f32 %v6562_v1, %v5947_v22  ;;  %5988 = vmax.xlane.f32.xlu0 %v5953_v55 }
0x1117   : > { %v7260_v33 = vpop.f32.mrf.mxu1 }
0x1118   : > { %v5963_v59 = vadd.f32 %v7260_v33, %v6562_v1  ;;  %5986 = vmax.xlane.f32.xlu1 %v5948_v34 }
0x1119   : > { %v5957_v18 = vpop.f32.mrf.mxu1 }
0x111a   : > { %v5958_v8 = vadd.f32 %v6562_v1, %v5957_v18  ;;  %5992 = vmax.xlane.f32.xlu0 %v5963_v59 }
0x111b   : > { %v7263_v36 = vpop.f32.mrf.mxu1 }
0x111c   : > { %v5973_v60 = vadd.f32 %v7263_v36, %v6562_v1  ;;  %5990 = vmax.xlane.f32.xlu1 %v5958_v8 }
0x111d   : > { %v5967_v30 = vpop.f32.mrf.mxu1 }
0x111e   : > { %v5968_v39 = vadd.f32 %v6562_v1, %v5967_v30  ;;  %5996 = vmax.xlane.f32.xlu0 %v5973_v60 }
0x111f   : > { %v7266_v13 = vpop.f32.mrf.mxu1 }
0x1120   : > { %v5983_v58 = vadd.f32 %v7266_v13, %v6562_v1  ;;  %5994 = vmax.xlane.f32.xlu1 %v5968_v39 }
0x1121   : > { %v5977_v17 = vpop.f32.mrf.mxu1 }
0x1122   : > { %v5978_v0 = vadd.f32 %v6562_v1, %v5977_v17  ;;  %6000 = vmax.xlane.f32.xlu0 %v5983_v58 }
0x1124   : > { %5998 = vmax.xlane.f32.xlu1 %v5978_v0 }
0x1191   : > { %v5837_v61 = vpop.xlane.xlu0 %5836 }
0x1192   : > { %v5838_v12 = vsub.f32 %v5833_v57, %v5837_v61 }
0x1194   : > { %v5839_v19 = vmul.f32 1.442695, %v5838_v12 }
0x1196   : > { %7503 = vpow2.f32 %v5839_v19 }
0x119f   : > { %v5989_v52 = vpop.xlane.xlu0 %5988 }
0x11a0   : > { %v6003_v62 = vsub.f32 %v5953_v55, %v5989_v52 }
0x11a1   : > { %v5987_v38 = vpop.xlane.xlu1 %5986 }
0x11a2   : > { %v6012_v16 = vmul.f32 1.442695, %v6003_v62  ;;  %v6002_v63 = vsub.f32 %v5948_v34, %v5987_v38 }
0x11a3   : > { %v9112_v25 = vpop.eup %7503  ;;  %v5993_v11 = vpop.xlane.xlu0 %5992 }
0x11a4   : > { %7505 = vpow2.f32 %v6012_v16  ;;  %v6010_v56 = vmul.f32 1.442695, %v6002_v63  ;;  %v6005_v31 = vsub.f32 %v5963_v59, %v5993_v11  ;;  %5841 = vadd.xlane.f32.xlu1 %v9112_v25 }
0x11a5   : > { %v5991_v5 = vpop.xlane.xlu1 %5990 }
0x11a6   : > { %7507 = vpow2.f32 %v6010_v56  ;;  %v6016_v23 = vmul.f32 1.442695, %v6005_v31  ;;  %v6004_v54 = vsub.f32 %v5958_v8, %v5991_v5 }
0x11a7   : > { %v5997_v46 = vpop.xlane.xlu0 %5996 }
0x11a8   : > { %7509 = vpow2.f32 %v6016_v23  ;;  %v6014_v20 = vmul.f32 1.442695, %v6004_v54  ;;  %v6007_v7 = vsub.f32 %v5973_v60, %v5997_v46 }
0x11a9   : > { %v5995_v51 = vpop.xlane.xlu1 %5994 }
0x11aa   : > { %7511 = vpow2.f32 %v6014_v20  ;;  %v6020_v6 = vmul.f32 1.442695, %v6007_v7  ;;  %v6006_v37 = vsub.f32 %v5968_v39, %v5995_v51 }
0x11ab   : > { %v6001_v10 = vpop.xlane.xlu0 %6000 }
0x11ac   : > { %7513 = vpow2.f32 %v6020_v6  ;;  %v6018_v47 = vmul.f32 1.442695, %v6006_v37  ;;  %v6009_v21 = vsub.f32 %v5983_v58, %v6001_v10 }
0x11ad   : > { %v5999_v14 = vpop.xlane.xlu1 %5998 }
0x11ae   : > { %7515 = vpow2.f32 %v6018_v47  ;;  %v6024_v41 = vmul.f32 1.442695, %v6009_v21  ;;  %v6008_v4 = vsub.f32 %v5978_v0, %v5999_v14 }
0x11b0   : > { %7517 = vpow2.f32 %v6024_v41  ;;  %v6022_v29 = vmul.f32 1.442695, %v6008_v4 }
0x11b1   : > { %v9115_v28 = vpop.eup %7505 }
0x11b2   : > { %7519 = vpow2.f32 %v6022_v29  ;;  %6028 = vadd.xlane.f32.xlu1 %v9115_v28 }
0x11b3   : > { %v9118_v42 = vpop.eup %7507 }
0x11b4   : > { %6026 = vadd.xlane.f32.xlu0 %v9118_v42 }
0x11b5   : > { %v9121_v53 = vpop.eup %7509 }
0x11b6   : > { %6032 = vadd.xlane.f32.xlu1 %v9121_v53 }
0x11b7   : > { %v9124_v15 = vpop.eup %7511 }
0x11b8   : > { %6030 = vadd.xlane.f32.xlu0 %v9124_v15 }
0x11b9   : > { %v9127_v40 = vpop.eup %7513 }
0x11ba   : > { %6036 = vadd.xlane.f32.xlu1 %v9127_v40 }
0x11bb   : > { %v9130_v9 = vpop.eup %7515 }
0x11bc   : > { %6034 = vadd.xlane.f32.xlu0 %v9130_v9 }
0x11bd   : > { %v9133_v24 = vpop.eup %7517 }
0x11be   : > { %6040 = vadd.xlane.f32.xlu1 %v9133_v24 }
0x11bf   : > { %v9136_v3 = vpop.eup %7519 }
0x11c0   : > { %6038 = vadd.xlane.f32.xlu0 %v9136_v3 }
0x11c1   : > { %7552 = shalt.err (!%p7549_p3)
}
0x11c2   : > { %s7553_s13 = scalar_lea.hbm %s6101_s7, 128  ;;  %s7557_s5 = scalar_lea.hbm %s9382_s3, 256 }
0x11c3   : > { %p7554_p4 = scmp.ne.s32.totalorder %s6101_s7, %s7553_s13  ;;  %p7558_p9 = scmp.lt.s32.totalorder %s6101_s7, %s9382_s3 }
0x11c4   : > { %p7559_p10 = scmp.lt.s32.totalorder %s7557_s5, %s7553_s13 }
0x11c5   : > { %p7555_p7 = pnand %p7554_p4, %p7968_p5 }
0x11c6   : > { %p7560_p11 = por %p7559_p10, %p7558_p9 }
0x11c7   : > { %p7556_p8 = pneg %p7555_p7 }
0x11c9   : > { %p7561_p12 = pnand %p7560_p11, %p7556_p8 }
0x11cb   : > { %7564 = shalt.err (!%p7561_p12)
}
0x11cc   : > { %s9384_s9 = sld [smem:[#allocation50_spill]]  ;;  %s6116_s12 = sshll.u32 %s9080_s22, 4  ;;  %s9153_s12 = int_to_ptr.vmem [resolvable:$true] %s6116_s12 }
0x11cd   : > { %7267 = dma.vmem_to_hbm [thread:$0]  (%p7968_p5), %s6104_s6, 128, %s6101_s7, %s6076_s8  }
0x11ce   : > { %s6580_s0 = sshll.u32 %s9380_s2, 10  ;;  %s6081_s13 = scalar_lea.sflag [#allocation5], %s9059_s1 }
0x11cf   : > { %s7565_s10 = scalar_lea.vmem %s9153_s12, 1024  ;;  %s7682_s26 = smov [#allocation4]  }
0x11d0   : > { %p7566_p13 = scmp.ne.s32.totalorder %s9153_s12, %s7565_s10  ;;  %s7569_s5 = sshll.u32 %s7682_s26, 4  ;;  %s7570_s5 = int_to_ptr.vmem [resolvable:$false] %s7569_s5 }
0x11d1   : > { %s7571_s3 = scalar_lea.vmem %s7570_s5, 2048  ;;  %p7572_p2 = scmp.lt.s32.totalorder %s9153_s12, %s7570_s5 }
0x11d2   : > { %s9156_s11 = scalar_lea.hbm %s9384_s9, %s6580_s0  ;;  %p7567_p0 = pnand %p7566_p13, %p7968_p5 }
0x11d3   : > { %p7573_p3 = scmp.lt.s32.totalorder %s7571_s3, %s7565_s10 }
0x11d4   : > { %p7568_p1 = pneg %p7567_p0 }
0x11d5   : > { %p7574_p4 = por %p7573_p3, %p7572_p2 }
0x11d7   : > { %p7575_p7 = pnand %p7574_p4, %p7568_p1 }
0x11d9   : > { %7578 = shalt.err (!%p7575_p7)
}
0x11da   : > { %s7579_s8 = scalar_lea.hbm %s9156_s11, 1024  ;;  %s7583_s6 = scalar_lea.hbm %s9384_s9, 2048 }
0x11db   : > { %p7580_p8 = scmp.ne.s32.totalorder %s9156_s11, %s7579_s8  ;;  %p7584_p11 = scmp.lt.s32.totalorder %s9156_s11, %s9384_s9 }
0x11dc   : > { %p7585_p12 = scmp.lt.s32.totalorder %s7583_s6, %s7579_s8 }
0x11dd   : > { %p7581_p9 = pnand %p7580_p8, %p7968_p5 }
0x11de   : > { %p7586_p13 = por %p7585_p12, %p7584_p11 }
0x11df   : > { %p7582_p10 = pneg %p7581_p9 }
0x11e1   : > { %p7587_p0 = pnand %p7586_p13, %p7582_p10 }
0x11e3   : > { %7590 = shalt.err (!%p7587_p0)
}
0x11e4   : > { %s7683_s3 = smov 128   ;;  %s9385_s7 = sld [smem:[#allocation60_spill]] }
0x11e5   : > { %s9386_s22 = sld [smem:[#allocation51_spill]]  ;;  %s7684_s2 = smov 8  }
0x11e6   : > { %7268 = dma.vmem_to_hbm [thread:$0]  (%p7968_p5), %s9153_s12, 1024, %s9156_s11, %s6081_s13, %s7683_s3, %s7683_s3, %s7684_s2  }
0x11e7   : > { %s9388_s26 = sld [smem:[#allocation52_spill]] }
0x11ea   : > { %s9387_s0 = sshll.u32 %s9385_s7, 3  ;;  %s6579_s4 = sshll.u32 %s9385_s7, 6 }
0x11eb   : > { %s1449_s10 = scalar_lea.vmem %s9386_s22, %s9387_s0 }
0x11ed   : > { %s1454_s1 = scalar_lea.vmem %s9388_s26, %s6579_s4 }
0x122d   : > { %v5842_v43 = vpop.xlane.xlu1 %5841 }
0x122e   : > { %7521 = vrcp.f32 %v5842_v43 }
0x123b   : > { %v7522_v26 = vpop.eup %7521  ;;  %v6029_v35 = vpop.xlane.xlu1 %6028 }
0x123c   : > { %v5844_v48 = vmul.f32 %v7522_v26, %v9112_v25  ;;  %7523 = vrcp.f32 %v6029_v35 }
0x123d   : > { %v6027_v32 = vpop.xlane.xlu0 %6026 }
0x123e   : > { %5845 = vst [vmem:[%s1449_s10] sm:$0xff] %v5844_v48  ;;  %7525 = vrcp.f32 %v6027_v32 }
0x123f   : > { %v6033_v49 = vpop.xlane.xlu1 %6032 }
0x1240   : > { %7527 = vrcp.f32 %v6033_v49 }
0x1241   : > { %v6031_v44 = vpop.xlane.xlu0 %6030 }
0x1242   : > { %7529 = vrcp.f32 %v6031_v44 }
0x1243   : > { %v6037_v2 = vpop.xlane.xlu1 %6036 }
0x1244   : > { %7531 = vrcp.f32 %v6037_v2 }
0x1245   : > { %v6035_v27 = vpop.xlane.xlu0 %6034 }
0x1246   : > { %7533 = vrcp.f32 %v6035_v27 }
0x1247   : > { %v6041_v57 = vpop.xlane.xlu1 %6040 }
0x1248   : > { %7535 = vrcp.f32 %v6041_v57 }
0x1249   : > { %v7524_v45 = vpop.eup %7523  ;;  %v6039_v1 = vpop.xlane.xlu0 %6038 }
0x124a   : > { %v6045_v50 = vmul.f32 %v7524_v45, %v9115_v28  ;;  %7537 = vrcp.f32 %v6039_v1 }
0x124b   : > { %v7526_v55 = vpop.eup %7525 }
0x124c   : > { %6059 = vst [vmem:[%s1454_s1 + $0x8] sm:$0xff] %v6045_v50  ;;  %v6043_v22 = vmul.f32 %v7526_v55, %v9118_v42 }
0x124d   : > { %v7528_v34 = vpop.eup %7527 }
0x124e   : > { %6058 = vst [vmem:[%s1454_s1] sm:$0xff] %v6043_v22  ;;  %v6049_v33 = vmul.f32 %v7528_v34, %v9121_v53 }
0x124f   : > { %v7530_v59 = vpop.eup %7529 }
0x1250   : > { %6061 = vst [vmem:[%s1454_s1 + $0x18] sm:$0xff] %v6049_v33  ;;  %v6047_v18 = vmul.f32 %v7530_v59, %v9124_v15 }
0x1251   : > { %v7532_v8 = vpop.eup %7531 }
0x1252   : > { %6060 = vst [vmem:[%s1454_s1 + $0x10] sm:$0xff] %v6047_v18  ;;  %v6053_v36 = vmul.f32 %v7532_v8, %v9127_v40 }
0x1253   : > { %v7534_v60 = vpop.eup %7533 }
0x1254   : > { %6063 = vst [vmem:[%s1454_s1 + $0x28] sm:$0xff] %v6053_v36  ;;  %v6051_v30 = vmul.f32 %v7534_v60, %v9130_v9 }
0x1255   : > { %v7536_v39 = vpop.eup %7535 }
0x1256   : > { %6062 = vst [vmem:[%s1454_s1 + $0x20] sm:$0xff] %v6051_v30  ;;  %v6057_v13 = vmul.f32 %v7536_v39, %v9133_v24 }
0x1257   : > { %v7538_v58 = vpop.eup %7537 }
0x1258   : > { %6065 = vst [vmem:[%s1454_s1 + $0x38] sm:$0xff] %v6057_v13  ;;  %v6055_v17 = vmul.f32 %v7538_v58, %v9136_v3 }
0x125a   : > { %6064 = vst [vmem:[%s1454_s1 + $0x30] sm:$0xff] %v6055_v17 }
0x125b PF: > { %s9389_s12 = sld [smem:[#allocation53_spill]]  ;;  %p7278_p5 = scmp.ge.s32.totalorder %s7629_s28, 2 }
0x125d   : > { %p7272_p1 = pnand %p7278_p5, %p7972_p6 }
0x125f   : > { %p7273_p2 = pneg %p7272_p1 }
0x1261   : > { %s6137_s13 = sand.u32 1, %s9389_s12  }
0x1262   : > { %s6138_s5 = scalar_lea.sflag [#allocation3], %s6137_s13 }
0x1263   : > { %7608 = dma.done.wait (%p7273_p2), %s6138_s5, 128  }
0x1264   : > { %7610 = vsyncadd (%p7273_p2), %s6138_s5, 4294967168  ;;  %s6147_s8 = scalar_lea.sflag [#allocation5], %s6137_s13 }
0x1265   : > { %7612 = dma.done.wait (%p7273_p2), %s6147_s8, 1024  }
0x1266   : > { %7614 = vsyncadd (%p7273_p2), %s6147_s8, 4294966272  ;;  %s9391_s28 = sld [smem:[#allocation56_spill]]  ;;  %s9394_s22 = smov %s7621_s23 }
0x1267   : > { %s9392_s6 = sld [smem:[#allocation54_spill]] }
0x1268   : > { %s9393_s26 = sld [smem:[#allocation57_spill]] }
0x126c   : > { %p109_p3 = scmp.ge.s32.totalorder %s9391_s28, 4  }
0x126d   : > { %s9395_s23 = smov %s9392_s6 }
0x126e   :  { %111 = sbr.rel (!%p109_p3) target bundleno = 118 (0x76), region = 352 }
0x1273   :  { %6167 = vsyncpa [#allocation3], 1 }
0x1274   :  { %6169 = vsyncpa [#allocation3 + $0x1], 1 }
0x1275   :  { %6170 = vsyncpa [#allocation5], 1 }
0x1276   :  { %6172 = vsyncpa [#allocation5 + $0x1], 1 }

</bundles_post_ra>
